<compile_context>
chip_gen: v6e
topology: v6e:2x2x1
jax: 0.10.0
libtpu: 0.0.40
codegen_flags: <defaults>
</compile_context>

<pallas_src>
import functools
import math

import jax
import jax.numpy as jnp
import numpy as np
from jax.experimental import pallas as pl
from jax.experimental.pallas import tpu as pltpu


# ---------------------------------------------------------------------------
# Fused kernel: conv1..conv4 (+LeakyReLU) + EqualLinear for one style chunk.
# ---------------------------------------------------------------------------
def _fused_kernel(lhs1_ref, w1_ref, b1_ref, w2_ref, b2_ref, w3_ref, b3_ref,
                  w4_ref, b4_ref, wl_ref, bl_ref, out_ref, y1_ref,
                  *, bpad, s_blk, c4):
    f32 = jnp.float32
    bf16 = jnp.bfloat16

    def leaky(v):  # nn.LeakyReLU() default negative_slope = 0.01
        return jnp.where(v > 0, v, 0.01 * v)

    def mxdot(a, b):  # bf16 x bf16 MXU matmul, f32 accumulate
        return jnp.dot(a.astype(bf16), b, preferred_element_type=f32)

    # ---- conv1 (16x16 -> 8x8): one lane-dense GEMM for the whole chunk ----
    # rows = (output block u*4+v, padded batch), cols = (style, rho, sig, oc)
    y1_ref[...] = leaky(mxdot(lhs1_ref[...], w1_ref[0]) + b1_ref[0])

    zeros_blk = jnp.zeros((bpad, c4), f32)
    y3_parts = []

    for s in range(s_blk):
        lo = s * c4
        hi = lo + c4

        # ---- conv2 (8x8 -> 4x4 on the 2x2-block grid): ONE long-K GEMM ----
        # im2col rows = (output block oa*2+ob, padded batch), K = 9 taps * c4
        rows = []
        for oa in range(2):
            for ob in range(2):
                taps = []
                for bi in range(3):
                    for bj in range(3):
                        p = 2 * oa - 1 + bi
                        q = 2 * ob - 1 + bj
                        if 0 <= p < 4 and 0 <= q < 4:
                            r0 = (p * 4 + q) * bpad
                            taps.append(y1_ref[r0:r0 + bpad, lo:hi])
                        else:
                            taps.append(zeros_blk)       # out-of-range tap
                rows.append(jnp.concatenate(taps, axis=1))
        lhs2 = jnp.concatenate(rows, axis=0)              # (4*bpad, 9*c4)
        y2 = leaky(mxdot(lhs2, w2_ref[0, s]) + b2_ref[0, :, lo:hi])

        # ---- conv3 (4x4 -> 2x2): lane-concat the 4 blocks, one long-K dot --
        lhs3 = jnp.concatenate(
            [y2[i * bpad:(i + 1) * bpad] for i in range(4)], axis=1)
        y3_parts.append(
            leaky(mxdot(lhs3, w3_ref[0, s]) + b3_ref[0, :, lo:hi]))

    # ---- conv4 (2x2 -> 1x1) + EqualLinear: block-diagonal, lane-dense ------
    y3 = jnp.concatenate(y3_parts, axis=1)                # (bpad, s_blk*c4)
    y4 = leaky(mxdot(y3, w4_ref[0]) + b4_ref[0])          # (bpad, n_pad)
    out_ref[0] = mxdot(y4, wl_ref[0]) + bl_ref[0]         # (bpad, n_pad)


# ---------------------------------------------------------------------------
# One-time (host side) parameter preparation.
# ---------------------------------------------------------------------------
def _pick_num_chunks(n_styles, max_styles_per_chunk=3):
    # 3 styles/chunk -> nc=6 for n_styles=18: balanced 3/3 across v7x's 2 TCs.
    nc = max(1, math.ceil(n_styles / max_styles_per_chunk))
    while n_styles % nc:
        nc += 1
    return nc


def prepare_params(params):
    """Rearrange module weights into the fused-kernel layout (done once)."""
    convs = params["convs"]
    assert len(convs) == 4, "fused kernel supports spatial == 16 (4 stride-2 convs)"
    # TODO(synk): generalize the block-conv cascade to spatial != 16.
    w1, b1 = (np.asarray(a, np.float32) for a in convs[0])
    w2, b2 = (np.asarray(a, np.float32) for a in convs[1])
    w3, b3 = (np.asarray(a, np.float32) for a in convs[2])
    w4, b4 = (np.asarray(a, np.float32) for a in convs[3])
    lw, lb = (np.asarray(a, np.float32) for a in params["linear"])

    n_styles, _, _, in_c, oc = w1.shape
    c4 = 4 * oc                       # channels of a 2x2 space-to-depth block
    nc = _pick_num_chunks(n_styles)   # grid steps (style chunks)
    sb = n_styles // nc               # styles per chunk
    n_feat = sb * oc
    n_pad = max(128, ((n_feat + 127) // 128) * 128)   # lane-dense output width

    # conv1: per output block (u, v) the LHS row is the 5x5xin_c padded-input
    # patch at (4u, 4v); weight column (s, rho, sigma, co) places
    # w1[s, kh, kw] at patch offset (2rho+kh, 2sig+kw).
    k_raw = 25 * in_c
    k1 = ((k_raw + 127) // 128) * 128
    blk = np.zeros((5, 5, in_c, n_styles, 2, 2, oc), np.float32)
    for kh in range(3):
        for kw in range(3):
            for r in range(2):
                for t in range(2):
                    blk[2 * r + kh, 2 * t + kw, :, :, r, t, :] = np.transpose(
                        w1[:, kh, kw, :, :], (1, 0, 2))
    w1r = np.zeros((k1, n_styles * c4), np.float32)
    w1r[:k_raw] = blk.reshape(k_raw, n_styles * c4)
    w1r = w1r.reshape(k1, nc, sb * c4).transpose(1, 0, 2)          # (nc,k1,sb*c4)
    b1r = np.tile(b1[:, None, :], (1, 4, 1)).reshape(nc, 1, sb * c4)

    # conv2/conv3: a 3x3 stride-2 conv becomes a 3x3 "block tap" conv on the
    # space-to-depth grid; channels (rho,sig,ci) -> (rho2,sig2,co).
    def block_tap_weights(w):
        eff = np.zeros((n_styles, 3, 3, 2, 2, oc, 2, 2, oc), np.float32)
        for bi in range(3):
            for bj in range(3):
                for r in range(2):
                    for t in range(2):
                        for r2 in range(2):
                            for t2 in range(2):
                                kh = 2 * bi + r - 2 * r2 - 1
                                kw = 2 * bj + t - 2 * t2 - 1
                                if 0 <= kh < 3 and 0 <= kw < 3:
                                    eff[:, bi, bj, r, t, :, r2, t2, :] = \
                                        w[:, kh, kw, :, :]
        return eff.reshape(n_styles, 3, 3, c4, c4)

    # Long-K GEMM RHS per style: (9*c4, c4) for conv2, (4*c4, c4) for conv3.
    w2r = block_tap_weights(w2).reshape(nc, sb, 9 * c4, c4)
    b2r = np.tile(b2[:, None, :], (1, 4, 1)).reshape(nc, 1, sb * c4)
    # conv3 only reads block taps bi, bj in {1, 2} (its input grid is 2x2).
    w3r = block_tap_weights(w3)[:, 1:3, 1:3].reshape(nc, sb, 4 * c4, c4)
    b3r = np.tile(b3[:, None, :], (1, 4, 1)).reshape(nc, 1, sb * c4)

    # conv4 (2x2 -> 1x1): only taps kh, kw in {1, 2} touch real data.
    w4eff = np.zeros((n_styles, 2, 2, oc, oc), np.float32)
    for r in range(2):
        for t in range(2):
            w4eff[:, r, t] = w4[:, r + 1, t + 1]
    w4eff = w4eff.reshape(n_styles, c4, oc)

    # EqualLinear (lr_mul=1): y = x @ (W * scale).T + b, scale = 1/sqrt(in_dim)
    scale = 1.0 / math.sqrt(lw.shape[-1])
    lwp = np.transpose(lw, (0, 2, 1)) * scale                      # (S, in, out)

    # conv4 + linear as per-chunk block-diagonal GEMMs, padded to n_pad lanes
    # so the per-chunk output store is a full (8, 128) unmasked vst.
    w4r = np.zeros((nc, sb * c4, n_pad), np.float32)
    wlr = np.zeros((nc, n_pad, n_pad), np.float32)
    b4r = np.zeros((nc, 1, n_pad), np.float32)
    blr = np.zeros((nc, 1, n_pad), np.float32)
    for c in range(nc):
        for j in range(sb):
            s = c * sb + j
            w4r[c, j * c4:(j + 1) * c4, j * oc:(j + 1) * oc] = w4eff[s]
            wlr[c, j * oc:(j + 1) * oc, j * oc:(j + 1) * oc] = lwp[s]
            b4r[c, 0, j * oc:(j + 1) * oc] = b4[s]
            blr[c, 0, j * oc:(j + 1) * oc] = lb[s]

    wdt = jnp.bfloat16   # weights ship as bf16 (halves HBM/DMA bytes)
    return {
        "w1": jnp.asarray(w1r, wdt), "b1": jnp.asarray(b1r, jnp.float32),
        "w2": jnp.asarray(w2r, wdt), "b2": jnp.asarray(b2r, jnp.float32),
        "w3": jnp.asarray(w3r, wdt), "b3": jnp.asarray(b3r, jnp.float32),
        "w4": jnp.asarray(w4r, wdt), "b4": jnp.asarray(b4r, jnp.float32),
        "wl": jnp.asarray(wlr, wdt), "bl": jnp.asarray(blr, jnp.float32),
    }


# ---------------------------------------------------------------------------
# Forward wrapper (jittable; `prep` is a pytree of prepared weights).
# ---------------------------------------------------------------------------
def psp_output_layer(x_nchw, prep):
    """Fused Pallas forward. x_nchw: (B, in_c, 16, 16) -> (B, n_styles, out_c)."""
    nc, k1, sbc4 = prep["w1"].shape
    sb = prep["w2"].shape[1]
    c4 = prep["w2"].shape[-1]
    oc = c4 // 4
    n_pad = prep["w4"].shape[-1]
    n_feat = sb * oc
    n_styles = nc * sb

    batch, in_c, h, w = x_nchw.shape
    assert h == 16 and w == 16, "fused kernel is specialized to spatial == 16"
    bpad = ((batch + 7) // 8) * 8     # pad block rows to the 8-row sublane tile

    # Shared input -> conv1 LHS in output-block form, batch padded to bpad
    # rows per block (built once in XLA since the input is shared by styles).
    x = jnp.transpose(x_nchw, (0, 2, 3, 1)).astype(jnp.float32)    # NHWC
    xpad = jnp.pad(x, ((0, 0), (1, 1), (1, 1), (0, 0)))
    patches = [xpad[:, 4 * u:4 * u + 5, 4 * v:4 * v + 5, :]
               for u in range(4) for v in range(4)]
    lhs1 = jnp.stack(patches, axis=0).reshape(16, batch, 25 * in_c)
    lhs1 = jnp.pad(lhs1, ((0, 0), (0, bpad - batch), (0, k1 - 25 * in_c)))
    lhs1 = lhs1.reshape(16 * bpad, k1)

    kernel = functools.partial(_fused_kernel, bpad=bpad, s_blk=sb, c4=c4)
    grid_spec = pltpu.PrefetchScalarGridSpec(
        num_scalar_prefetch=0,
        grid=(nc,),
        in_specs=[
            pl.BlockSpec((16 * bpad, k1), lambda c: (0, 0)),            # lhs1 (shared)
            pl.BlockSpec((1, k1, sbc4), lambda c: (c, 0, 0)),           # w1
            pl.BlockSpec((1, 1, sbc4), lambda c: (c, 0, 0)),            # b1
            pl.BlockSpec((1, sb, 9 * c4, c4), lambda c: (c, 0, 0, 0)),  # w2 (long-K)
            pl.BlockSpec((1, 1, sbc4), lambda c: (c, 0, 0)),            # b2
            pl.BlockSpec((1, sb, 4 * c4, c4), lambda c: (c, 0, 0, 0)),  # w3 (long-K)
            pl.BlockSpec((1, 1, sbc4), lambda c: (c, 0, 0)),            # b3
            pl.BlockSpec((1, sb * c4, n_pad), lambda c: (c, 0, 0)),     # w4 (block-diag)
            pl.BlockSpec((1, 1, n_pad), lambda c: (c, 0, 0)),           # b4
            pl.BlockSpec((1, n_pad, n_pad), lambda c: (c, 0, 0)),       # wl (block-diag)
            pl.BlockSpec((1, 1, n_pad), lambda c: (c, 0, 0)),           # bl
        ],
        out_specs=pl.BlockSpec((1, bpad, n_pad), lambda c: (c, 0, 0)),
        scratch_shapes=[
            pltpu.VMEM((16 * bpad, sbc4), jnp.float32),  # conv1 output (s2d blocks)
        ],
    )
    out = pl.pallas_call(
        kernel,
        out_shape=jax.ShapeDtypeStruct((nc, bpad, n_pad), jnp.float32),
        grid_spec=grid_spec,
        compiler_params=pltpu.CompilerParams(
            dimension_semantics=("parallel",),
            vmem_limit_bytes=32 * 1024 * 1024,
        ),
    )(lhs1, prep["w1"], prep["b1"], prep["w2"], prep["b2"], prep["w3"],
      prep["b3"], prep["w4"], prep["b4"], prep["wl"], prep["bl"])

    # (nc, bpad, n_pad) -> (B, n_styles, out_c)  (== torch.stack(latents, dim=1))
    out = out[:, :batch, :n_feat].reshape(nc, batch, sb, oc)
    return jnp.transpose(out, (1, 0, 2, 3)).reshape(batch, n_styles, oc)


# ---------------------------------------------------------------------------
# Synthetic parameters + pure-JAX reference.
# ---------------------------------------------------------------------------
def init_params(key, in_c, out_c, spatial, n_styles):
    num_pools = int(math.log2(spatial))
    params = {"convs": [], "linear": None}
    cin = in_c
    for _ in range(num_pools):
        key, kw_, kb_ = jax.random.split(key, 3)
        w = jax.random.normal(kw_, (n_styles, 3, 3, cin, out_c), jnp.float32) * 0.1
        b = jax.random.normal(kb_, (n_styles, out_c), jnp.float32) * 0.01
        params["convs"].append((w, b))
        cin = out_c
    key, kw_ = jax.random.split(key)
    lw = jax.random.normal(kw_, (n_styles, out_c, out_c), jnp.float32)
    lb = jnp.zeros((n_styles, out_c), jnp.float32)
    params["linear"] = (lw, lb)
    return params


def reference_forward(x_nchw, params):
    n_styles = params["convs"][0][0].shape[0]
    lw, lb = params["linear"]
    scale = 1.0 / math.sqrt(lw.shape[-1])
    outs = []
    for s in range(n_styles):
        h = x_nchw.astype(jnp.float32)
        for (w, b) in params["convs"]:
            ws = jnp.transpose(w[s], (3, 2, 0, 1))                 # (Cout, Cin, kh, kw)
            h = jax.lax.conv_general_dilated(
                h, ws, window_strides=(2, 2), padding=((1, 1), (1, 1)),
                dimension_numbers=("NCHW", "OIHW", "NCHW"))
            h = h + b[s].reshape(1, -1, 1, 1)
            h = jnp.where(h > 0, h, 0.01 * h)
        feat = h.reshape(h.shape[0], -1)                           # (B, out_c)
        y = jnp.dot(feat, (lw[s] * scale).T) + lb[s]
        outs.append(y)
    return jnp.stack(outs, axis=1)


if __name__ == "__main__":
    B, in_c, out_c, spatial, n_styles = 2, 4, 32, 16, 18
    key = jax.random.PRNGKey(0)
    key, kx = jax.random.split(key)
    x = jax.random.normal(kx, (B, in_c, spatial, spatial), jnp.float32)  # NCHW
    params = init_params(key, in_c, out_c, spatial, n_styles)

    prep = prepare_params(params)           # one-time weight prep (outside jit)
    out = jax.jit(psp_output_layer)(x, prep)
    out = jax.block_until_ready(out)
    assert out.shape == (B, n_styles, out_c), out.shape

    ref = reference_forward(x, params)
    max_err = float(jnp.max(jnp.abs(out - ref)))
    # Tolerance accounts for bf16 weight storage / bf16 MXU operands.
    assert jnp.allclose(out, ref, rtol=3e-2, atol=3e-2), max_err

    print("KERNEL_OK")
</pallas_src>

<mosaic_0001>
module attributes {stable_mosaic.version = 11 : i64} {
  func.func @_fused_kernel(%arg0: i32, %arg1: memref<128x128xf32, #tpu.memory_space<vmem>>, %arg2: memref<1x128x384xbf16, #tpu.memory_space<vmem>>, %arg3: memref<1x1x384xf32, #tpu.memory_space<vmem>>, %arg4: memref<1x3x1152x128xbf16, #tpu.memory_space<vmem>>, %arg5: memref<1x1x384xf32, #tpu.memory_space<vmem>>, %arg6: memref<1x3x512x128xbf16, #tpu.memory_space<vmem>>, %arg7: memref<1x1x384xf32, #tpu.memory_space<vmem>>, %arg8: memref<1x384x128xbf16, #tpu.memory_space<vmem>>, %arg9: memref<1x1x128xf32, #tpu.memory_space<vmem>>, %arg10: memref<1x128x128xbf16, #tpu.memory_space<vmem>>, %arg11: memref<1x1x128xf32, #tpu.memory_space<vmem>>, %arg12: memref<1x8x128xf32, #tpu.memory_space<vmem>>, %arg13: memref<128x384xf32, #tpu.memory_space<vmem>>) attributes {dimension_semantics = [#tpu.dimension_semantics<parallel>], iteration_bounds = array<i64: 6>, scalar_prefetch = 0 : i64, scratch_operands = 1 : i64, tpu.core_type = #tpu.core_type<tc>, window_params = [{pipeline_mode = #tpu.pipeline_mode<synchronous>, transform_indices = @transform_0, window_bounds = array<i64: 128, 128>}, {transform_indices = @transform_1, window_bounds = array<i64: 1, 128, 384>}, {transform_indices = @transform_2, window_bounds = array<i64: 1, 1, 384>}, {transform_indices = @transform_3, window_bounds = array<i64: 1, 3, 1152, 128>}, {transform_indices = @transform_4, window_bounds = array<i64: 1, 1, 384>}, {transform_indices = @transform_5, window_bounds = array<i64: 1, 3, 512, 128>}, {transform_indices = @transform_6, window_bounds = array<i64: 1, 1, 384>}, {transform_indices = @transform_7, window_bounds = array<i64: 1, 384, 128>}, {transform_indices = @transform_8, window_bounds = array<i64: 1, 1, 128>}, {transform_indices = @transform_9, window_bounds = array<i64: 1, 128, 128>}, {transform_indices = @transform_10, window_bounds = array<i64: 1, 1, 128>}, {transform_indices = @transform_11, window_bounds = array<i64: 1, 8, 128>}]} {
    %c0 = arith.constant 0 : index
    %c0_0 = arith.constant 0 : index
    %0 = vector.load %arg1[%c0, %c0_0] : memref<128x128xf32, #tpu.memory_space<vmem>>, vector<128x128xf32>
    %c0_1 = arith.constant 0 : index
    %c0_2 = arith.constant 0 : index
    %c0_3 = arith.constant 0 : index
    %1 = vector.load %arg2[%c0_1, %c0_2, %c0_3] : memref<1x128x384xbf16, #tpu.memory_space<vmem>>, vector<1x128x384xbf16>
    %2 = vector.shape_cast %1 : vector<1x128x384xbf16> to vector<128x384xbf16>
    %3 = arith.truncf %0 : vector<128x128xf32> to vector<128x128xbf16>
    %cst = arith.constant dense<0.000000e+00> : vector<128x384xf32>
    %4 = tpu.matmul %3, %2, %cst {dimension_numbers = #tpu.dot_dimension_numbers<[1], [0], [0], [1], [0, 0, 1, 1], [], []>} : vector<128x128xbf16>, vector<128x384xbf16>, vector<128x384xf32> -> vector<128x384xf32>
    %c0_4 = arith.constant 0 : index
    %c0_5 = arith.constant 0 : index
    %c0_6 = arith.constant 0 : index
    %5 = vector.load %arg3[%c0_4, %c0_5, %c0_6] : memref<1x1x384xf32, #tpu.memory_space<vmem>>, vector<1x1x384xf32>
    %6 = vector.shape_cast %5 : vector<1x1x384xf32> to vector<1x384xf32>
    %7 = vector.broadcast %6 : vector<1x384xf32> to vector<128x384xf32>
    %8 = arith.addf %4, %7 : vector<128x384xf32>
    %cst_7 = arith.constant 0.000000e+00 : f32
    %9 = vector.broadcast %cst_7 : f32 to vector<128x384xf32>
    %10 = arith.cmpf ogt, %8, %9 : vector<128x384xf32>
    %cst_8 = arith.constant 0.00999999977 : f32
    %11 = vector.broadcast %cst_8 : f32 to vector<128x384xf32>
    %12 = arith.mulf %11, %8 : vector<128x384xf32>
    %13 = arith.select %10, %8, %12 : vector<128x384xi1>, vector<128x384xf32>
    %c0_9 = arith.constant 0 : index
    %c0_10 = arith.constant 0 : index
    %14 = vector.load %arg13[%c0_9, %c0_10] : memref<128x384xf32, #tpu.memory_space<vmem>>, vector<128x384xf32>
    tpu.vector_store %arg13[%c0_9, %c0_10], %13 {strides = array<i32>} : memref<128x384xf32, #tpu.memory_space<vmem>>, vector<128x384xf32>,
    %cst_11 = arith.constant 0.000000e+00 : f32
    %15 = vector.broadcast %cst_11 : f32 to vector<8x128xf32>
    %c0_12 = arith.constant 0 : index
    %c0_13 = arith.constant 0 : index
    %16 = vector.load %arg13[%c0_12, %c0_13] : memref<128x384xf32, #tpu.memory_space<vmem>>, vector<8x128xf32>
    %c8 = arith.constant 8 : index
    %c0_14 = arith.constant 0 : index
    %17 = vector.load %arg13[%c8, %c0_14] : memref<128x384xf32, #tpu.memory_space<vmem>>, vector<8x128xf32>
    %c32 = arith.constant 32 : index
    %c0_15 = arith.constant 0 : index
    %18 = vector.load %arg13[%c32, %c0_15] : memref<128x384xf32, #tpu.memory_space<vmem>>, vector<8x128xf32>
    %c40 = arith.constant 40 : index
    %c0_16 = arith.constant 0 : index
    %19 = vector.load %arg13[%c40, %c0_16] : memref<128x384xf32, #tpu.memory_space<vmem>>, vector<8x128xf32>
    %20 = tpu.concatenate %15, %15, %15, %15, %16, %17, %15, %18, %19 in 1 : vector<8x128xf32>, vector<8x128xf32>, vector<8x128xf32>, vector<8x128xf32>, vector<8x128xf32>, vector<8x128xf32>, vector<8x128xf32>, vector<8x128xf32>, vector<8x128xf32> -> vector<8x1152xf32>
    %c8_17 = arith.constant 8 : index
    %c0_18 = arith.constant 0 : index
    %21 = vector.load %arg13[%c8_17, %c0_18] : memref<128x384xf32, #tpu.memory_space<vmem>>, vector<8x128xf32>
    %c16 = arith.constant 16 : index
    %c0_19 = arith.constant 0 : index
    %22 = vector.load %arg13[%c16, %c0_19] : memref<128x384xf32, #tpu.memory_space<vmem>>, vector<8x128xf32>
    %c24 = arith.constant 24 : index
    %c0_20 = arith.constant 0 : index
    %23 = vector.load %arg13[%c24, %c0_20] : memref<128x384xf32, #tpu.memory_space<vmem>>, vector<8x128xf32>
    %c40_21 = arith.constant 40 : index
    %c0_22 = arith.constant 0 : index
    %24 = vector.load %arg13[%c40_21, %c0_22] : memref<128x384xf32, #tpu.memory_space<vmem>>, vector<8x128xf32>
    %c48 = arith.constant 48 : index
    %c0_23 = arith.constant 0 : index
    %25 = vector.load %arg13[%c48, %c0_23] : memref<128x384xf32, #tpu.memory_space<vmem>>, vector<8x128xf32>
    %c56 = arith.constant 56 : index
    %c0_24 = arith.constant 0 : index
    %26 = vector.load %arg13[%c56, %c0_24] : memref<128x384xf32, #tpu.memory_space<vmem>>, vector<8x128xf32>
    %27 = tpu.concatenate %15, %15, %15, %21, %22, %23, %24, %25, %26 in 1 : vector<8x128xf32>, vector<8x128xf32>, vector<8x128xf32>, vector<8x128xf32>, vector<8x128xf32>, vector<8x128xf32>, vector<8x128xf32>, vector<8x128xf32>, vector<8x128xf32> -> vector<8x1152xf32>
    %c32_25 = arith.constant 32 : index
    %c0_26 = arith.constant 0 : index
    %28 = vector.load %arg13[%c32_25, %c0_26] : memref<128x384xf32, #tpu.memory_space<vmem>>, vector<8x128xf32>
    %c40_27 = arith.constant 40 : index
    %c0_28 = arith.constant 0 : index
    %29 = vector.load %arg13[%c40_27, %c0_28] : memref<128x384xf32, #tpu.memory_space<vmem>>, vector<8x128xf32>
    %c64 = arith.constant 64 : index
    %c0_29 = arith.constant 0 : index
    %30 = vector.load %arg13[%c64, %c0_29] : memref<128x384xf32, #tpu.memory_space<vmem>>, vector<8x128xf32>
    %c72 = arith.constant 72 : index
    %c0_30 = arith.constant 0 : index
    %31 = vector.load %arg13[%c72, %c0_30] : memref<128x384xf32, #tpu.memory_space<vmem>>, vector<8x128xf32>
    %c96 = arith.constant 96 : index
    %c0_31 = arith.constant 0 : index
    %32 = vector.load %arg13[%c96, %c0_31] : memref<128x384xf32, #tpu.memory_space<vmem>>, vector<8x128xf32>
    %c104 = arith.constant 104 : index
    %c0_32 = arith.constant 0 : index
    %33 = vector.load %arg13[%c104, %c0_32] : memref<128x384xf32, #tpu.memory_space<vmem>>, vector<8x128xf32>
    %34 = tpu.concatenate %15, %28, %29, %15, %30, %31, %15, %32, %33 in 1 : vector<8x128xf32>, vector<8x128xf32>, vector<8x128xf32>, vector<8x128xf32>, vector<8x128xf32>, vector<8x128xf32>, vector<8x128xf32>, vector<8x128xf32>, vector<8x128xf32> -> vector<8x1152xf32>
    %c40_33 = arith.constant 40 : index
    %c0_34 = arith.constant 0 : index
    %35 = vector.load %arg13[%c40_33, %c0_34] : memref<128x384xf32, #tpu.memory_space<vmem>>, vector<8x128xf32>
    %c48_35 = arith.constant 48 : index
    %c0_36 = arith.constant 0 : index
    %36 = vector.load %arg13[%c48_35, %c0_36] : memref<128x384xf32, #tpu.memory_space<vmem>>, vector<8x128xf32>
    %c56_37 = arith.constant 56 : index
    %c0_38 = arith.constant 0 : index
    %37 = vector.load %arg13[%c56_37, %c0_38] : memref<128x384xf32, #tpu.memory_space<vmem>>, vector<8x128xf32>
    %c72_39 = arith.constant 72 : index
    %c0_40 = arith.constant 0 : index
    %38 = vector.load %arg13[%c72_39, %c0_40] : memref<128x384xf32, #tpu.memory_space<vmem>>, vector<8x128xf32>
    %c80 = arith.constant 80 : index
    %c0_41 = arith.constant 0 : index
    %39 = vector.load %arg13[%c80, %c0_41] : memref<128x384xf32, #tpu.memory_space<vmem>>, vector<8x128xf32>
    %c88 = arith.constant 88 : index
    %c0_42 = arith.constant 0 : index
    %40 = vector.load %arg13[%c88, %c0_42] : memref<128x384xf32, #tpu.memory_space<vmem>>, vector<8x128xf32>
    %c104_43 = arith.constant 104 : index
    %c0_44 = arith.constant 0 : index
    %41 = vector.load %arg13[%c104_43, %c0_44] : memref<128x384xf32, #tpu.memory_space<vmem>>, vector<8x128xf32>
    %c112 = arith.constant 112 : index
    %c0_45 = arith.constant 0 : index
    %42 = vector.load %arg13[%c112, %c0_45] : memref<128x384xf32, #tpu.memory_space<vmem>>, vector<8x128xf32>
    %c120 = arith.constant 120 : index
    %c0_46 = arith.constant 0 : index
    %43 = vector.load %arg13[%c120, %c0_46] : memref<128x384xf32, #tpu.memory_space<vmem>>, vector<8x128xf32>
    %44 = tpu.concatenate %35, %36, %37, %38, %39, %40, %41, %42, %43 in 1 : vector<8x128xf32>, vector<8x128xf32>, vector<8x128xf32>, vector<8x128xf32>, vector<8x128xf32>, vector<8x128xf32>, vector<8x128xf32>, vector<8x128xf32>, vector<8x128xf32> -> vector<8x1152xf32>
    %45 = tpu.concatenate %20, %27, %34, %44 in 0 : vector<8x1152xf32>, vector<8x1152xf32>, vector<8x1152xf32>, vector<8x1152xf32> -> vector<32x1152xf32>
    %c0_47 = arith.constant 0 : index
    %c0_48 = arith.constant 0 : index
    %c0_49 = arith.constant 0 : index
    %c0_50 = arith.constant 0 : index
    %46 = vector.load %arg4[%c0_47, %c0_48, %c0_49, %c0_50] : memref<1x3x1152x128xbf16, #tpu.memory_space<vmem>>, vector<1x1x1152x128xbf16>
    %47 = vector.shape_cast %46 : vector<1x1x1152x128xbf16> to vector<1152x128xbf16>
    %48 = arith.truncf %45 : vector<32x1152xf32> to vector<32x1152xbf16>
    %cst_51 = arith.constant dense<0.000000e+00> : vector<32x128xf32>
    %49 = tpu.matmul %48, %47, %cst_51 {dimension_numbers = #tpu.dot_dimension_numbers<[1], [0], [0], [1], [0, 0, 1, 1], [], []>} : vector<32x1152xbf16>, vector<1152x128xbf16>, vector<32x128xf32> -> vector<32x128xf32>
    %c0_52 = arith.constant 0 : index
    %c0_53 = arith.constant 0 : index
    %c0_54 = arith.constant 0 : index
    %50 = vector.load %arg5[%c0_52, %c0_53, %c0_54] : memref<1x1x384xf32, #tpu.memory_space<vmem>>, vector<1x1x128xf32>
    %51 = vector.shape_cast %50 : vector<1x1x128xf32> to vector<1x128xf32>
    %52 = vector.broadcast %51 : vector<1x128xf32> to vector<32x128xf32>
    %53 = arith.addf %49, %52 : vector<32x128xf32>
    %cst_55 = arith.constant 0.000000e+00 : f32
    %54 = vector.broadcast %cst_55 : f32 to vector<32x128xf32>
    %55 = arith.cmpf ogt, %53, %54 : vector<32x128xf32>
    %cst_56 = arith.constant 0.00999999977 : f32
    %56 = vector.broadcast %cst_56 : f32 to vector<32x128xf32>
    %57 = arith.mulf %56, %53 : vector<32x128xf32>
    %58 = arith.select %55, %53, %57 : vector<32x128xi1>, vector<32x128xf32>
    %59 = vector.extract_strided_slice %58 {offsets = [0, 0], sizes = [8, 128], strides = [1, 1]} : vector<32x128xf32> to vector<8x128xf32>
    %60 = vector.extract_strided_slice %58 {offsets = [8, 0], sizes = [8, 128], strides = [1, 1]} : vector<32x128xf32> to vector<8x128xf32>
    %61 = vector.extract_strided_slice %58 {offsets = [16, 0], sizes = [8, 128], strides = [1, 1]} : vector<32x128xf32> to vector<8x128xf32>
    %62 = vector.extract_strided_slice %58 {offsets = [24, 0], sizes = [8, 128], strides = [1, 1]} : vector<32x128xf32> to vector<8x128xf32>
    %63 = tpu.concatenate %59, %60, %61, %62 in 1 : vector<8x128xf32>, vector<8x128xf32>, vector<8x128xf32>, vector<8x128xf32> -> vector<8x512xf32>
    %c0_57 = arith.constant 0 : index
    %c0_58 = arith.constant 0 : index
    %c0_59 = arith.constant 0 : index
    %c0_60 = arith.constant 0 : index
    %64 = vector.load %arg6[%c0_57, %c0_58, %c0_59, %c0_60] : memref<1x3x512x128xbf16, #tpu.memory_space<vmem>>, vector<1x1x512x128xbf16>
    %65 = vector.shape_cast %64 : vector<1x1x512x128xbf16> to vector<512x128xbf16>
    %66 = arith.truncf %63 : vector<8x512xf32> to vector<8x512xbf16>
    %cst_61 = arith.constant dense<0.000000e+00> : vector<8x128xf32>
    %67 = tpu.matmul %66, %65, %cst_61 {dimension_numbers = #tpu.dot_dimension_numbers<[1], [0], [0], [1], [0, 0, 1, 1], [], []>} : vector<8x512xbf16>, vector<512x128xbf16>, vector<8x128xf32> -> vector<8x128xf32>
    %c0_62 = arith.constant 0 : index
    %c0_63 = arith.constant 0 : index
    %c0_64 = arith.constant 0 : index
    %68 = vector.load %arg7[%c0_62, %c0_63, %c0_64] : memref<1x1x384xf32, #tpu.memory_space<vmem>>, vector<1x1x128xf32>
    %69 = vector.shape_cast %68 : vector<1x1x128xf32> to vector<1x128xf32>
    %70 = vector.broadcast %69 : vector<1x128xf32> to vector<8x128xf32>
    %71 = arith.addf %67, %70 : vector<8x128xf32>
    %cst_65 = arith.constant 0.000000e+00 : f32
    %72 = vector.broadcast %cst_65 : f32 to vector<8x128xf32>
    %73 = arith.cmpf ogt, %71, %72 : vector<8x128xf32>
    %cst_66 = arith.constant 0.00999999977 : f32
    %74 = vector.broadcast %cst_66 : f32 to vector<8x128xf32>
    %75 = arith.mulf %74, %71 : vector<8x128xf32>
    %76 = arith.select %73, %71, %75 : vector<8x128xi1>, vector<8x128xf32>
    %c0_67 = arith.constant 0 : index
    %c128 = arith.constant 128 : index
    %77 = vector.load %arg13[%c0_67, %c128] : memref<128x384xf32, #tpu.memory_space<vmem>>, vector<8x128xf32>
    %c8_68 = arith.constant 8 : index
    %c128_69 = arith.constant 128 : index
    %78 = vector.load %arg13[%c8_68, %c128_69] : memref<128x384xf32, #tpu.memory_space<vmem>>, vector<8x128xf32>
    %c32_70 = arith.constant 32 : index
    %c128_71 = arith.constant 128 : index
    %79 = vector.load %arg13[%c32_70, %c128_71] : memref<128x384xf32, #tpu.memory_space<vmem>>, vector<8x128xf32>
    %c40_72 = arith.constant 40 : index
    %c128_73 = arith.constant 128 : index
    %80 = vector.load %arg13[%c40_72, %c128_73] : memref<128x384xf32, #tpu.memory_space<vmem>>, vector<8x128xf32>
    %81 = tpu.concatenate %15, %15, %15, %15, %77, %78, %15, %79, %80 in 1 : vector<8x128xf32>, vector<8x128xf32>, vector<8x128xf32>, vector<8x128xf32>, vector<8x128xf32>, vector<8x128xf32>, vector<8x128xf32>, vector<8x128xf32>, vector<8x128xf32> -> vector<8x1152xf32>
    %c8_74 = arith.constant 8 : index
    %c128_75 = arith.constant 128 : index
    %82 = vector.load %arg13[%c8_74, %c128_75] : memref<128x384xf32, #tpu.memory_space<vmem>>, vector<8x128xf32>
    %c16_76 = arith.constant 16 : index
    %c128_77 = arith.constant 128 : index
    %83 = vector.load %arg13[%c16_76, %c128_77] : memref<128x384xf32, #tpu.memory_space<vmem>>, vector<8x128xf32>
    %c24_78 = arith.constant 24 : index
    %c128_79 = arith.constant 128 : index
    %84 = vector.load %arg13[%c24_78, %c128_79] : memref<128x384xf32, #tpu.memory_space<vmem>>, vector<8x128xf32>
    %c40_80 = arith.constant 40 : index
    %c128_81 = arith.constant 128 : index
    %85 = vector.load %arg13[%c40_80, %c128_81] : memref<128x384xf32, #tpu.memory_space<vmem>>, vector<8x128xf32>
    %c48_82 = arith.constant 48 : index
    %c128_83 = arith.constant 128 : index
    %86 = vector.load %arg13[%c48_82, %c128_83] : memref<128x384xf32, #tpu.memory_space<vmem>>, vector<8x128xf32>
    %c56_84 = arith.constant 56 : index
    %c128_85 = arith.constant 128 : index
    %87 = vector.load %arg13[%c56_84, %c128_85] : memref<128x384xf32, #tpu.memory_space<vmem>>, vector<8x128xf32>
    %88 = tpu.concatenate %15, %15, %15, %82, %83, %84, %85, %86, %87 in 1 : vector<8x128xf32>, vector<8x128xf32>, vector<8x128xf32>, vector<8x128xf32>, vector<8x128xf32>, vector<8x128xf32>, vector<8x128xf32>, vector<8x128xf32>, vector<8x128xf32> -> vector<8x1152xf32>
    %c32_86 = arith.constant 32 : index
    %c128_87 = arith.constant 128 : index
    %89 = vector.load %arg13[%c32_86, %c128_87] : memref<128x384xf32, #tpu.memory_space<vmem>>, vector<8x128xf32>
    %c40_88 = arith.constant 40 : index
    %c128_89 = arith.constant 128 : index
    %90 = vector.load %arg13[%c40_88, %c128_89] : memref<128x384xf32, #tpu.memory_space<vmem>>, vector<8x128xf32>
    %c64_90 = arith.constant 64 : index
    %c128_91 = arith.constant 128 : index
    %91 = vector.load %arg13[%c64_90, %c128_91] : memref<128x384xf32, #tpu.memory_space<vmem>>, vector<8x128xf32>
    %c72_92 = arith.constant 72 : index
    %c128_93 = arith.constant 128 : index
    %92 = vector.load %arg13[%c72_92, %c128_93] : memref<128x384xf32, #tpu.memory_space<vmem>>, vector<8x128xf32>
    %c96_94 = arith.constant 96 : index
    %c128_95 = arith.constant 128 : index
    %93 = vector.load %arg13[%c96_94, %c128_95] : memref<128x384xf32, #tpu.memory_space<vmem>>, vector<8x128xf32>
    %c104_96 = arith.constant 104 : index
    %c128_97 = arith.constant 128 : index
    %94 = vector.load %arg13[%c104_96, %c128_97] : memref<128x384xf32, #tpu.memory_space<vmem>>, vector<8x128xf32>
    %95 = tpu.concatenate %15, %89, %90, %15, %91, %92, %15, %93, %94 in 1 : vector<8x128xf32>, vector<8x128xf32>, vector<8x128xf32>, vector<8x128xf32>, vector<8x128xf32>, vector<8x128xf32>, vector<8x128xf32>, vector<8x128xf32>, vector<8x128xf32> -> vector<8x1152xf32>
    %c40_98 = arith.constant 40 : index
    %c128_99 = arith.constant 128 : index
    %96 = vector.load %arg13[%c40_98, %c128_99] : memref<128x384xf32, #tpu.memory_space<vmem>>, vector<8x128xf32>
    %c48_100 = arith.constant 48 : index
    %c128_101 = arith.constant 128 : index
    %97 = vector.load %arg13[%c48_100, %c128_101] : memref<128x384xf32, #tpu.memory_space<vmem>>, vector<8x128xf32>
    %c56_102 = arith.constant 56 : index
    %c128_103 = arith.constant 128 : index
    %98 = vector.load %arg13[%c56_102, %c128_103] : memref<128x384xf32, #tpu.memory_space<vmem>>, vector<8x128xf32>
    %c72_104 = arith.constant 72 : index
    %c128_105 = arith.constant 128 : index
    %99 = vector.load %arg13[%c72_104, %c128_105] : memref<128x384xf32, #tpu.memory_space<vmem>>, vector<8x128xf32>
    %c80_106 = arith.constant 80 : index
    %c128_107 = arith.constant 128 : index
    %100 = vector.load %arg13[%c80_106, %c128_107] : memref<128x384xf32, #tpu.memory_space<vmem>>, vector<8x128xf32>
    %c88_108 = arith.constant 88 : index
    %c128_109 = arith.constant 128 : index
    %101 = vector.load %arg13[%c88_108, %c128_109] : memref<128x384xf32, #tpu.memory_space<vmem>>, vector<8x128xf32>
    %c104_110 = arith.constant 104 : index
    %c128_111 = arith.constant 128 : index
    %102 = vector.load %arg13[%c104_110, %c128_111] : memref<128x384xf32, #tpu.memory_space<vmem>>, vector<8x128xf32>
    %c112_112 = arith.constant 112 : index
    %c128_113 = arith.constant 128 : index
    %103 = vector.load %arg13[%c112_112, %c128_113] : memref<128x384xf32, #tpu.memory_space<vmem>>, vector<8x128xf32>
    %c120_114 = arith.constant 120 : index
    %c128_115 = arith.constant 128 : index
    %104 = vector.load %arg13[%c120_114, %c128_115] : memref<128x384xf32, #tpu.memory_space<vmem>>, vector<8x128xf32>
    %105 = tpu.concatenate %96, %97, %98, %99, %100, %101, %102, %103, %104 in 1 : vector<8x128xf32>, vector<8x128xf32>, vector<8x128xf32>, vector<8x128xf32>, vector<8x128xf32>, vector<8x128xf32>, vector<8x128xf32>, vector<8x128xf32>, vector<8x128xf32> -> vector<8x1152xf32>
    %106 = tpu.concatenate %81, %88, %95, %105 in 0 : vector<8x1152xf32>, vector<8x1152xf32>, vector<8x1152xf32>, vector<8x1152xf32> -> vector<32x1152xf32>
    %c0_116 = arith.constant 0 : index
    %c1 = arith.constant 1 : index
    %c0_117 = arith.constant 0 : index
    %c0_118 = arith.constant 0 : index
    %107 = vector.load %arg4[%c0_116, %c1, %c0_117, %c0_118] : memref<1x3x1152x128xbf16, #tpu.memory_space<vmem>>, vector<1x1x1152x128xbf16>
    %108 = vector.shape_cast %107 : vector<1x1x1152x128xbf16> to vector<1152x128xbf16>
    %109 = arith.truncf %106 : vector<32x1152xf32> to vector<32x1152xbf16>
    %cst_119 = arith.constant dense<0.000000e+00> : vector<32x128xf32>
    %110 = tpu.matmul %109, %108, %cst_119 {dimension_numbers = #tpu.dot_dimension_numbers<[1], [0], [0], [1], [0, 0, 1, 1], [], []>} : vector<32x1152xbf16>, vector<1152x128xbf16>, vector<32x128xf32> -> vector<32x128xf32>
    %c0_120 = arith.constant 0 : index
    %c0_121 = arith.constant 0 : index
    %c128_122 = arith.constant 128 : index
    %111 = vector.load %arg5[%c0_120, %c0_121, %c128_122] : memref<1x1x384xf32, #tpu.memory_space<vmem>>, vector<1x1x128xf32>
    %112 = vector.shape_cast %111 : vector<1x1x128xf32> to vector<1x128xf32>
    %113 = vector.broadcast %112 : vector<1x128xf32> to vector<32x128xf32>
    %114 = arith.addf %110, %113 : vector<32x128xf32>
    %cst_123 = arith.constant 0.000000e+00 : f32
    %115 = vector.broadcast %cst_123 : f32 to vector<32x128xf32>
    %116 = arith.cmpf ogt, %114, %115 : vector<32x128xf32>
    %cst_124 = arith.constant 0.00999999977 : f32
    %117 = vector.broadcast %cst_124 : f32 to vector<32x128xf32>
    %118 = arith.mulf %117, %114 : vector<32x128xf32>
    %119 = arith.select %116, %114, %118 : vector<32x128xi1>, vector<32x128xf32>
    %120 = vector.extract_strided_slice %119 {offsets = [0, 0], sizes = [8, 128], strides = [1, 1]} : vector<32x128xf32> to vector<8x128xf32>
    %121 = vector.extract_strided_slice %119 {offsets = [8, 0], sizes = [8, 128], strides = [1, 1]} : vector<32x128xf32> to vector<8x128xf32>
    %122 = vector.extract_strided_slice %119 {offsets = [16, 0], sizes = [8, 128], strides = [1, 1]} : vector<32x128xf32> to vector<8x128xf32>
    %123 = vector.extract_strided_slice %119 {offsets = [24, 0], sizes = [8, 128], strides = [1, 1]} : vector<32x128xf32> to vector<8x128xf32>
    %124 = tpu.concatenate %120, %121, %122, %123 in 1 : vector<8x128xf32>, vector<8x128xf32>, vector<8x128xf32>, vector<8x128xf32> -> vector<8x512xf32>
    %c0_125 = arith.constant 0 : index
    %c1_126 = arith.constant 1 : index
    %c0_127 = arith.constant 0 : index
    %c0_128 = arith.constant 0 : index
    %125 = vector.load %arg6[%c0_125, %c1_126, %c0_127, %c0_128] : memref<1x3x512x128xbf16, #tpu.memory_space<vmem>>, vector<1x1x512x128xbf16>
    %126 = vector.shape_cast %125 : vector<1x1x512x128xbf16> to vector<512x128xbf16>
    %127 = arith.truncf %124 : vector<8x512xf32> to vector<8x512xbf16>
    %cst_129 = arith.constant dense<0.000000e+00> : vector<8x128xf32>
    %128 = tpu.matmul %127, %126, %cst_129 {dimension_numbers = #tpu.dot_dimension_numbers<[1], [0], [0], [1], [0, 0, 1, 1], [], []>} : vector<8x512xbf16>, vector<512x128xbf16>, vector<8x128xf32> -> vector<8x128xf32>
    %c0_130 = arith.constant 0 : index
    %c0_131 = arith.constant 0 : index
    %c128_132 = arith.constant 128 : index
    %129 = vector.load %arg7[%c0_130, %c0_131, %c128_132] : memref<1x1x384xf32, #tpu.memory_space<vmem>>, vector<1x1x128xf32>
    %130 = vector.shape_cast %129 : vector<1x1x128xf32> to vector<1x128xf32>
    %131 = vector.broadcast %130 : vector<1x128xf32> to vector<8x128xf32>
    %132 = arith.addf %128, %131 : vector<8x128xf32>
    %cst_133 = arith.constant 0.000000e+00 : f32
    %133 = vector.broadcast %cst_133 : f32 to vector<8x128xf32>
    %134 = arith.cmpf ogt, %132, %133 : vector<8x128xf32>
    %cst_134 = arith.constant 0.00999999977 : f32
    %135 = vector.broadcast %cst_134 : f32 to vector<8x128xf32>
    %136 = arith.mulf %135, %132 : vector<8x128xf32>
    %137 = arith.select %134, %132, %136 : vector<8x128xi1>, vector<8x128xf32>
    %c0_135 = arith.constant 0 : index
    %c256 = arith.constant 256 : index
    %138 = vector.load %arg13[%c0_135, %c256] : memref<128x384xf32, #tpu.memory_space<vmem>>, vector<8x128xf32>
    %c8_136 = arith.constant 8 : index
    %c256_137 = arith.constant 256 : index
    %139 = vector.load %arg13[%c8_136, %c256_137] : memref<128x384xf32, #tpu.memory_space<vmem>>, vector<8x128xf32>
    %c32_138 = arith.constant 32 : index
    %c256_139 = arith.constant 256 : index
    %140 = vector.load %arg13[%c32_138, %c256_139] : memref<128x384xf32, #tpu.memory_space<vmem>>, vector<8x128xf32>
    %c40_140 = arith.constant 40 : index
    %c256_141 = arith.constant 256 : index
    %141 = vector.load %arg13[%c40_140, %c256_141] : memref<128x384xf32, #tpu.memory_space<vmem>>, vector<8x128xf32>
    %142 = tpu.concatenate %15, %15, %15, %15, %138, %139, %15, %140, %141 in 1 : vector<8x128xf32>, vector<8x128xf32>, vector<8x128xf32>, vector<8x128xf32>, vector<8x128xf32>, vector<8x128xf32>, vector<8x128xf32>, vector<8x128xf32>, vector<8x128xf32> -> vector<8x1152xf32>
    %c8_142 = arith.constant 8 : index
    %c256_143 = arith.constant 256 : index
    %143 = vector.load %arg13[%c8_142, %c256_143] : memref<128x384xf32, #tpu.memory_space<vmem>>, vector<8x128xf32>
    %c16_144 = arith.constant 16 : index
    %c256_145 = arith.constant 256 : index
    %144 = vector.load %arg13[%c16_144, %c256_145] : memref<128x384xf32, #tpu.memory_space<vmem>>, vector<8x128xf32>
    %c24_146 = arith.constant 24 : index
    %c256_147 = arith.constant 256 : index
    %145 = vector.load %arg13[%c24_146, %c256_147] : memref<128x384xf32, #tpu.memory_space<vmem>>, vector<8x128xf32>
    %c40_148 = arith.constant 40 : index
    %c256_149 = arith.constant 256 : index
    %146 = vector.load %arg13[%c40_148, %c256_149] : memref<128x384xf32, #tpu.memory_space<vmem>>, vector<8x128xf32>
    %c48_150 = arith.constant 48 : index
    %c256_151 = arith.constant 256 : index
    %147 = vector.load %arg13[%c48_150, %c256_151] : memref<128x384xf32, #tpu.memory_space<vmem>>, vector<8x128xf32>
    %c56_152 = arith.constant 56 : index
    %c256_153 = arith.constant 256 : index
    %148 = vector.load %arg13[%c56_152, %c256_153] : memref<128x384xf32, #tpu.memory_space<vmem>>, vector<8x128xf32>
    %149 = tpu.concatenate %15, %15, %15, %143, %144, %145, %146, %147, %148 in 1 : vector<8x128xf32>, vector<8x128xf32>, vector<8x128xf32>, vector<8x128xf32>, vector<8x128xf32>, vector<8x128xf32>, vector<8x128xf32>, vector<8x128xf32>, vector<8x128xf32> -> vector<8x1152xf32>
    %c32_154 = arith.constant 32 : index
    %c256_155 = arith.constant 256 : index
    %150 = vector.load %arg13[%c32_154, %c256_155] : memref<128x384xf32, #tpu.memory_space<vmem>>, vector<8x128xf32>
    %c40_156 = arith.constant 40 : index
    %c256_157 = arith.constant 256 : index
    %151 = vector.load %arg13[%c40_156, %c256_157] : memref<128x384xf32, #tpu.memory_space<vmem>>, vector<8x128xf32>
    %c64_158 = arith.constant 64 : index
    %c256_159 = arith.constant 256 : index
    %152 = vector.load %arg13[%c64_158, %c256_159] : memref<128x384xf32, #tpu.memory_space<vmem>>, vector<8x128xf32>
    %c72_160 = arith.constant 72 : index
    %c256_161 = arith.constant 256 : index
    %153 = vector.load %arg13[%c72_160, %c256_161] : memref<128x384xf32, #tpu.memory_space<vmem>>, vector<8x128xf32>
    %c96_162 = arith.constant 96 : index
    %c256_163 = arith.constant 256 : index
    %154 = vector.load %arg13[%c96_162, %c256_163] : memref<128x384xf32, #tpu.memory_space<vmem>>, vector<8x128xf32>
    %c104_164 = arith.constant 104 : index
    %c256_165 = arith.constant 256 : index
    %155 = vector.load %arg13[%c104_164, %c256_165] : memref<128x384xf32, #tpu.memory_space<vmem>>, vector<8x128xf32>
    %156 = tpu.concatenate %15, %150, %151, %15, %152, %153, %15, %154, %155 in 1 : vector<8x128xf32>, vector<8x128xf32>, vector<8x128xf32>, vector<8x128xf32>, vector<8x128xf32>, vector<8x128xf32>, vector<8x128xf32>, vector<8x128xf32>, vector<8x128xf32> -> vector<8x1152xf32>
    %c40_166 = arith.constant 40 : index
    %c256_167 = arith.constant 256 : index
    %157 = vector.load %arg13[%c40_166, %c256_167] : memref<128x384xf32, #tpu.memory_space<vmem>>, vector<8x128xf32>
    %c48_168 = arith.constant 48 : index
    %c256_169 = arith.constant 256 : index
    %158 = vector.load %arg13[%c48_168, %c256_169] : memref<128x384xf32, #tpu.memory_space<vmem>>, vector<8x128xf32>
    %c56_170 = arith.constant 56 : index
    %c256_171 = arith.constant 256 : index
    %159 = vector.load %arg13[%c56_170, %c256_171] : memref<128x384xf32, #tpu.memory_space<vmem>>, vector<8x128xf32>
    %c72_172 = arith.constant 72 : index
    %c256_173 = arith.constant 256 : index
    %160 = vector.load %arg13[%c72_172, %c256_173] : memref<128x384xf32, #tpu.memory_space<vmem>>, vector<8x128xf32>
    %c80_174 = arith.constant 80 : index
    %c256_175 = arith.constant 256 : index
    %161 = vector.load %arg13[%c80_174, %c256_175] : memref<128x384xf32, #tpu.memory_space<vmem>>, vector<8x128xf32>
    %c88_176 = arith.constant 88 : index
    %c256_177 = arith.constant 256 : index
    %162 = vector.load %arg13[%c88_176, %c256_177] : memref<128x384xf32, #tpu.memory_space<vmem>>, vector<8x128xf32>
    %c104_178 = arith.constant 104 : index
    %c256_179 = arith.constant 256 : index
    %163 = vector.load %arg13[%c104_178, %c256_179] : memref<128x384xf32, #tpu.memory_space<vmem>>, vector<8x128xf32>
    %c112_180 = arith.constant 112 : index
    %c256_181 = arith.constant 256 : index
    %164 = vector.load %arg13[%c112_180, %c256_181] : memref<128x384xf32, #tpu.memory_space<vmem>>, vector<8x128xf32>
    %c120_182 = arith.constant 120 : index
    %c256_183 = arith.constant 256 : index
    %165 = vector.load %arg13[%c120_182, %c256_183] : memref<128x384xf32, #tpu.memory_space<vmem>>, vector<8x128xf32>
    %166 = tpu.concatenate %157, %158, %159, %160, %161, %162, %163, %164, %165 in 1 : vector<8x128xf32>, vector<8x128xf32>, vector<8x128xf32>, vector<8x128xf32>, vector<8x128xf32>, vector<8x128xf32>, vector<8x128xf32>, vector<8x128xf32>, vector<8x128xf32> -> vector<8x1152xf32>
    %167 = tpu.concatenate %142, %149, %156, %166 in 0 : vector<8x1152xf32>, vector<8x1152xf32>, vector<8x1152xf32>, vector<8x1152xf32> -> vector<32x1152xf32>
    %c0_184 = arith.constant 0 : index
    %c2 = arith.constant 2 : index
    %c0_185 = arith.constant 0 : index
    %c0_186 = arith.constant 0 : index
    %168 = vector.load %arg4[%c0_184, %c2, %c0_185, %c0_186] : memref<1x3x1152x128xbf16, #tpu.memory_space<vmem>>, vector<1x1x1152x128xbf16>
    %169 = vector.shape_cast %168 : vector<1x1x1152x128xbf16> to vector<1152x128xbf16>
    %170 = arith.truncf %167 : vector<32x1152xf32> to vector<32x1152xbf16>
    %cst_187 = arith.constant dense<0.000000e+00> : vector<32x128xf32>
    %171 = tpu.matmul %170, %169, %cst_187 {dimension_numbers = #tpu.dot_dimension_numbers<[1], [0], [0], [1], [0, 0, 1, 1], [], []>} : vector<32x1152xbf16>, vector<1152x128xbf16>, vector<32x128xf32> -> vector<32x128xf32>
    %c0_188 = arith.constant 0 : index
    %c0_189 = arith.constant 0 : index
    %c256_190 = arith.constant 256 : index
    %172 = vector.load %arg5[%c0_188, %c0_189, %c256_190] : memref<1x1x384xf32, #tpu.memory_space<vmem>>, vector<1x1x128xf32>
    %173 = vector.shape_cast %172 : vector<1x1x128xf32> to vector<1x128xf32>
    %174 = vector.broadcast %173 : vector<1x128xf32> to vector<32x128xf32>
    %175 = arith.addf %171, %174 : vector<32x128xf32>
    %cst_191 = arith.constant 0.000000e+00 : f32
    %176 = vector.broadcast %cst_191 : f32 to vector<32x128xf32>
    %177 = arith.cmpf ogt, %175, %176 : vector<32x128xf32>
    %cst_192 = arith.constant 0.00999999977 : f32
    %178 = vector.broadcast %cst_192 : f32 to vector<32x128xf32>
    %179 = arith.mulf %178, %175 : vector<32x128xf32>
    %180 = arith.select %177, %175, %179 : vector<32x128xi1>, vector<32x128xf32>
    %181 = vector.extract_strided_slice %180 {offsets = [0, 0], sizes = [8, 128], strides = [1, 1]} : vector<32x128xf32> to vector<8x128xf32>
    %182 = vector.extract_strided_slice %180 {offsets = [8, 0], sizes = [8, 128], strides = [1, 1]} : vector<32x128xf32> to vector<8x128xf32>
    %183 = vector.extract_strided_slice %180 {offsets = [16, 0], sizes = [8, 128], strides = [1, 1]} : vector<32x128xf32> to vector<8x128xf32>
    %184 = vector.extract_strided_slice %180 {offsets = [24, 0], sizes = [8, 128], strides = [1, 1]} : vector<32x128xf32> to vector<8x128xf32>
    %185 = tpu.concatenate %181, %182, %183, %184 in 1 : vector<8x128xf32>, vector<8x128xf32>, vector<8x128xf32>, vector<8x128xf32> -> vector<8x512xf32>
    %c0_193 = arith.constant 0 : index
    %c2_194 = arith.constant 2 : index
    %c0_195 = arith.constant 0 : index
    %c0_196 = arith.constant 0 : index
    %186 = vector.load %arg6[%c0_193, %c2_194, %c0_195, %c0_196] : memref<1x3x512x128xbf16, #tpu.memory_space<vmem>>, vector<1x1x512x128xbf16>
    %187 = vector.shape_cast %186 : vector<1x1x512x128xbf16> to vector<512x128xbf16>
    %188 = arith.truncf %185 : vector<8x512xf32> to vector<8x512xbf16>
    %cst_197 = arith.constant dense<0.000000e+00> : vector<8x128xf32>
    %189 = tpu.matmul %188, %187, %cst_197 {dimension_numbers = #tpu.dot_dimension_numbers<[1], [0], [0], [1], [0, 0, 1, 1], [], []>} : vector<8x512xbf16>, vector<512x128xbf16>, vector<8x128xf32> -> vector<8x128xf32>
    %c0_198 = arith.constant 0 : index
    %c0_199 = arith.constant 0 : index
    %c256_200 = arith.constant 256 : index
    %190 = vector.load %arg7[%c0_198, %c0_199, %c256_200] : memref<1x1x384xf32, #tpu.memory_space<vmem>>, vector<1x1x128xf32>
    %191 = vector.shape_cast %190 : vector<1x1x128xf32> to vector<1x128xf32>
    %192 = vector.broadcast %191 : vector<1x128xf32> to vector<8x128xf32>
    %193 = arith.addf %189, %192 : vector<8x128xf32>
    %cst_201 = arith.constant 0.000000e+00 : f32
    %194 = vector.broadcast %cst_201 : f32 to vector<8x128xf32>
    %195 = arith.cmpf ogt, %193, %194 : vector<8x128xf32>
    %cst_202 = arith.constant 0.00999999977 : f32
    %196 = vector.broadcast %cst_202 : f32 to vector<8x128xf32>
    %197 = arith.mulf %196, %193 : vector<8x128xf32>
    %198 = arith.select %195, %193, %197 : vector<8x128xi1>, vector<8x128xf32>
    %199 = tpu.concatenate %76, %137, %198 in 1 : vector<8x128xf32>, vector<8x128xf32>, vector<8x128xf32> -> vector<8x384xf32>
    %c0_203 = arith.constant 0 : index
    %c0_204 = arith.constant 0 : index
    %c0_205 = arith.constant 0 : index
    %200 = vector.load %arg8[%c0_203, %c0_204, %c0_205] : memref<1x384x128xbf16, #tpu.memory_space<vmem>>, vector<1x384x128xbf16>
    %201 = vector.shape_cast %200 : vector<1x384x128xbf16> to vector<384x128xbf16>
    %202 = arith.truncf %199 : vector<8x384xf32> to vector<8x384xbf16>
    %cst_206 = arith.constant dense<0.000000e+00> : vector<8x128xf32>
    %203 = tpu.matmul %202, %201, %cst_206 {dimension_numbers = #tpu.dot_dimension_numbers<[1], [0], [0], [1], [0, 0, 1, 1], [], []>} : vector<8x384xbf16>, vector<384x128xbf16>, vector<8x128xf32> -> vector<8x128xf32>
    %c0_207 = arith.constant 0 : index
    %c0_208 = arith.constant 0 : index
    %c0_209 = arith.constant 0 : index
    %204 = vector.load %arg9[%c0_207, %c0_208, %c0_209] : memref<1x1x128xf32, #tpu.memory_space<vmem>>, vector<1x1x128xf32>
    %205 = vector.shape_cast %204 : vector<1x1x128xf32> to vector<1x128xf32>
    %206 = vector.broadcast %205 : vector<1x128xf32> to vector<8x128xf32>
    %207 = arith.addf %203, %206 : vector<8x128xf32>
    %cst_210 = arith.constant 0.000000e+00 : f32
    %208 = vector.broadcast %cst_210 : f32 to vector<8x128xf32>
    %209 = arith.cmpf ogt, %207, %208 : vector<8x128xf32>
    %cst_211 = arith.constant 0.00999999977 : f32
    %210 = vector.broadcast %cst_211 : f32 to vector<8x128xf32>
    %211 = arith.mulf %210, %207 : vector<8x128xf32>
    %212 = arith.select %209, %207, %211 : vector<8x128xi1>, vector<8x128xf32>
    %c0_212 = arith.constant 0 : index
    %c0_213 = arith.constant 0 : index
    %c0_214 = arith.constant 0 : index
    %213 = vector.load %arg10[%c0_212, %c0_213, %c0_214] : memref<1x128x128xbf16, #tpu.memory_space<vmem>>, vector<1x128x128xbf16>
    %214 = vector.shape_cast %213 : vector<1x128x128xbf16> to vector<128x128xbf16>
    %215 = arith.truncf %212 : vector<8x128xf32> to vector<8x128xbf16>
    %cst_215 = arith.constant dense<0.000000e+00> : vector<8x128xf32>
    %216 = tpu.matmul %215, %214, %cst_215 {dimension_numbers = #tpu.dot_dimension_numbers<[1], [0], [0], [1], [0, 0, 1, 1], [], []>} : vector<8x128xbf16>, vector<128x128xbf16>, vector<8x128xf32> -> vector<8x128xf32>
    %c0_216 = arith.constant 0 : index
    %c0_217 = arith.constant 0 : index
    %c0_218 = arith.constant 0 : index
    %217 = vector.load %arg11[%c0_216, %c0_217, %c0_218] : memref<1x1x128xf32, #tpu.memory_space<vmem>>, vector<1x1x128xf32>
    %218 = vector.shape_cast %217 : vector<1x1x128xf32> to vector<1x128xf32>
    %219 = vector.broadcast %218 : vector<1x128xf32> to vector<8x128xf32>
    %220 = arith.addf %216, %219 : vector<8x128xf32>
    %c0_219 = arith.constant 0 : index
    %c0_220 = arith.constant 0 : index
    %c0_221 = arith.constant 0 : index
    %221 = vector.load %arg12[%c0_219, %c0_220, %c0_221] : memref<1x8x128xf32, #tpu.memory_space<vmem>>, vector<1x8x128xf32>
    %222 = vector.shape_cast %221 : vector<1x8x128xf32> to vector<8x128xf32>
    %223 = vector.shape_cast %220 : vector<8x128xf32> to vector<1x8x128xf32>
    tpu.vector_store %arg12[%c0_219, %c0_220, %c0_221], %223 {strides = array<i32>} : memref<1x8x128xf32, #tpu.memory_space<vmem>>, vector<1x8x128xf32>,
    return
  }
  func.func @transform_0(%arg0: i32) -> (i32, i32) {
    %c0_i32 = arith.constant 0 : i32
    %c0_i32_0 = arith.constant 0 : i32
    %c0_i32_1 = arith.constant 0 : i32
    return %c0_i32, %c0_i32_0 : i32, i32
  }
  func.func @transform_1(%arg0: i32) -> (i32, i32, i32) {
    %c0_i32 = arith.constant 0 : i32
    %c0_i32_0 = arith.constant 0 : i32
    %c0_i32_1 = arith.constant 0 : i32
    return %arg0, %c0_i32, %c0_i32_0 : i32, i32, i32
  }
  func.func @transform_2(%arg0: i32) -> (i32, i32, i32) {
    %c0_i32 = arith.constant 0 : i32
    %c0_i32_0 = arith.constant 0 : i32
    %c0_i32_1 = arith.constant 0 : i32
    return %arg0, %c0_i32, %c0_i32_0 : i32, i32, i32
  }
  func.func @transform_3(%arg0: i32) -> (i32, i32, i32, i32) {
    %c0_i32 = arith.constant 0 : i32
    %c0_i32_0 = arith.constant 0 : i32
    %c0_i32_1 = arith.constant 0 : i32
    %c0_i32_2 = arith.constant 0 : i32
    return %arg0, %c0_i32, %c0_i32_0, %c0_i32_1 : i32, i32, i32, i32
  }
  func.func @transform_4(%arg0: i32) -> (i32, i32, i32) {
    %c0_i32 = arith.constant 0 : i32
    %c0_i32_0 = arith.constant 0 : i32
    %c0_i32_1 = arith.constant 0 : i32
    return %arg0, %c0_i32, %c0_i32_0 : i32, i32, i32
  }
  func.func @transform_5(%arg0: i32) -> (i32, i32, i32, i32) {
    %c0_i32 = arith.constant 0 : i32
    %c0_i32_0 = arith.constant 0 : i32
    %c0_i32_1 = arith.constant 0 : i32
    %c0_i32_2 = arith.constant 0 : i32
    return %arg0, %c0_i32, %c0_i32_0, %c0_i32_1 : i32, i32, i32, i32
  }
  func.func @transform_6(%arg0: i32) -> (i32, i32, i32) {
    %c0_i32 = arith.constant 0 : i32
    %c0_i32_0 = arith.constant 0 : i32
    %c0_i32_1 = arith.constant 0 : i32
    return %arg0, %c0_i32, %c0_i32_0 : i32, i32, i32
  }
  func.func @transform_7(%arg0: i32) -> (i32, i32, i32) {
    %c0_i32 = arith.constant 0 : i32
    %c0_i32_0 = arith.constant 0 : i32
    %c0_i32_1 = arith.constant 0 : i32
    return %arg0, %c0_i32, %c0_i32_0 : i32, i32, i32
  }
  func.func @transform_8(%arg0: i32) -> (i32, i32, i32) {
    %c0_i32 = arith.constant 0 : i32
    %c0_i32_0 = arith.constant 0 : i32
    %c0_i32_1 = arith.constant 0 : i32
    return %arg0, %c0_i32, %c0_i32_0 : i32, i32, i32
  }
  func.func @transform_9(%arg0: i32) -> (i32, i32, i32) {
    %c0_i32 = arith.constant 0 : i32
    %c0_i32_0 = arith.constant 0 : i32
    %c0_i32_1 = arith.constant 0 : i32
    return %arg0, %c0_i32, %c0_i32_0 : i32, i32, i32
  }
  func.func @transform_10(%arg0: i32) -> (i32, i32, i32) {
    %c0_i32 = arith.constant 0 : i32
    %c0_i32_0 = arith.constant 0 : i32
    %c0_i32_1 = arith.constant 0 : i32
    return %arg0, %c0_i32, %c0_i32_0 : i32, i32, i32
  }
  func.func @transform_11(%arg0: i32) -> (i32, i32, i32) {
    %c0_i32 = arith.constant 0 : i32
    %c0_i32_0 = arith.constant 0 : i32
    %c0_i32_1 = arith.constant 0 : i32
    return %arg0, %c0_i32, %c0_i32_0 : i32, i32, i32
  }
}

</mosaic_0001>

<bundles_post_ra>
// kernel: psp_output_layer.1
= control target key start
LH: loop header
LB: loop body
LE: loop exit
PB: predicated region body
PF: predicated region fallthrough
CT: control target
= control target key end

     0   :  { %s9405_s0 = inlined_call_operand.vmem [shape: f32[128,128], index: 0, kind: input, shape index: {}]   ;;  %s9406_s1 = inlined_call_operand.hbm [shape: bf16[6,128,384], index: 1, kind: input, shape index: {}]   ;;  %s9407_s2 = inlined_call_operand.hbm [shape: f32[6,1,384], index: 2, kind: input, shape index: {}]   ;;  %s9408_s3 = inlined_call_operand.hbm [shape: bf16[6,3,1152,128], index: 3, kind: input, shape index: {}]   ;;  %s9409_s4 = inlined_call_operand.hbm [shape: f32[6,1,384], index: 4, kind: input, shape index: {}]   ;;  %s9410_s5 = inlined_call_operand.hbm [shape: bf16[6,3,512,128], index: 5, kind: input, shape index: {}]   ;;  %s9411_s6 = inlined_call_operand.hbm [shape: f32[6,1,384], index: 6, kind: input, shape index: {}]   ;;  %s9412_s7 = inlined_call_operand.hbm [shape: bf16[6,384,128], index: 7, kind: input, shape index: {}]   ;;  %s9413_s8 = inlined_call_operand.hbm [shape: f32[6,1,128], index: 8, kind: input, shape index: {}]   ;;  %s9414_s9 = inlined_call_operand.hbm [shape: bf16[6,128,128], index: 9, kind: input, shape index: {}]   ;;  %s9415_s10 = inlined_call_operand.hbm [shape: f32[6,1,128], index: 10, kind: input, shape index: {}]   ;;  %s9416_s11 = inlined_call_operand.vmem [shape: f32[6,8,128], index: 11, kind: output, shape index: {}]  }
   0x1   :  { %9444 = sst [smem:[#allocation40_spill]] %s9405_s0 }
   0x2   :  { %9445 = sst [smem:[#allocation41_spill]] %s9406_s1 }
   0x3   :  { %9446 = sst [smem:[#allocation42_spill]] %s9407_s2 }
   0x4   :  { %9447 = sst [smem:[#allocation43_spill]] %s9408_s3 }
   0x5   :  { %9448 = sst [smem:[#allocation44_spill]] %s9409_s4 }
   0x6   :  { %9449 = sst [smem:[#allocation45_spill]] %s9416_s11 }
   0x7   :  { %16 = vsyncpa [#allocation4], 0 }
   0x8   :  { %18 = vsyncpa [#allocation4 + $0x1], 0 }
   0x9   :  { %19 = vsyncpa [#allocation6], 0 }
   0xa   :  { %21 = vsyncpa [#allocation6 + $0x1], 0 }
   0xb   :  { %22 = vsyncpa [#allocation9], 0 }
   0xc   :  { %24 = vsyncpa [#allocation9 + $0x1], 0 }
   0xd   :  { %25 = vsyncpa [#allocation12], 0 }
   0xe   :  { %27 = vsyncpa [#allocation12 + $0x1], 0 }
   0xf   :  { %28 = vsyncpa [#allocation15], 0 }
  0x10   :  { %30 = vsyncpa [#allocation15 + $0x1], 0 }
  0x11   :  { %31 = vsyncpa [#allocation18], 0 }
  0x12   :  { %33 = vsyncpa [#allocation18 + $0x1], 0  ;;  %s8050_s17 = smov 0   ;;  %s8052_s18 = smov 0  }
  0x13   :  { %s8054_s19 = smov 0   ;;  %s8056_s20 = smov 0  }
  0x14 LB: > { %9450 = sst [smem:[#allocation25_spill]] %s7966_s19  ;;  %s8069_s21 = sadd.s32 4294967295, %s7970_s20   ;;  %s7970_s20 = sphi %s8056_s20, %s9513_s20   ;;  %s7966_s19 = sphi %s8054_s19, %s9515_s19   ;;  %s7962_s18 = sphi %s8052_s18, %s9517_s18   ;;  %s7958_s17 = sphi %s8050_s17, %s9516_s17  }
  0x15   : > { %9451 = sst [smem:[#allocation26_spill]] %s8069_s21  ;;  %s8072_s22 = sadd.s32 1, %s7970_s20  }
  0x16   : > { %9452 = sst [smem:[#allocation27_spill]] %s8072_s22  ;;  %s64_s23 = ssub.s32 %s7970_s20, %s8072_s22 }
  0x17   : > { %s67_s24 = sadd.s32 1, %s7966_s19  ;;  %p65_p0 = scmp.eq.s32.totalorder %s64_s23, 0 }
  0x18   : > { %p74_p1 = scmp.ne.s32.totalorder %s7966_s19, %s7962_s18  ;;  %p75_p2 = scmp.eq.s32.totalorder %s7970_s20, 0 }
  0x19   : > { %p80_p3 = scmp.ne.s32.totalorder %s7962_s18, %s7958_s17  ;;  %p81_p5 = scmp.eq.s32.totalorder %s8069_s21, 0 }
  0x1a   : > { %s8082_s25 = scalar_select %p65_p0, %s7966_s19, %s67_s24  }
  0x1b   : > { %p76_p4 = por %p75_p2, %p74_p1  ;;  %p7218_p6 = scmp.lt.s32.totalorder %s7970_s20, 6 }
  0x1c   : > { %9453 = sst [smem:[#allocation28_spill]] %s8082_s25  ;;  %p8086_p7 = por %p81_p5, %p80_p3 }
  0x1d   : > { %s8091_s27 = sand.u32 1, %s7966_s19   ;;  %p8093_p8 = pnand %p7218_p6, %p76_p4 }
  0x1e   : > { %s9454_s26 = scalar_select %p8086_p7, 1, 0 }
  0x1f   : > { %s8098_s29 = sand.u32 1, %s7970_s20   ;;  %s8101_s30 = smul.u32 3, %s8091_s27 }
  0x20   : > { %s8104_s12 = smul.u32 48, %s7970_s20  ;;  %s9456_s2 = sld [smem:[#allocation42_spill]] }
  0x21   : > { %s392_s16 = scalar_lea.vmem [#allocation5], %s8101_s30  ;;  %p8120_p12 = pneg %p8093_p8 }
  0x22   : > { %s400_s17 = sshll.u32 %s392_s16, 4  ;;  %s401_s17 = int_to_ptr.vmem [resolvable:$true] %s400_s17 }
  0x26   : > { %s8111_s15 = scalar_lea.hbm %s9456_s2, %s8104_s12  ;;  %s7641_s19 = scalar_lea.hbm %s9456_s2, 288 }
  0x27   : > { %s7636_s24 = scalar_lea.hbm %s8111_s15, 48  ;;  %p7642_p1 = scmp.lt.s32.totalorder %s8111_s15, %s9456_s2 }
  0x28   : > { %p7637_p11 = scmp.ne.s32.totalorder %s8111_s15, %s7636_s24  ;;  %p7643_p2 = scmp.lt.s32.totalorder %s7641_s19, %s7636_s24 }
  0x2a   : > { %p7639_p13 = pnand %p8120_p12, %p7637_p11  ;;  %p7644_p3 = por %p7643_p2, %p7642_p1 }
  0x2c   : > { %p7640_p0 = pneg %p7639_p13 }
  0x2e   : > { %p7645_p4 = pnand %p7644_p3, %p7640_p0 }
  0x30   : > { %7648 = shalt.err (!%p7645_p4)
}
  0x31   : > { %s7649_s23 = scalar_lea.vmem %s401_s17, 48  ;;  %s7972_s11 = smov [#allocation5]  }
  0x32   : > { %p7650_p5 = scmp.ne.s32.totalorder %s401_s17, %s7649_s23  ;;  %s7654_s0 = sshll.u32 %s7972_s11, 4  ;;  %s7655_s0 = int_to_ptr.vmem [resolvable:$false] %s7654_s0 }
  0x33   : > { %s7656_s21 = scalar_lea.vmem %s7655_s0, 96  ;;  %p7657_p11 = scmp.lt.s32.totalorder %s401_s17, %s7655_s0 }
  0x34   : > { %p7652_p6 = pnand %p7650_p5, %p8120_p12  ;;  %p7658_p13 = scmp.lt.s32.totalorder %s7656_s21, %s7649_s23 }
  0x36   : > { %p7653_p9 = pneg %p7652_p6  ;;  %p7659_p10 = por %p7658_p13, %p7657_p11 }
  0x38   : > { %p7660_p7 = pnand %p7659_p10, %p7653_p9 }
  0x3a   : > { %7663 = shalt.err (!%p7660_p7)
}
  0x3b   : > { %s9458_s19 = scalar_lea.sflag [#allocation6], %s8098_s29  ;;  %p9459_p0 = scmp.lt.s32.totalorder %s7970_s20, 7 }
  0x3c   : > { %7193 = dma.hbm_to_vmem [thread:$0]  (!%p8093_p8), %s8111_s15, 48, %s401_s17, %s9458_s19  }
  0x3d   : > { %p9460_p1 = scmp.ge.s32.totalorder %s7970_s20, 1  ;;  %s9462_s4 = sld [smem:[#allocation44_spill]] }
  0x3e   : > { %s432_s23 = scalar_lea.vmem [#allocation8], %s8101_s30 }
  0x3f   : > { %p8144_p2 = pnand %p9460_p1, %p9459_p0  ;;  %s440_s24 = sshll.u32 %s432_s23, 4  ;;  %s441_s24 = int_to_ptr.vmem [resolvable:$true] %s440_s24 }
  0x41   : > { %s9461_s0 = scalar_select %p8144_p2, 1, 0 }
  0x43   : > { %s8152_s22 = scalar_lea.hbm %s9462_s4, %s8104_s12  ;;  %s7669_s16 = scalar_lea.hbm %s9462_s4, 288 }
  0x44   : > { %s7664_s14 = scalar_lea.hbm %s8152_s22, 48  ;;  %p7670_p3 = scmp.lt.s32.totalorder %s8152_s22, %s9462_s4 }
  0x45   : > { %p7665_p7 = scmp.ne.s32.totalorder %s8152_s22, %s7664_s14  ;;  %p7671_p4 = scmp.lt.s32.totalorder %s7669_s16, %s7664_s14 }
  0x47   : > { %p7667_p9 = pnand %p7665_p7, %p8120_p12  ;;  %p7672_p5 = por %p7671_p4, %p7670_p3 }
  0x49   : > { %p7668_p10 = pneg %p7667_p9 }
  0x4b   : > { %p7673_p6 = pnand %p7672_p5, %p7668_p10 }
  0x4d   : > { %7676 = shalt.err (!%p7673_p6)
}
  0x4e   : > { %s7677_s21 = scalar_lea.vmem %s441_s24, 48  ;;  %s7973_s23 = smov [#allocation8]  }
  0x4f   : > { %p7678_p11 = scmp.ne.s32.totalorder %s441_s24, %s7677_s21  ;;  %s7682_s13 = sshll.u32 %s7973_s23, 4  ;;  %s7683_s13 = int_to_ptr.vmem [resolvable:$false] %s7682_s13 }
  0x50   : > { %s7684_s2 = scalar_lea.vmem %s7683_s13, 96  ;;  %p7685_p1 = scmp.lt.s32.totalorder %s441_s24, %s7683_s13 }
  0x51   : > { %p7680_p13 = pnand %p7678_p11, %p8120_p12  ;;  %p7686_p7 = scmp.lt.s32.totalorder %s7684_s2, %s7677_s21 }
  0x53   : > { %p7681_p0 = pneg %p7680_p13  ;;  %p7687_p9 = por %p7686_p7, %p7685_p1 }
  0x55   : > { %p7688_p2 = pnand %p7687_p9, %p7681_p0 }
  0x57   : > { %7691 = shalt.err (!%p7688_p2)
}
  0x58   : > { %s9463_s14 = scalar_lea.sflag [#allocation9], %s8098_s29  ;;  %s8178_s16 = scalar_lea.hbm %s9411_s6, %s8104_s12 }
  0x59   : > { %7199 = dma.hbm_to_vmem [thread:$0]  (!%p8093_p8), %s8152_s22, 48, %s441_s24, %s9463_s14  }
  0x5a   : > { %s472_s2 = scalar_lea.vmem [#allocation11], %s8101_s30  ;;  %s9426_s19 = scalar_lea.sflag [#allocation12], %s8098_s29 }
  0x5b   : > { %s480_s13 = sshll.u32 %s472_s2, 4  ;;  %s7692_s11 = scalar_lea.hbm %s8178_s16, 48  ;;  %s481_s13 = int_to_ptr.vmem [resolvable:$true] %s480_s13 }
  0x5c   : > { %p7693_p2 = scmp.ne.s32.totalorder %s8178_s16, %s7692_s11  ;;  %s7697_s22 = scalar_lea.hbm %s9411_s6, 288 }
  0x5d   : > { %p7698_p4 = scmp.lt.s32.totalorder %s8178_s16, %s9411_s6  ;;  %p7699_p5 = scmp.lt.s32.totalorder %s7697_s22, %s7692_s11 }
  0x5e   : > { %p7695_p10 = pnand %p7693_p2, %p8120_p12 }
  0x5f   : > { %p7700_p6 = por %p7699_p5, %p7698_p4 }
  0x60   : > { %p7696_p3 = pneg %p7695_p10 }
  0x62   : > { %p7701_p11 = pnand %p7700_p6, %p7696_p3 }
  0x64   : > { %7704 = shalt.err (!%p7701_p11)
}
  0x65   : > { %s7705_s30 = scalar_lea.vmem %s481_s13, 48  ;;  %s7974_s12 = smov [#allocation11]  }
  0x66   : > { %p7706_p13 = scmp.ne.s32.totalorder %s481_s13, %s7705_s30  ;;  %s7710_s15 = sshll.u32 %s7974_s12, 4  ;;  %s7711_s15 = int_to_ptr.vmem [resolvable:$false] %s7710_s15 }
  0x67   : > { %s7712_s17 = scalar_lea.vmem %s7711_s15, 96  ;;  %p7713_p7 = scmp.lt.s32.totalorder %s481_s13, %s7711_s15 }
  0x68   : > { %p7708_p0 = pnand %p7706_p13, %p8120_p12  ;;  %p7714_p9 = scmp.lt.s32.totalorder %s7712_s17, %s7705_s30 }
  0x6a   : > { %p7709_p1 = pneg %p7708_p0  ;;  %p7715_p2 = por %p7714_p9, %p7713_p7 }
  0x6c   : > { %p7716_p10 = pnand %p7715_p2, %p7709_p1 }
  0x6e   : > { %7719 = shalt.err (!%p7716_p10)
}
  0x6f   : > { %7205 = dma.hbm_to_vmem [thread:$0]  (!%p8093_p8), %s8178_s16, 48, %s481_s13, %s9426_s19  }
  0x70   : > { %s9424_s2 = sshll.u32 %s7970_s20, 4  ;;  %s511_s22 = scalar_lea.vmem [#allocation14], %s8091_s27 }
  0x71   : > { %s8206_s23 = scalar_lea.hbm %s9413_s8, %s9424_s2  ;;  %s518_s24 = sshll.u32 %s511_s22, 4  ;;  %s519_s24 = int_to_ptr.vmem [resolvable:$true] %s518_s24 }
  0x72   : > { %s9425_s14 = scalar_lea.sflag [#allocation15], %s8098_s29  ;;  %s7720_s30 = scalar_lea.hbm %s8206_s23, 16 }
  0x73   : > { %p7721_p3 = scmp.ne.s32.totalorder %s8206_s23, %s7720_s30  ;;  %s7725_s12 = scalar_lea.hbm %s9413_s8, 96 }
  0x74   : > { %p7726_p6 = scmp.lt.s32.totalorder %s8206_s23, %s9413_s8  ;;  %p7727_p11 = scmp.lt.s32.totalorder %s7725_s12, %s7720_s30 }
  0x75   : > { %p7723_p4 = pnand %p7721_p3, %p8120_p12 }
  0x76   : > { %p7728_p13 = por %p7727_p11, %p7726_p6 }
  0x77   : > { %p7724_p5 = pneg %p7723_p4 }
  0x79   : > { %p7729_p0 = pnand %p7728_p13, %p7724_p5 }
  0x7b   : > { %7732 = shalt.err (!%p7729_p0)
}
  0x7c   : > { %s7733_s11 = scalar_lea.vmem %s519_s24, 16  ;;  %s7975_s21 = smov [#allocation14]  }
  0x7d   : > { %p7734_p1 = scmp.ne.s32.totalorder %s519_s24, %s7733_s11  ;;  %s7738_s22 = sshll.u32 %s7975_s21, 4  ;;  %s7739_s22 = int_to_ptr.vmem [resolvable:$false] %s7738_s22 }
  0x7e   : > { %s7740_s2 = scalar_lea.vmem %s7739_s22, 32  ;;  %p7741_p2 = scmp.lt.s32.totalorder %s519_s24, %s7739_s22 }
  0x7f   : > { %p7736_p7 = pnand %p7734_p1, %p8120_p12  ;;  %p7742_p10 = scmp.lt.s32.totalorder %s7740_s2, %s7733_s11 }
  0x81   : > { %p7737_p9 = pneg %p7736_p7  ;;  %p7743_p3 = por %p7742_p10, %p7741_p2 }
  0x83   : > { %p7744_p4 = pnand %p7743_p3, %p7737_p9 }
  0x85   : > { %7747 = shalt.err (!%p7744_p4)
}
  0x86   : > { %7211 = dma.hbm_to_vmem [thread:$0]  (!%p8093_p8), %s8206_s23, 16, %s519_s24, %s9425_s14  }
  0x87   : > { %s9427_s30 = smul.u32 192, %s8091_s27  ;;  %s9464_s1 = sld [smem:[#allocation41_spill]] }
  0x88   : > { %s7150_s16 = smul.u32 3072, %s7970_s20  ;;  %s368_s21 = scalar_lea.sflag [#allocation4], %s8091_s27 }
  0x89   : > { %s7153_s13 = smul.u32 1728, %s8091_s27  ;;  %s371_s17 = scalar_lea.vmem [#allocation3], %s9427_s30 }
  0x8a   : > { %s378_s11 = sshll.u32 %s371_s17, 4  ;;  %s8240_s11 = int_to_ptr.vmem [resolvable:$true] %s378_s11 }
  0x8d   : > { %s8236_s15 = scalar_lea.hbm %s9464_s1, %s7150_s16  ;;  %s7753_s2 = scalar_lea.hbm %s9464_s1, 18432 }
  0x8e   : > { %s7748_s22 = scalar_lea.hbm %s8236_s15, 3072  ;;  %p7754_p13 = scmp.lt.s32.totalorder %s8236_s15, %s9464_s1 }
  0x8f   : > { %p7749_p5 = scmp.ne.s32.totalorder %s8236_s15, %s7748_s22  ;;  %p7755_p0 = scmp.lt.s32.totalorder %s7753_s2, %s7748_s22 }
  0x91   : > { %p7751_p6 = pnand %p7749_p5, %p8120_p12  ;;  %p7756_p1 = por %p7755_p0, %p7754_p13 }
  0x93   : > { %p7752_p11 = pneg %p7751_p6 }
  0x95   : > { %p7757_p7 = pnand %p7756_p1, %p7752_p11 }
  0x97   : > { %7760 = shalt.err (!%p7757_p7)
}
  0x98   : > { %s7761_s17 = scalar_lea.vmem %s8240_s11, 3072  ;;  %s7976_s19 = smov [#allocation3]  }
  0x99   : > { %p7762_p9 = scmp.ne.s32.totalorder %s8240_s11, %s7761_s17  ;;  %s7766_s23 = sshll.u32 %s7976_s19, 4  ;;  %s7767_s23 = int_to_ptr.vmem [resolvable:$false] %s7766_s23 }
  0x9a   : > { %s7768_s24 = scalar_lea.vmem %s7767_s23, 6144  ;;  %p7769_p3 = scmp.lt.s32.totalorder %s8240_s11, %s7767_s23 }
  0x9b   : > { %p7764_p2 = pnand %p7762_p9, %p8120_p12  ;;  %p7770_p4 = scmp.lt.s32.totalorder %s7768_s24, %s7761_s17 }
  0x9d   : > { %p7765_p10 = pneg %p7764_p2  ;;  %p7771_p5 = por %p7770_p4, %p7769_p3 }
  0x9f   : > { %p7772_p6 = pnand %p7771_p5, %p7765_p10 }
  0xa1   : > { %7775 = shalt.err (!%p7772_p6)
}
  0xa2   : > { %s7977_s14 = smov 192   ;;  %s7978_s22 = smov 12  }
  0xa3   : > { %7190 = dma.hbm_to_vmem [thread:$0]  (!%p8093_p8), %s8236_s15, 3072, %s8240_s11, %s368_s21, %s7977_s14, %s7977_s14, %s7978_s22  }
  0xa4   : > { %s7154_s19 = smul.u32 27648, %s7970_s20  ;;  %s411_s2 = scalar_lea.vmem [#allocation7], %s7153_s13 }
  0xa5   : > { %s418_s12 = sshll.u32 %s411_s2, 4  ;;  %s9465_s3 = sld [smem:[#allocation43_spill]]  ;;  %s8268_s12 = int_to_ptr.vmem [resolvable:$true] %s418_s12 }
  0xab   : > { %s8273_s24 = scalar_lea.hbm %s9465_s3, %s7154_s19  ;;  %s7781_s13 = scalar_lea.hbm %s9465_s3, 165888 }
  0xac   : > { %s7776_s30 = scalar_lea.hbm %s8273_s24, 27648  ;;  %p7782_p1 = scmp.lt.s32.totalorder %s8273_s24, %s9465_s3 }
  0xad   : > { %p7777_p11 = scmp.ne.s32.totalorder %s8273_s24, %s7776_s30  ;;  %p7783_p7 = scmp.lt.s32.totalorder %s7781_s13, %s7776_s30 }
  0xaf   : > { %p7779_p13 = pnand %p7777_p11, %p8120_p12  ;;  %p7784_p9 = por %p7783_p7, %p7782_p1 }
  0xb1   : > { %p7780_p0 = pneg %p7779_p13 }
  0xb3   : > { %p7785_p2 = pnand %p7784_p9, %p7780_p0 }
  0xb5   : > { %7788 = shalt.err (!%p7785_p2)
}
  0xb6   : > { %s7789_s22 = scalar_lea.vmem %s8268_s12, 27648  ;;  %s7979_s19 = smov [#allocation7]  }
  0xb7   : > { %p7790_p10 = scmp.ne.s32.totalorder %s8268_s12, %s7789_s22  ;;  %s7794_s2 = sshll.u32 %s7979_s19, 4  ;;  %s7795_s2 = int_to_ptr.vmem [resolvable:$false] %s7794_s2 }
  0xb8   : > { %s7796_s17 = scalar_lea.vmem %s7795_s2, 55296  ;;  %p7797_p5 = scmp.lt.s32.totalorder %s8268_s12, %s7795_s2 }
  0xb9   : > { %p7792_p3 = pnand %p7790_p10, %p8120_p12  ;;  %p7798_p6 = scmp.lt.s32.totalorder %s7796_s17, %s7789_s22 }
  0xbb   : > { %p7793_p4 = pneg %p7792_p3  ;;  %p7799_p11 = por %p7798_p6, %p7797_p5 }
  0xbd   : > { %p7800_p13 = pnand %p7799_p11, %p7793_p4 }
  0xbf   : > { %7803 = shalt.err (!%p7800_p13)
}
  0xc0   : > { %s7980_s30 = smov 64   ;;  %s7981_s23 = smov 4  }
  0xc1   : > { %s9466_s15 = scalar_lea.sflag [#allocation6], %s8098_s29  ;;  %s7157_s11 = smul.u32 768, %s8091_s27 }
  0xc2   : > { %7196 = dma.hbm_to_vmem [thread:$0]  (!%p8093_p8), %s8273_s24, 27648, %s8268_s12, %s9466_s15, %s7980_s30, %s7980_s30, %s7981_s23  }
  0xc3   : > { %s7158_s13 = smul.u32 12288, %s7970_s20  ;;  %s8307_s22 = scalar_lea.hbm %s9412_s7, %s7150_s16 }
  0xc4   : > { %s9467_s19 = smul.u32 192, %s8091_s27  ;;  %s451_s12 = scalar_lea.vmem [#allocation10], %s7157_s11 }
  0xc5   : > { %s8314_s4 = scalar_lea.hbm %s9410_s5, %s7158_s13  ;;  %s458_s24 = sshll.u32 %s451_s12, 4  ;;  %s8316_s24 = int_to_ptr.vmem [resolvable:$true] %s458_s24 }
  0xc6   : > { %s491_s2 = scalar_lea.vmem [#allocation13], %s9467_s19  ;;  %s7804_s15 = scalar_lea.hbm %s8314_s4, 12288 }
  0xc7   : > { %s498_s17 = sshll.u32 %s491_s2, 4  ;;  %p7805_p0 = scmp.ne.s32.totalorder %s8314_s4, %s7804_s15  ;;  %s8318_s17 = int_to_ptr.vmem [resolvable:$true] %s498_s17 }
  0xc8   : > { %s7809_s1 = scalar_lea.hbm %s9410_s5, 73728  ;;  %p7810_p9 = scmp.lt.s32.totalorder %s8314_s4, %s9410_s5 }
  0xc9   : > { %p7807_p1 = pnand %p7805_p0, %p8120_p12  ;;  %p7811_p2 = scmp.lt.s32.totalorder %s7809_s1, %s7804_s15 }
  0xcb   : > { %p7808_p7 = pneg %p7807_p1  ;;  %p7812_p10 = por %p7811_p2, %p7810_p9 }
  0xcd   : > { %p7813_p3 = pnand %p7812_p10, %p7808_p7 }
  0xcf   : > { %7816 = shalt.err (!%p7813_p3)
}
  0xd0   : > { %s7817_s11 = scalar_lea.vmem %s8316_s24, 12288  ;;  %s7982_s14 = smov [#allocation10]  }
  0xd1   : > { %p7818_p4 = scmp.ne.s32.totalorder %s8316_s24, %s7817_s11  ;;  %s7822_s19 = sshll.u32 %s7982_s14, 4  ;;  %s7823_s19 = int_to_ptr.vmem [resolvable:$false] %s7822_s19 }
  0xd2   : > { %s7824_s2 = scalar_lea.vmem %s7823_s19, 24576  ;;  %p7825_p11 = scmp.lt.s32.totalorder %s8316_s24, %s7823_s19 }
  0xd3   : > { %p7820_p5 = pnand %p7818_p4, %p8120_p12  ;;  %p7826_p13 = scmp.lt.s32.totalorder %s7824_s2, %s7817_s11 }
  0xd5   : > { %p7821_p6 = pneg %p7820_p5  ;;  %p7827_p0 = por %p7826_p13, %p7825_p11 }
  0xd7   : > { %p7828_p1 = pnand %p7827_p0, %p7821_p6 }
  0xd9   : > { %7831 = shalt.err (!%p7828_p1)
}
  0xda   : > { %s9468_s12 = scalar_lea.sflag [#allocation9], %s8098_s29  ;;  %s7832_s15 = scalar_lea.hbm %s8307_s22, 3072 }
  0xdb   : > { %7202 = dma.hbm_to_vmem [thread:$0]  (!%p8093_p8), %s8314_s4, 12288, %s8316_s24, %s9468_s12, %s7980_s30, %s7980_s30, %s7981_s23  }
  0xdc   : > { %p7833_p7 = scmp.ne.s32.totalorder %s8307_s22, %s7832_s15  ;;  %s7837_s1 = scalar_lea.hbm %s9412_s7, 18432 }
  0xdd   : > { %p7838_p10 = scmp.lt.s32.totalorder %s8307_s22, %s9412_s7  ;;  %p7839_p3 = scmp.lt.s32.totalorder %s7837_s1, %s7832_s15 }
  0xde   : > { %p7835_p9 = pnand %p7833_p7, %p8120_p12 }
  0xdf   : > { %p7840_p4 = por %p7839_p3, %p7838_p10 }
  0xe0   : > { %p7836_p2 = pneg %p7835_p9 }
  0xe2   : > { %p7841_p5 = pnand %p7840_p4, %p7836_p2 }
  0xe4   : > { %7844 = shalt.err (!%p7841_p5)
}
  0xe5   : > { %s7845_s4 = scalar_lea.vmem %s8318_s17, 3072  ;;  %s7983_s24 = smov [#allocation13]  }
  0xe6   : > { %p7846_p6 = scmp.ne.s32.totalorder %s8318_s17, %s7845_s4  ;;  %s7850_s11 = sshll.u32 %s7983_s24, 4  ;;  %s7851_s11 = int_to_ptr.vmem [resolvable:$false] %s7850_s11 }
  0xe7   : > { %s7852_s14 = scalar_lea.vmem %s7851_s11, 6144  ;;  %p7853_p0 = scmp.lt.s32.totalorder %s8318_s17, %s7851_s11 }
  0xe8   : > { %p7848_p11 = pnand %p7846_p6, %p8120_p12  ;;  %p7854_p1 = scmp.lt.s32.totalorder %s7852_s14, %s7845_s4 }
  0xea   : > { %p7849_p13 = pneg %p7848_p11  ;;  %p7855_p7 = por %p7854_p1, %p7853_p0 }
  0xec   : > { %p7856_p9 = pnand %p7855_p7, %p7849_p13 }
  0xee   : > { %7859 = shalt.err (!%p7856_p9)
}
  0xef   : > { %s9469_s19 = scalar_lea.sflag [#allocation12], %s8098_s29  ;;  %s5661_s2 = sshll.u32 %s8091_s27, 6 }
  0xf0   : > { %7208 = dma.hbm_to_vmem [thread:$0]  (!%p8093_p8), %s8307_s22, 3072, %s8318_s17, %s9469_s19, %s7980_s30, %s7980_s30, %s7981_s23  }
  0xf1   : > { %s6462_s12 = sshll.u32 %s7970_s20, 10  ;;  %s529_s1 = scalar_lea.vmem [#allocation16], %s5661_s2 }
  0xf2   : > { %s8375_s21 = scalar_lea.hbm %s9414_s9, %s6462_s12  ;;  %s536_s3 = sshll.u32 %s529_s1, 4  ;;  %s537_s3 = int_to_ptr.vmem [resolvable:$true] %s536_s3 }
  0xf3   : > { %s7860_s13 = scalar_lea.hbm %s8375_s21, 1024  ;;  %s7865_s17 = scalar_lea.hbm %s9414_s9, 6144 }
  0xf4   : > { %p7861_p2 = scmp.ne.s32.totalorder %s8375_s21, %s7860_s13  ;;  %p7866_p4 = scmp.lt.s32.totalorder %s8375_s21, %s9414_s9 }
  0xf5   : > { %p7867_p5 = scmp.lt.s32.totalorder %s7865_s17, %s7860_s13 }
  0xf6   : > { %p7863_p10 = pnand %p7861_p2, %p8120_p12 }
  0xf7   : > { %p7868_p6 = por %p7867_p5, %p7866_p4 }
  0xf8   : > { %p7864_p3 = pneg %p7863_p10 }
  0xfa   : > { %p7869_p11 = pnand %p7868_p6, %p7864_p3 }
  0xfc   : > { %7872 = shalt.err (!%p7869_p11)
}
  0xfd   : > { %s7873_s14 = scalar_lea.vmem %s537_s3, 1024  ;;  %s7984_s19 = smov [#allocation16]  }
  0xfe   : > { %p7874_p13 = scmp.ne.s32.totalorder %s537_s3, %s7873_s14  ;;  %s7878_s2 = sshll.u32 %s7984_s19, 4  ;;  %s7879_s2 = int_to_ptr.vmem [resolvable:$false] %s7878_s2 }
  0xff   : > { %s7880_s12 = scalar_lea.vmem %s7879_s2, 2048  ;;  %p7881_p7 = scmp.lt.s32.totalorder %s537_s3, %s7879_s2 }
 0x100   : > { %p7876_p0 = pnand %p7874_p13, %p8120_p12  ;;  %p7882_p9 = scmp.lt.s32.totalorder %s7880_s12, %s7873_s14 }
 0x102   : > { %p7877_p1 = pneg %p7876_p0  ;;  %p7883_p2 = por %p7882_p9, %p7881_p7 }
 0x104   : > { %p7884_p10 = pnand %p7883_p2, %p7877_p1 }
 0x106   : > { %7887 = shalt.err (!%p7884_p10)
}
 0x107   : > { %s9470_s15 = scalar_lea.sflag [#allocation15], %s8098_s29  ;;  %s9471_s16 = sshll.u32 %s7970_s20, 4 }
 0x108   : > { %7214 = dma.hbm_to_vmem [thread:$0]  (!%p8093_p8), %s8375_s21, 1024, %s537_s3, %s9470_s15, %s7980_s30, %s7980_s30, %s7981_s23  }
 0x109   : > { %s8403_s4 = scalar_lea.hbm %s9415_s10, %s9471_s16  ;;  %s549_s22 = scalar_lea.vmem [#allocation17], %s8091_s27 }
 0x10a   : > { %s556_s17 = sshll.u32 %s549_s22, 4  ;;  %s547_s24 = scalar_lea.sflag [#allocation18], %s8091_s27  ;;  %s557_s17 = int_to_ptr.vmem [resolvable:$true] %s556_s17 }
 0x10b   : > { %s7888_s29 = scalar_lea.hbm %s8403_s4, 16  ;;  %s7893_s20 = scalar_lea.hbm %s9415_s10, 96 }
 0x10c   : > { %p7889_p3 = scmp.ne.s32.totalorder %s8403_s4, %s7888_s29  ;;  %p7894_p6 = scmp.lt.s32.totalorder %s8403_s4, %s9415_s10 }
 0x10d   : > { %p7895_p11 = scmp.lt.s32.totalorder %s7893_s20, %s7888_s29 }
 0x10e   : > { %p7891_p4 = pnand %p7889_p3, %p8120_p12 }
 0x10f   : > { %p7896_p13 = por %p7895_p11, %p7894_p6 }
 0x110   : > { %p7892_p5 = pneg %p7891_p4 }
 0x112   : > { %p7897_p0 = pnand %p7896_p13, %p7892_p5 }
 0x114   : > { %7900 = shalt.err (!%p7897_p0)
}
 0x115   : > { %s7901_s3 = scalar_lea.vmem %s557_s17, 16  ;;  %s7985_s27 = smov [#allocation17]  }
 0x116   : > { %p7902_p1 = scmp.ne.s32.totalorder %s557_s17, %s7901_s3  ;;  %s7906_s14 = sshll.u32 %s7985_s27, 4  ;;  %s7907_s14 = int_to_ptr.vmem [resolvable:$false] %s7906_s14 }
 0x117   : > { %s7908_s19 = scalar_lea.vmem %s7907_s14, 32  ;;  %p7909_p2 = scmp.lt.s32.totalorder %s557_s17, %s7907_s14 }
 0x118   : > { %p7904_p7 = pnand %p7902_p1, %p8120_p12  ;;  %p7910_p10 = scmp.lt.s32.totalorder %s7908_s19, %s7901_s3 }
 0x11a   : > { %p7905_p9 = pneg %p7904_p7  ;;  %p7911_p3 = por %p7910_p10, %p7909_p2 }
 0x11c   : > { %p7912_p4 = pnand %p7911_p3, %p7905_p9 }
 0x11e   : > { %7915 = shalt.err (!%p7912_p4)
}
 0x11f   : > { %7217 = dma.hbm_to_vmem [thread:$0]  (!%p8093_p8), %s8403_s4, 16, %s557_s17, %s547_s24  }
 0x120   : > { %p9472_p5 = scmp.ne.s32.totalorder %s9461_s0, 0 }
 0x122   : > { %565 = sbr.rel (%p9472_p5) target bundleno = 2039 (0x7f7), region = 64 }
 0x127   : > { %s8426_s25 = sand.u32 1, %s7962_s18   ;;  %p9473_p12 = scmp.ne.s32.totalorder %s9454_s26, 0 }
 0x128   : > { %s7163_s2 = smul.u32 192, %s8426_s25  ;;  %s568_s12 = scalar_lea.sflag [#allocation4], %s8426_s25 }
 0x12a   : > { %s8430_s15 = scalar_lea.vmem [#allocation3], %s7163_s2 }
 0x12b   : > { %7933 = dma.done.wait (%p9473_p12), %s568_s12, 3072  }
 0x12c   : > { %7935 = vsyncadd (%p9473_p12), %s568_s12, 4294964224  ;;  %s9474_s28 = sld [smem:[#allocation26_spill]]  ;;  %s8438_s16 = smul.u32 3, %s8426_s25 }
 0x12e   : > { %s580_s13 = scalar_lea.vmem [#allocation5], %s8438_s16 }
 0x132   : > { %s576_s0 = sand.u32 1, %s9474_s28  }
 0x133   : > { %s577_s1 = scalar_lea.sflag [#allocation6], %s576_s0 }
 0x134   : > { %7937 = dma.done.wait (%p9473_p12), %s577_s1, 27696  }
 0x135   : > { %7939 = vsyncadd (%p9473_p12), %s577_s1, 4294939600  ;;  %s7165_s4 = smul.u32 1728, %s8426_s25  ;;  %s595_s17 = scalar_lea.sflag [#allocation9], %s576_s0 }
 0x136   : > { %s8449_s24 = scalar_lea.vmem [#allocation8], %s8438_s16 }
 0x137   : > { %s8446_s22 = scalar_lea.vmem [#allocation7], %s7165_s4 }
 0x138   : > { %7941 = dma.done.wait (%p9473_p12), %s595_s17, 12336  }
 0x139   : > { %7943 = vsyncadd (%p9473_p12), %s595_s17, 4294954960  ;;  %s7166_s29 = smul.u32 768, %s8426_s25  ;;  %s613_s30 = scalar_lea.sflag [#allocation12], %s576_s0 }
 0x13a   : > { %s8459_s20 = scalar_lea.vmem [#allocation11], %s8438_s16 }
 0x13b   : > { %s8456_s11 = scalar_lea.vmem [#allocation10], %s7166_s29 }
 0x13c   : > { %7945 = dma.done.wait (%p9473_p12), %s613_s30, 3120  }
 0x13d   : > { %7947 = vsyncadd (%p9473_p12), %s613_s30, 4294964176  ;;  %s8465_s23 = scalar_lea.vmem [#allocation13], %s7163_s2  ;;  %s631_s21 = scalar_lea.sflag [#allocation15], %s576_s0 }
 0x13e   : > { %s633_s3 = scalar_lea.vmem [#allocation14], %s8426_s25 }
 0x13f   : > { %7949 = dma.done.wait (%p9473_p12), %s631_s21, 1040  }
 0x140   : > { %7951 = vsyncadd (%p9473_p12), %s631_s21, 4294966256  ;;  %s5666_s27 = sshll.u32 %s8426_s25, 6  ;;  %s648_s19 = scalar_lea.sflag [#allocation18], %s8426_s25 }
 0x141   : > { %s8473_s14 = scalar_lea.vmem [#allocation16], %s5666_s27  ;;  %s650_s12 = scalar_lea.vmem [#allocation17], %s8426_s25 }
 0x142   : > { %7953 = dma.done.wait (%p9473_p12), %s648_s19, 16  }
 0x143   : > { %7955 = vsyncadd (%p9473_p12), %s648_s19, 4294967280  ;;  %v7986_v0 = vmov 0   ;;  %v7259_v1 = vld [vmem:[%s8430_s15 + $0xac] ss:$12 sps:$4 sm:$0xff]   ;;  %v7261_v2 = vld [vmem:[%s8430_s15 + $0xa8] ss:$12 sps:$4 sm:$0xff]  }
 0x144   : > { %969 = vmatprep.mubr.bf16.mxu0 %v7986_v0  ;;  %937 = vmatprep.subr.bf16.mxu0 %v7259_v1  ;;  %v7262_v3 = vld [vmem:[%s8430_s15 + $0x94] ss:$12 sps:$4 sm:$0xff]   ;;  %v7264_v4 = vld [vmem:[%s8430_s15 + $0x90] ss:$12 sps:$4 sm:$0xff]   ;;  %v7267_v6 = vld [vmem:[%s8430_s15 + $0x78] ss:$12 sps:$4 sm:$0xff]  }
 0x145   : > { %938 = vmatpush1.bf16.msra.mxu0 %v7261_v2  ;;  %v7265_v5 = vld [vmem:[%s8430_s15 + $0x7c] ss:$12 sps:$4 sm:$0xff]   ;;  %v7268_v7 = vld [vmem:[%s8430_s15 + $0x64] ss:$12 sps:$4 sm:$0xff]   ;;  %s9475_s0 = sld [smem:[#allocation40_spill]]  ;;  %p731_p8 = scmp.lt.s32.totalorder %s9474_s28, 5 }
 0x146   : > { %939 = vmatprep.subr.bf16.mxu0 %v7262_v3  ;;  %v7270_v9 = vld [vmem:[%s8430_s15 + $0x60] ss:$12 sps:$4 sm:$0xff]   ;;  %v7273_v13 = vld [vmem:[%s8430_s15 + $0x48] ss:$12 sps:$4 sm:$0xff]   ;;  %v7283_v15 = vld [vmem:[%s8430_s15 + $0xb0] ss:$12 sps:$4 sm:$0xff]  }
 0x147   : > { %v7271_v11 = vld [vmem:[%s8430_s15 + $0x4c] ss:$12 sps:$4 sm:$0xff]   ;;  %v7274_v14 = vld [vmem:[%s8430_s15 + $0x34] ss:$12 sps:$4 sm:$0xff]   ;;  %v7276_v17 = vld [vmem:[%s8430_s15 + $0x30] ss:$12 sps:$4 sm:$0xff]   ;;  %7017 = vmatprep.subr.bf16.mxu1 %v7283_v15 }
 0x148   : > { %v7284_v16 = vld [vmem:[%s8430_s15 + $0x98] ss:$12 sps:$4 sm:$0xff]   ;;  %v7277_v18 = vld [vmem:[%s8430_s15 + $0x1c] ss:$12 sps:$4 sm:$0xff]   ;;  %7018 = vmatpush3.bf16.msra.mxu1 %v7283_v15  ;;  %v7285_v19 = vld [vmem:[%s8430_s15 + $0x80] ss:$12 sps:$4 sm:$0xff]  }
 0x149   : > { %940 = vmatpush1.bf16.msra.mxu0 %v7264_v4  ;;  %7019 = vmatprep.subr.bf16.mxu1 %v7284_v16  ;;  %v7279_v20 = vld [vmem:[%s8430_s15 + $0x18] ss:$12 sps:$4 sm:$0xff]   ;;  %v7286_v22 = vld [vmem:[%s8430_s15 + $0x68] ss:$12 sps:$4 sm:$0xff]   ;;  %v7282_v23 = vld [vmem:[%s8430_s15] ss:$12 sps:$4 sm:$0xff]  }
 0x14a   : > { %941 = vmatprep.subr.bf16.mxu0 %v7265_v5  ;;  %v7280_v21 = vld [vmem:[%s8430_s15 + $0x4] ss:$12 sps:$4 sm:$0xff]   ;;  %v7299_v29 = vld [vmem:[%s8446_s22 + $0xf0] sm:$0xff]   ;;  %v7289_v31 = vld [vmem:[%s8430_s15 + $0x20] ss:$12 sps:$4 sm:$0xff]   ;;  %s9519_s28 = smov (!%p731_p8, %s9474_s28), 5 }
 0x14b   : > { %v736_v8 = vld [vmem:[%s9475_s0] sm:$0xff]  ;;  %v737_v10 = vld [vmem:[%s9475_s0 + $0x8] sm:$0xff]  ;;  %v7287_v24 = vld [vmem:[%s8430_s15 + $0x50] ss:$12 sps:$4 sm:$0xff]   ;;  %s5667_s16 = sshll.u32 %s9519_s28, 3 }
 0x14c   : > { %v784_v12 = vpack.c.bf16 %v737_v10, %v736_v8  ;;  %7020 = vmatpush3.bf16.msra.mxu1 %v7284_v16  ;;  %v7293_v25 = vld [vmem:[%s8446_s22 + $0xf8] sm:$0xff]   ;;  %v738_v28 = vld [vmem:[%s9475_s0 + $0x10] sm:$0xff]  ;;  %v741_v38 = vld [vmem:[%s9475_s0 + $0x28] sm:$0xff] }
 0x14d   : > { %942 = vmatpush1.bf16.msra.mxu0 %v7267_v6  ;;  %7021 = vmatprep.subr.bf16.mxu1 %v7285_v19  ;;  %v7288_v26 = vld [vmem:[%s8430_s15 + $0x38] ss:$12 sps:$4 sm:$0xff]   ;;  %v7305_v34 = vld [vmem:[%s8446_s22 + $0xe8] sm:$0xff]  }
 0x14e   : > { %943 = vmatprep.subr.bf16.mxu0 %v7268_v7  ;;  %7033 = vmatprep.mubr.bf16.mxu1 %v784_v12  ;;  %v7294_v27 = vld [vmem:[%s8446_s22 + $0xb8] sm:$0xff]   ;;  %v7300_v32 = vld [vmem:[%s8446_s22 + $0xb0] sm:$0xff]   ;;  %v7306_v36 = vld [vmem:[%s8446_s22 + $0xa8] sm:$0xff]  }
 0x14f   : > { %v739_v30 = vld [vmem:[%s9475_s0 + $0x18] sm:$0xff]  ;;  %v7290_v35 = vld [vmem:[%s8430_s15 + $0x8] ss:$12 sps:$4 sm:$0xff]   ;;  %v740_v37 = vld [vmem:[%s9475_s0 + $0x20] sm:$0xff] }
 0x150   : > { %7022 = vmatpush3.bf16.msra.mxu1 %v7285_v19  ;;  %v785_v33 = vpack.c.bf16 %v739_v30, %v738_v28  ;;  %v7309_v39 = vld [vmem:[%s8446_s22 + $0xe0] sm:$0xff]   ;;  %v7291_v40 = vld [vmem:[%s8446_s22 + $0x78] sm:$0xff]   ;;  %v786_v42 = vpack.c.bf16 %v741_v38, %v740_v37  ;;  %v7295_v45 = vld [vmem:[%s8446_s22 + $0x70] sm:$0xff]  }
 0x151   : > { %944 = vmatpush1.bf16.msra.mxu0 %v7270_v9  ;;  %7023 = vmatprep.subr.bf16.mxu1 %v7286_v22  ;;  %v7310_v41 = vld [vmem:[%s8446_s22 + $0xa0] sm:$0xff]   ;;  %v7313_v43 = vld [vmem:[%s8446_s22 + $0xd8] sm:$0xff]   ;;  %v742_v46 = vld [vmem:[%s9475_s0 + $0x30] sm:$0xff] }
 0x152   : > { %945 = vmatprep.subr.bf16.mxu0 %v7271_v11  ;;  %v7292_v44 = vld [vmem:[%s8446_s22 + $0x38] sm:$0xff]   ;;  %v7296_v48 = vld [vmem:[%s8446_s22 + $0x30] sm:$0xff]   ;;  %v7297_v50 = vld [vmem:[%s8446_s22 + $0x68] sm:$0xff]  }
 0x153   : > { %v743_v47 = vld [vmem:[%s9475_s0 + $0x38] sm:$0xff]  ;;  %v744_v51 = vld [vmem:[%s9475_s0 + $0x40] sm:$0xff]  ;;  %v745_v52 = vld [vmem:[%s9475_s0 + $0x48] sm:$0xff] }
 0x154   : > { %7024 = vmatpush3.bf16.msra.mxu1 %v7286_v22  ;;  %v7314_v49 = vld [vmem:[%s8446_s22 + $0x98] sm:$0xff]   ;;  %v7298_v53 = vld [vmem:[%s8446_s22 + $0x28] sm:$0xff]   ;;  %v787_v54 = vpack.c.bf16 %v743_v47, %v742_v46  ;;  %v7301_v55 = vld [vmem:[%s8446_s22 + $0x60] sm:$0xff]   ;;  %v788_v57 = vpack.c.bf16 %v745_v52, %v744_v51 }
 0x155   : > { %946 = vmatpush1.bf16.msra.mxu0 %v7273_v13  ;;  %7025 = vmatprep.subr.bf16.mxu1 %v7287_v24  ;;  %v7302_v56 = vld [vmem:[%s8446_s22 + $0x20] sm:$0xff]   ;;  %v7303_v58 = vld [vmem:[%s8446_s22 + $0x58] sm:$0xff]   ;;  %v746_v59 = vld [vmem:[%s9475_s0 + $0x50] sm:$0xff] }
 0x156   : > { %947 = vmatprep.subr.bf16.mxu0 %v7274_v14  ;;  %v747_v60 = vld [vmem:[%s9475_s0 + $0x58] sm:$0xff]  ;;  %v748_v61 = vld [vmem:[%s9475_s0 + $0x60] sm:$0xff]  ;;  %v749_v62 = vld [vmem:[%s9475_s0 + $0x68] sm:$0xff]  ;;  %v9428_v14 = vmov 0.0|0.0  }
 0x157   : > { %v7304_v63 = vld [vmem:[%s8446_s22 + $0x18] sm:$0xff]   ;;  %v7307_v1 = vld [vmem:[%s8446_s22 + $0x50] sm:$0xff]   ;;  %v789_v2 = vpack.c.bf16 %v747_v60, %v746_v59  ;;  %v790_v4 = vpack.c.bf16 %v749_v62, %v748_v61  ;;  %v7311_v5 = vld [vmem:[%s8446_s22 + $0x48] sm:$0xff]  }
 0x158   : > { %7026 = vmatpush3.bf16.msra.mxu1 %v7287_v24  ;;  %v7308_v3 = vld [vmem:[%s8446_s22 + $0x10] sm:$0xff]   ;;  %v7312_v8 = vld [vmem:[%s8446_s22 + $0x8] sm:$0xff]   ;;  %v7315_v9 = vld [vmem:[%s8446_s22 + $0x40] sm:$0xff]  }
 0x159   : > { %948 = vmatpush1.bf16.msra.mxu0 %v7276_v17  ;;  %7027 = vmatprep.subr.bf16.mxu1 %v7288_v26  ;;  %v750_v6 = vld [vmem:[%s9475_s0 + $0x70] sm:$0xff]  ;;  %v751_v7 = vld [vmem:[%s9475_s0 + $0x78] sm:$0xff]  ;;  %v7316_v11 = vld [vmem:[%s8446_s22] sm:$0xff]  }
 0x15a   : > { %949 = vmatprep.subr.bf16.mxu0 %v7277_v18  ;;  %v791_v10 = vpack.c.bf16 %v751_v7, %v750_v6  ;;  %v7318_v13 = vld [vmem:[%s8446_s22 + $0x90] sm:$0xff]   ;;  %v7319_v15 = vld [vmem:[%s8446_s22 + $0xc8] sm:$0xff]   ;;  %v7321_v16 = vld [vmem:[%s8446_s22 + $0x178] sm:$0xff]  }
 0x15b   : > { %v7322_v17 = vld [vmem:[%s8446_s22 + $0xc0] sm:$0xff]   ;;  %v7323_v18 = vld [vmem:[%s8446_s22 + $0x138] sm:$0xff]   ;;  %v7327_v22 = vld [vmem:[%s8446_s22 + $0x168] sm:$0xff]  }
 0x15c   : > { %7028 = vmatpush3.bf16.msra.mxu1 %v7288_v26  ;;  %v7324_v19 = vld [vmem:[%s8446_s22 + $0x80] sm:$0xff]   ;;  %v7331_v26 = vld [vmem:[%s8446_s22 + $0x1f8] sm:$0xff]   ;;  %v7338_v30 = vld [vmem:[%s8446_s22 + $0x110] sm:$0xff]  }
 0x15d   : > { %950 = vmatpush1.bf16.msra.mxu0 %v7279_v20  ;;  %7029 = vmatprep.subr.bf16.mxu1 %v7289_v31  ;;  %v7325_v20 = vld [vmem:[%s8446_s22 + $0x170] sm:$0xff]   ;;  %v7329_v24 = vld [vmem:[%s8446_s22 + $0x160] sm:$0xff]   ;;  %v7334_v28 = vld [vmem:[%s8446_s22 + $0x118] sm:$0xff]  }
 0x15e   : > { %951 = vmatprep.subr.bf16.mxu0 %v7280_v21  ;;  %v7326_v21 = vld [vmem:[%s8446_s22 + $0x130] sm:$0xff]   ;;  %v7332_v52 = vld [vmem:[%s8446_s22 + $0x1b8] sm:$0xff]   ;;  %v7339_v6 = vld [vmem:[%s8446_s22 + $0x1e8] sm:$0xff]  }
 0x15f   : > { %v7335_v59 = vld [vmem:[%s8446_s22 + $0x1f0] sm:$0xff]  }
 0x160   : > { %7030 = vmatpush3.bf16.msra.mxu1 %v7289_v31  ;;  %v7341_v31 = vld [vmem:[%s8446_s22 + $0x148] sm:$0xff]  }
 0x161   : > { %952 = vmatpush1.bf16.msra.mxu0 %v7282_v23  ;;  %7031 = vmatprep.subr.bf16.mxu1 %v7290_v35  ;;  %v7328_v23 = vld [vmem:[%s8446_s22 + $0x128] sm:$0xff]  }
 0x162   : > { %6507 = vmatprep.subr.bf16.mxu0 %v7293_v25  ;;  %v7330_v25 = vld [vmem:[%s8446_s22 + $0x120] sm:$0xff]  }
 0x164   : > { %970 = vmatmul.mubr.bf16.vlgmr.msra.gmra.mxu0 %v784_v12  ;;  %7032 = vmatpush3.bf16.msra.mxu1 %v7290_v35  ;;  %v7317_v12 = vld [vmem:[%s8446_s22 + $0xd0] sm:$0xff]   ;;  %v7349_v35 = vld [vmem:[%s8446_s22 + $0x238] sm:$0xff]  }
 0x165   : > { %979 = vmatprep.mubr.bf16.mxu0 %v7986_v0  ;;  %6508 = vmatpush3.bf16.msra.mxu0 %v7294_v27  ;;  %v7333_v27 = vld [vmem:[%s8446_s22 + $0x158] sm:$0xff]  }
 0x166   : > { %6509 = vmatprep.subr.bf16.mxu0 %v7299_v29  ;;  %6479 = vmatprep.subr.bf16.mxu1 %v7291_v40  ;;  %v7337_v29 = vld [vmem:[%s8446_s22 + $0x150] sm:$0xff]   ;;  %v792_v40 = vld [vmem:[%s580_s13] sm:$0x7] }
 0x167   : > { %7034 = vmatmul.mubr.bf16.vlgmr.msra.gmra.mxu1 %v785_v33 }
 0x168   : > { %6480 = vmatpush3.bf16.msra.mxu1 %v7292_v44  ;;  %7037 = vmatprep.mubr.bf16.mxu1 %v786_v42 }
 0x169   : > { %6510 = vmatpush3.bf16.msra.mxu0 %v7300_v32  ;;  %6481 = vmatprep.subr.bf16.mxu1 %v7295_v45  ;;  %v7342_v32 = vld [vmem:[%s8446_s22 + $0x108] sm:$0xff]  }
 0x16a   : > { %6511 = vmatprep.subr.bf16.mxu0 %v7305_v34  ;;  %v7346_v34 = vld [vmem:[%s8446_s22 + $0x100] sm:$0xff]  }
 0x16c   : > { %980 = vmatmul.mubr.bf16.gmra.mxu0 %v785_v33  ;;  %6482 = vmatpush3.bf16.msra.mxu1 %v7296_v48  ;;  %v7345_v33 = vld [vmem:[%s8446_s22 + $0x140] sm:$0xff]  }
 0x16d   : > { %989 = vmatprep.mubr.bf16.mxu0 %v7986_v0  ;;  %6512 = vmatpush3.bf16.msra.mxu0 %v7306_v36  ;;  %v794_v36 = vlaneseq }
 0x16e   : > { %6513 = vmatprep.subr.bf16.mxu0 %v7309_v39  ;;  %6483 = vmatprep.subr.bf16.mxu1 %v7297_v50 }
 0x16f   : > { %7038 = vmatmul.mubr.bf16.gmra.mxu1 %v787_v54  ;;  %v795_v37 = vshrl.u32 %v794_v36, 7 }
 0x170   : > { %6484 = vmatpush3.bf16.msra.mxu1 %v7298_v53  ;;  %7041 = vmatprep.mubr.bf16.mxu1 %v788_v57 }
 0x171   : > { %6514 = vmatpush3.bf16.msra.mxu0 %v7310_v41  ;;  %6485 = vmatprep.subr.bf16.mxu1 %v7301_v55  ;;  %v796_v38 = vsub.s32 0, %v795_v37  ;;  %v800_v39 = vsub.s32 1, %v795_v37  ;;  %v804_v53 = vsub.s32 2, %v795_v37  ;;  %v9430_v55 = vmov 0.0  }
 0x172   : > { %6515 = vmatprep.subr.bf16.mxu0 %v7313_v43 }
 0x173   : > { %v8615_v41 = vrot.slane %v792_v40, %v800_v39  ;;  %v8617_v44 = vrot.slane %v792_v40, %v796_v38 }
 0x174   : > { %990 = vmatmul.mubr.bf16.gmra.mxu0 %v786_v42  ;;  %6486 = vmatpush3.bf16.msra.mxu1 %v7302_v56 }
 0x175   : > { %999 = vmatprep.mubr.bf16.mxu0 %v7986_v0  ;;  %6516 = vmatpush3.bf16.msra.mxu0 %v7314_v49 }
 0x176   : > { %6487 = vmatprep.subr.bf16.mxu1 %v7303_v58  ;;  %6517 = vmatprep.subr.bf16.mxu0 %v7317_v12 }
 0x177   : > { %7042 = vmatmul.mubr.bf16.gmra.mxu1 %v789_v2 }
 0x178   : > { %6488 = vmatpush3.bf16.msra.mxu1 %v7304_v63  ;;  %7045 = vmatprep.mubr.bf16.mxu1 %v790_v4  ;;  %v7336_v63 = vld [vmem:[%s8446_s22 + $0x1b0] sm:$0xff]  }
 0x179   : > { %6489 = vmatprep.subr.bf16.mxu1 %v7307_v1  ;;  %6518 = vmatpush3.bf16.msra.mxu0 %v7318_v13  ;;  %v7340_v13 = vld [vmem:[%s8446_s22 + $0x1a8] sm:$0xff]  }
 0x17a   : > { %6519 = vmatprep.subr.bf16.mxu0 %v7319_v15 }
 0x17c   : > { %1000 = vmatmul.mubr.bf16.gmra.mxu0 %v787_v54  ;;  %6490 = vmatpush3.bf16.msra.mxu1 %v7308_v3 }
 0x17d   : > { %1009 = vmatprep.mubr.bf16.mxu0 %v7986_v0  ;;  %6491 = vmatprep.subr.bf16.mxu1 %v7311_v5 }
 0x17f   : > { %7046 = vmatmul.mubr.bf16.gmra.mxu1 %v791_v10 }
 0x180   : > { %6492 = vmatpush3.bf16.msra.mxu1 %v7312_v8  ;;  %1983 = vmatprep.mubr.bf16.mxu1 %v9428_v14 }
 0x181   : > { %6493 = vmatprep.subr.bf16.mxu1 %v7315_v9 }
 0x184   : > { %1010 = vmatmul.mubr.bf16.gmra.mxu0 %v788_v57  ;;  %6494 = vmatpush3.bf16.msra.mxu1 %v7316_v11 }
 0x185   : > { %1019 = vmatprep.mubr.bf16.mxu0 %v7986_v0  ;;  %6535 = vmatprep.subr.bf16.mxu1 %v7321_v16 }
 0x187   : > { %1984 = vmatmul.mubr.bf16.vlgmr.msra.gmra.mxu1 %v9428_v14 }
 0x188   : > { %6536 = vmatpush3.bf16.msra.mxu1 %v7323_v18 }
 0x189   : > { %6537 = vmatprep.subr.bf16.mxu1 %v7325_v20 }
 0x18c   : > { %1020 = vmatmul.mubr.bf16.gmra.mxu0 %v789_v2  ;;  %6538 = vmatpush3.bf16.msra.mxu1 %v7326_v21  ;;  %v8631_v2 = vrot.slane %v792_v40, %v804_v53 }
 0x18d   : > { %1029 = vmatprep.mubr.bf16.mxu0 %v7986_v0  ;;  %6539 = vmatprep.subr.bf16.mxu1 %v7327_v22 }
 0x190   : > { %6540 = vmatpush3.bf16.msra.mxu1 %v7328_v23  ;;  %v7344_v23 = vld [vmem:[%s8446_s22 + $0x1a0] sm:$0xff]  }
 0x191   : > { %6541 = vmatprep.subr.bf16.mxu1 %v7329_v24 }
 0x194   : > { %1030 = vmatmul.mubr.bf16.gmra.mxu0 %v790_v4  ;;  %6542 = vmatpush3.bf16.msra.mxu1 %v7330_v25 }
 0x195   : > { %1039 = vmatprep.mubr.bf16.mxu0 %v7986_v0  ;;  %v7320_v0 = vld [vmem:[%s8446_s22 + $0x88] sm:$0xff]   ;;  %6543 = vmatprep.subr.bf16.mxu1 %v7333_v27 }
 0x196   : > { %6520 = vmatpush3.bf16.msra.mxu0 %v7320_v0 }
 0x197   : > { %6521 = vmatprep.subr.bf16.mxu0 %v7322_v17 }
 0x198   : > { %6544 = vmatpush3.bf16.msra.mxu1 %v7334_v28 }
 0x199   : > { %6545 = vmatprep.subr.bf16.mxu1 %v7337_v29  ;;  %v7347_v29 = vld [vmem:[%s8446_s22 + $0x1d8] sm:$0xff]  }
 0x19a   : > { %6522 = vmatpush3.bf16.msra.mxu0 %v7324_v19  ;;  %v7343_v19 = vld [vmem:[%s8446_s22 + $0x1e0] sm:$0xff]  }
 0x19b   : > { %6563 = vmatprep.subr.bf16.mxu0 %v7331_v26 }
 0x19c   : > { %1040 = vmatmul.mubr.bf16.gmra.mxu0 %v791_v10  ;;  %6546 = vmatpush3.bf16.msra.mxu1 %v7338_v30 }
 0x19d   : > { %6547 = vmatprep.subr.bf16.mxu1 %v7341_v31 }
 0x1a0   : > { %6548 = vmatpush3.bf16.msra.mxu1 %v7342_v32 }
 0x1a1   : > { %6549 = vmatprep.subr.bf16.mxu1 %v7345_v33 }
 0x1a4   : > { %6550 = vmatpush3.bf16.msra.mxu1 %v7346_v34 }
 0x1a5   : > { %7049 = vmatprep.subr.bf16.mxu1 %v7349_v35 }
 0x224   : > { %v971_v42 = vpop.f32.mrf.mxu0 }
 0x225   : > { %v972_v61 = vadd.f32 %v971_v42, %v8617_v44 }
 0x226   : > { %v973_v43 = vpop.f32.mrf.mxu0 }
 0x227   : > { %v974_v45 = vadd.f32 %v973_v43, %v8615_v41  ;;  %v7035_v9 = vpop.f32.mrf.mxu1  ;;  %vm1147_vm3 = vcmp.gt.f32.partialorder %v972_v61, 0.0  ;;  %v1195_v10 = vmul.f32 0.01, %v972_v61 }
 0x228   : > { %v975_v46 = vpop.f32.mrf.mxu0  ;;  %v1093_v0 = vadd.f32 %v7035_v9, %v8631_v2 }
 0x229   : > { %v976_v47 = vadd.f32 %v975_v46, %v8617_v44  ;;  %vm1148_vm1 = vcmp.gt.f32.partialorder %v974_v45, 0.0  ;;  %v1196_v57 = vmul.f32 0.01, %v974_v45  ;;  %v1084_v16 = vpop.f32.mrf.mxu1  ;;  %v8651_v26 = vsel %vm1147_vm3, %v972_v61, %v1195_v10 }
 0x22a   : > { %v977_v48 = vpop.f32.mrf.mxu0  ;;  %v1085_v20 = vadd.f32 %v1084_v16, %v8631_v2  ;;  %vm1155_vm5 = vcmp.gt.f32.partialorder %v1093_v0, 0.0  ;;  %v1203_v24 = vmul.f32 0.01, %v1093_v0 }
 0x22b   : > { %vm1150_vm0 = vcmp.gt.f32.partialorder %v976_v47, 0.0  ;;  %v1198_v49 = vmul.f32 0.01, %v976_v47  ;;  %v8633_v3 = vsel %vm1148_vm1, %v974_v45, %v1196_v57  ;;  %v978_v4 = vadd.f32 %v977_v48, %v8615_v41  ;;  %v7036_v25 = vpop.f32.mrf.mxu1 }
 0x22c   : > { %v981_v50 = vpop.f32.mrf.mxu0  ;;  %vm1149_vm8 = vcmp.gt.f32.partialorder %v1085_v20, 0.0  ;;  %v1197_v32 = vmul.f32 0.01, %v1085_v20  ;;  %v8659_v36 = vsel %vm1155_vm5, %v1093_v0, %v1203_v24 }
 0x22d   : > { %v8621_v51 = vsel %vm1150_vm0, %v976_v47, %v1198_v49  ;;  %v982_v11 = vadd.f32 %v981_v50, %v8617_v44  ;;  %v1199_v17 = vmul.f32 0.01, %v978_v4  ;;  %vm1151_vm4 = vcmp.gt.f32.partialorder %v978_v4, 0.0  ;;  %v1087_v33 = vpop.f32.mrf.mxu1  ;;  %9476 = vst [vmem:[#allocation29_spill] sm:$0xff] %v8659_v36  ;;  %v7348_v49 = vld [vmem:[%s8446_s22 + $0x198] sm:$0xff]  }
 0x22e   : > { %v983_v54 = vpop.f32.mrf.mxu0  ;;  %v1500_v56 = vpack.c.bf16 %v8621_v51, %v9430_v55  ;;  %v8664_v40 = vsel %vm1149_vm8, %v1085_v20, %v1197_v32 }
 0x22f   : > { %v984_v58 = vadd.f32 %v983_v54, %v8615_v41  ;;  %vm1153_vm6 = vcmp.gt.f32.partialorder %v982_v11, 0.0  ;;  %v1201_v34 = vmul.f32 0.01, %v982_v11  ;;  %v8662_v37 = vsel %vm1151_vm4, %v978_v4, %v1199_v17  ;;  %9477 = vst [vmem:[#allocation30_spill] sm:$0xff] %v8664_v40  ;;  %v7039_v42 = vpop.f32.mrf.mxu1 }
 0x230   : > { %v985_v60 = vpop.f32.mrf.mxu0  ;;  %2032 = vmatprep.mubr.bf16.mxu0 %v1500_v56 }
 0x231   : > { %vm1154_vm2 = vcmp.gt.f32.partialorder %v984_v58, 0.0  ;;  %v1202_v62 = vmul.f32 0.01, %v984_v58  ;;  %2033 = vmatmul.mubr.bf16.vlgmr.msra.gmra.mxu0 %v9428_v14  ;;  %v986_v18 = vadd.f32 %v985_v60, %v8617_v44  ;;  %v1100_v53 = vpop.f32.mrf.mxu1 }
 0x232   : > { %v987_v1 = vpop.f32.mrf.mxu0  ;;  %6564 = vmatpush3.bf16.msra.mxu0 %v7332_v52  ;;  %v8678_v52 = vadd.f32 %v7036_v25, %v8631_v2 }
 0x233   : > { %v8636_v5 = vsel %vm1154_vm2, %v984_v58, %v1202_v62  ;;  %6565 = vmatprep.subr.bf16.mxu0 %v7335_v59  ;;  %v988_v12 = vadd.f32 %v987_v1, %v8615_v41  ;;  %v1204_v35 = vmul.f32 0.01, %v986_v18  ;;  %vm1156_vm9 = vcmp.gt.f32.partialorder %v986_v18, 0.0  ;;  %v7350_v58 = vld [vmem:[%s8446_s22 + $0x1d0] sm:$0xff]  }
 0x234   : > { %v991_v8 = vpop.f32.mrf.mxu0  ;;  %v8686_v59 = vsel %vm1153_vm6, %v982_v11, %v1201_v34 }
 0x235   : > { %v992_v21 = vadd.f32 %v991_v8, %v8617_v44  ;;  %v1205_v27 = vmul.f32 0.01, %v988_v12  ;;  %vm1157_vm7 = vcmp.gt.f32.partialorder %v988_v12, 0.0  ;;  %v1252_v62 = vsel %vm1156_vm9, %v986_v18, %v1204_v35 }
 0x236   : > { %v993_v15 = vpop.f32.mrf.mxu0  ;;  %6566 = vmatpush3.bf16.msra.mxu0 %v7336_v63  ;;  %v7040_v63 = vpop.f32.mrf.mxu1  ;;  %v1501_v20 = vpack.c.bf16 %v8686_v59, %v8651_v26  ;;  %v7352_v59 = vld [vmem:[%s8446_s22 + $0x230] sm:$0xff]  }
 0x237   : > { %6567 = vmatprep.subr.bf16.mxu0 %v7339_v6  ;;  %v8656_v30 = vadd.f32 %v993_v15, %v8615_v41  ;;  %vm1159_vm10 = vcmp.gt.f32.partialorder %v992_v21, 0.0  ;;  %v1207_v43 = vmul.f32 0.01, %v992_v21  ;;  %v8668_v46 = vsel %vm1157_vm7, %v988_v12, %v1205_v27  ;;  %v7351_v12 = vld [vmem:[%s8446_s22 + $0x190] sm:$0xff]  }
 0x238   : > { %v995_v22 = vpop.f32.mrf.mxu0  ;;  %v8703_v15 = vadd.f32 %v1087_v33, %v8631_v2  ;;  %v1103_v0 = vpop.f32.mrf.mxu1  ;;  %v8730_v32 = vadd.f32 %v7040_v63, %v8631_v2  ;;  %vm1158_vm7 = vcmp.gt.f32.partialorder %v8678_v52, 0.0 }
 0x239   : > { %v996_v28 = vadd.f32 %v995_v22, %v8617_v44  ;;  %vm1160_vm12 = vcmp.gt.f32.partialorder %v8656_v30, 0.0  ;;  %v8672_v47 = vmul.f32 0.01, %v8656_v30  ;;  %v1255_v8 = vsel %vm1159_vm10, %v992_v21, %v1207_v43 }
 0x23a   : > { %v997_v31 = vpop.f32.mrf.mxu0  ;;  %6568 = vmatpush3.bf16.msra.mxu0 %v7340_v13  ;;  %v8700_v13 = vmul.f32 0.01, %v8678_v52  ;;  %v1502_v22 = vpack.c.bf16 %v1252_v62, %v8621_v51  ;;  %v7043_v24 = vpop.f32.mrf.mxu1  ;;  %v8733_v33 = vadd.f32 %v1103_v0, %v8631_v2  ;;  %vm1152_vm5 = vcmp.gt.f32.partialorder %v8703_v15, 0.0 }
 0x23b   : > { %6569 = vmatprep.subr.bf16.mxu0 %v7343_v19  ;;  %v1210_v38 = vmul.f32 0.01, %v996_v28  ;;  %vm1162_vm11 = vcmp.gt.f32.partialorder %v996_v28, 0.0  ;;  %v8681_v54 = vadd.f32 %v997_v31, %v8615_v41  ;;  %v7353_v19 = vld [vmem:[%s8446_s22 + $0x1c8] sm:$0xff]  }
 0x23c   : > { %v1001_v39 = vpop.f32.mrf.mxu0  ;;  %v7354_v31 = vld [vmem:[%s8446_s22 + $0x188] sm:$0xff]   ;;  %v1116_v34 = vpop.f32.mrf.mxu1 }
 0x23d   : > { %v1002_v45 = vadd.f32 %v1001_v39, %v8617_v44  ;;  %v8689_v61 = vsel %vm1162_vm11, %v996_v28, %v1210_v38  ;;  %vm1163_vm15 = vcmp.gt.f32.partialorder %v8681_v54, 0.0  ;;  %v1211_v16 = vmul.f32 0.01, %v8681_v54  ;;  %v7356_v38 = vld [vmem:[%s8446_s22 + $0x1c0] sm:$0xff]  }
 0x23e   : > { %v1003_v48 = vpop.f32.mrf.mxu0  ;;  %6570 = vmatpush3.bf16.msra.mxu0 %v7344_v23  ;;  %v8710_v18 = vpack.c.bf16 %v8689_v61, %v9430_v55  ;;  %v8718_v23 = vadd.f32 %v7039_v42, %v8631_v2  ;;  %v8722_v28 = vadd.f32 %v1100_v53, %v8631_v2  ;;  %v8740_v39 = vmul.f32 0.01, %v8703_v15  ;;  %v7044_v53 = vpop.f32.mrf.mxu1 }
 0x23f   : > { %vm1165_vm13 = vcmp.gt.f32.partialorder %v1002_v45, 0.0  ;;  %v1213_v56 = vmul.f32 0.01, %v1002_v45  ;;  %v1004_v57 = vadd.f32 %v1003_v48, %v8615_v41  ;;  %6571 = vmatprep.subr.bf16.mxu0 %v7347_v29  ;;  %v1256_v42 = vsel %vm1160_vm12, %v8656_v30, %v8672_v47 }
 0x240   : > { %v1005_v60 = vpop.f32.mrf.mxu0  ;;  %v8748_v48 = vadd.f32 %v7043_v24, %v8631_v2  ;;  %v8763_v30 = vmul.f32 0.01, %v8718_v23  ;;  %v8766_v47 = vmul.f32 0.01, %v8722_v28  ;;  %v7635_v24 = vld [vmem:[%s8446_s22 + $0x238] sm:$0xff]   ;;  %vm1167_vm12 = vcmp.gt.f32.partialorder %v8718_v23, 0.0 }
 0x241   : > { %v1214_v4 = vmul.f32 0.01, %v1004_v57  ;;  %v1006_v6 = vadd.f32 %v1005_v60, %v8617_v44  ;;  %v1261_v9 = vsel %vm1165_vm13, %v1002_v45, %v1213_v56  ;;  %vm1166_vm14 = vcmp.gt.f32.partialorder %v1004_v57, 0.0  ;;  %v7357_v45 = vld [vmem:[%s8446_s22 + $0x180] sm:$0xff]  }
 0x242   : > { %v1007_v10 = vpop.f32.mrf.mxu0  ;;  %v8696_v11 = vpack.c.bf16 %v1261_v9, %v1255_v8  ;;  %6572 = vmatpush3.bf16.msra.mxu0 %v7348_v49  ;;  %v8751_v49 = vadd.f32 %v1116_v34, %v8631_v2  ;;  %v8775_v8 = vmul.f32 0.01, %v8733_v33  ;;  %v1119_v9 = vpop.f32.mrf.mxu1  ;;  %vm1161_vm13 = vcmp.gt.f32.partialorder %v8722_v28, 0.0 }
 0x243   : > { %v1008_v17 = vadd.f32 %v1007_v10, %v8615_v41  ;;  %6573 = vmatprep.subr.bf16.mxu0 %v7350_v58  ;;  %v1216_v25 = vmul.f32 0.01, %v1006_v6  ;;  %v1262_v26 = vsel %vm1166_vm14, %v1004_v57, %v1214_v4  ;;  %vm1168_vm1 = vcmp.gt.f32.partialorder %v1006_v6, 0.0 }
 0x244   : > { %v1011_v21 = vpop.f32.mrf.mxu0  ;;  %1991 = vmatprep.mubr.bf16.mxu1 %v8696_v11  ;;  %v8753_v56 = vpack.c.bf16 %v1262_v26, %v1256_v42  ;;  %v8758_v57 = vsel %vm1163_vm15, %v8681_v54, %v1211_v16  ;;  %v8772_v54 = vmul.f32 0.01, %v8730_v32  ;;  %v7047_v16 = vpop.f32.mrf.mxu1  ;;  %v8806_v42 = vmul.f32 0.01, %v8751_v49 }
 0x245   : > { %v1217_v27 = vmul.f32 0.01, %v1008_v17  ;;  %1992 = vmatmul.mubr.bf16.gmra.mxu1 %v8710_v18  ;;  %vm1169_vm0 = vcmp.gt.f32.partialorder %v1008_v17, 0.0  ;;  %v8726_v29 = vadd.f32 %v1011_v21, %v8617_v44  ;;  %v1264_v4 = vsel %vm1168_vm1, %v1006_v6, %v1216_v25 }
 0x246   : > { %v1013_v51 = vpop.f32.mrf.mxu0  ;;  %2081 = vmatprep.mubr.bf16.mxu1 %v1502_v22  ;;  %6574 = vmatpush3.bf16.msra.mxu0 %v7351_v12  ;;  %v8779_v12 = vadd.f32 %v7044_v53, %v8631_v2  ;;  %v8796_v26 = vpack.c.bf16 %v1264_v4, %v8689_v61  ;;  %vm1164_vm14 = vcmp.gt.f32.partialorder %v8733_v33, 0.0  ;;  %vm1170_vm15 = vcmp.gt.f32.partialorder %v8730_v32, 0.0 }
 0x247   : > { %v8736_v35 = vadd.f32 %v1013_v51, %v8615_v41  ;;  %6575 = vmatprep.subr.bf16.mxu0 %v7353_v19  ;;  %v1265_v60 = vsel %vm1169_vm0, %v1008_v17, %v1217_v27  ;;  %v1219_v62 = vmul.f32 0.01, %v8726_v29  ;;  %vm1171_vm2 = vcmp.gt.f32.partialorder %v8726_v29, 0.0 }
 0x248   : > { %v1015_v43 = vpop.f32.mrf.mxu0  ;;  %v8782_v6 = vpack.c.bf16 %v1265_v60, %v8758_v57  ;;  %v8800_v51 = vmul.f32 0.01, %v8748_v48 }
 0x249   : > { %v1016_v58 = vadd.f32 %v1015_v43, %v8617_v44  ;;  %vm1172_vm4 = vcmp.gt.f32.partialorder %v8736_v35, 0.0  ;;  %v1220_v22 = vmul.f32 0.01, %v8736_v35  ;;  %v8809_v43 = vadd.f32 %v7047_v16, %v8631_v2 }
 0x24a   : > { %v1017_v63 = vpop.f32.mrf.mxu0  ;;  %6576 = vmatpush3.bf16.msra.mxu0 %v7354_v31  ;;  %v8826_v16 = vadd.f32 %v1119_v9, %v8631_v2 }
 0x24b   : > { %vm1174_vm3 = vcmp.gt.f32.partialorder %v1016_v58, 0.0  ;;  %v1222_v10 = vmul.f32 0.01, %v1016_v58  ;;  %6577 = vmatprep.subr.bf16.mxu0 %v7356_v38  ;;  %v8786_v17 = vadd.f32 %v1017_v63, %v8615_v41  ;;  %v7355_v38 = vld [vmem:[%s8446_s22 + $0x228] sm:$0xff]  }
 0x24c   : > { %v1021_v0 = vpop.f32.mrf.mxu0 }
 0x24d   : > { %v1022_v19 = vadd.f32 %v1021_v0, %v8617_v44  ;;  %2082 = vmatmul.mubr.bf16.vlgmr.msra.gmra.mxu1 %v1501_v20  ;;  %v8789_v21 = vsel %vm1174_vm3, %v1016_v58, %v1222_v10  ;;  %v1132_v20 = vpop.f32.mrf.mxu1  ;;  %vm1175_vm8 = vcmp.gt.f32.partialorder %v8786_v17, 0.0  ;;  %v1223_v63 = vmul.f32 0.01, %v8786_v17 }
 0x24e   : > { %7050 = vmatpush3.bf16.msra.mxu1 %v7635_v24  ;;  %v1023_v25 = vpop.f32.mrf.mxu0  ;;  %v1506_v27 = vpack.c.bf16 %v8789_v21, %v9430_v55  ;;  %6578 = vmatpush3.bf16.msra.mxu0 %v7357_v45  ;;  %v8812_v45 = vadd.f32 %v1132_v20, %v8631_v2  ;;  %v1267_v10 = vsel %vm1171_vm2, %v8726_v29, %v1219_v62  ;;  %v8823_v0 = vmul.f32 0.01, %v8779_v12 }
 0x24f   : > { %vm1177_vm6 = vcmp.gt.f32.partialorder %v1022_v19, 0.0  ;;  %v1225_v31 = vmul.f32 0.01, %v1022_v19  ;;  %v1024_v34 = vadd.f32 %v1023_v25, %v8615_v41  ;;  %7051 = vmatprep.subr.bf16.mxu1 %v7352_v59  ;;  %v7048_v53 = vpop.f32.mrf.mxu1  ;;  %v8840_v62 = vsel %vm1172_vm4, %v8736_v35, %v1220_v22 }
 0x250   : > { %v1025_v61 = vpop.f32.mrf.mxu0  ;;  %2040 = vmatprep.mubr.bf16.mxu0 %v1506_v27  ;;  %vm1173_vm4 = vcmp.gt.f32.partialorder %v8751_v49, 0.0 }
 0x251   : > { %vm1178_vm9 = vcmp.gt.f32.partialorder %v1024_v34, 0.0  ;;  %v1226_v58 = vmul.f32 0.01, %v1024_v34  ;;  %v1026_v60 = vadd.f32 %v1025_v61, %v8617_v44  ;;  %2041 = vmatmul.mubr.bf16.gmra.mxu0 %v8796_v26  ;;  %v1135_v24 = vpop.f32.mrf.mxu1  ;;  %v8832_v61 = vadd.f32 %v7048_v53, %v8631_v2 }
 0x252   : > { %7052 = vmatpush3.bf16.msra.mxu1 %v7352_v59  ;;  %v1027_v4 = vpop.f32.mrf.mxu0  ;;  %2130 = vmatprep.mubr.bf16.mxu0 %v8696_v11  ;;  %v7358_v59 = vld [vmem:[%s8446_s22 + $0x220] sm:$0xff]   ;;  %v1273_v11 = vsel %vm1177_vm6, %v1022_v19, %v1225_v31  ;;  %v8835_v29 = vadd.f32 %v1135_v24, %v8631_v2  ;;  %v7359_v31 = vld [vmem:[%s8446_s22 + $0x218] sm:$0xff]   ;;  %v8855_v53 = vmul.f32 0.01, %v8809_v43  ;;  %v8860_v24 = vmul.f32 0.01, %v8812_v45 }
 0x253   : > { %vm1180_vm10 = vcmp.gt.f32.partialorder %v1026_v60, 0.0  ;;  %v1228_v25 = vmul.f32 0.01, %v1026_v60  ;;  %v1028_v27 = vadd.f32 %v1027_v4, %v8615_v41  ;;  %7053 = vmatprep.subr.bf16.mxu1 %v7355_v38  ;;  %v8843_v9 = vsel %vm1178_vm9, %v1024_v34, %v1226_v58 }
 0x254   : > { %v1031_v20 = vpop.f32.mrf.mxu0  ;;  %v1507_v22 = vpack.c.bf16 %v1273_v11, %v1267_v10  ;;  %v8852_v34 = vmul.f32 0.01, %v8826_v16  ;;  %v8868_v10 = vsel %vm1175_vm8, %v8786_v17, %v1223_v63  ;;  %v8885_v17 = vsel %vm1152_vm5, %v8703_v15, %v8740_v39  ;;  %v7361_v39 = vld [vmem:[%s8446_s22 + $0x208] sm:$0xff]  }
 0x255   : > { %vm1181_vm11 = vcmp.gt.f32.partialorder %v1028_v27, 0.0  ;;  %v1229_v4 = vmul.f32 0.01, %v1028_v27  ;;  %v1032_v50 = vadd.f32 %v1031_v20, %v8617_v44  ;;  %v1276_v19 = vsel %vm1180_vm10, %v1026_v60, %v1228_v25 }
 0x256   : > { %7054 = vmatpush3.bf16.msra.mxu1 %v7355_v38  ;;  %v1033_v2 = vpop.f32.mrf.mxu0  ;;  %v1508_v35 = vpack.c.bf16 %v1276_v19, %v8789_v21  ;;  %v8863_v38 = vmul.f32 0.01, %v8832_v61  ;;  %vm1182_vm5 = vcmp.gt.f32.partialorder %v8779_v12, 0.0  ;;  %vm1176_vm6 = vcmp.gt.f32.partialorder %v8826_v16, 0.0 }
 0x257   : > { %v1231_v58 = vmul.f32 0.01, %v1032_v50  ;;  %v1034_v60 = vadd.f32 %v1033_v2, %v8615_v41  ;;  %7055 = vmatprep.subr.bf16.mxu1 %v7358_v59  ;;  %v8871_v25 = vsel %vm1181_vm11, %v1028_v27, %v1229_v4  ;;  %v7360_v2 = vld [vmem:[%s8446_s22 + $0x210] sm:$0xff]   ;;  %vm1183_vm0 = vcmp.gt.f32.partialorder %v1032_v50, 0.0 }
 0x258   : > { %v1035_v21 = vpop.f32.mrf.mxu0  ;;  %2089 = vmatprep.mubr.bf16.mxu1 %v1508_v35  ;;  %v8879_v35 = vmul.f32 0.01, %v8835_v29  ;;  %vm1194_vm11 = vcmp.gt.f32.partialorder %v8832_v61, 0.0 }
 0x259   : > { %v1232_v20 = vmul.f32 0.01, %v1034_v60  ;;  %v1036_v19 = vadd.f32 %v1035_v21, %v8617_v44  ;;  %2090 = vmatmul.mubr.bf16.gmra.mxu1 %v1507_v22  ;;  %2131 = vmatmul.mubr.bf16.vlgmr.msra.gmra.mxu0 %v8710_v18  ;;  %v8894_v18 = vsel %vm1158_vm7, %v8678_v52, %v8700_v13  ;;  %vm1184_vm2 = vcmp.gt.f32.partialorder %v1034_v60, 0.0 }
 0x25a   : > { %7056 = vmatpush3.bf16.msra.mxu1 %v7358_v59  ;;  %v1037_v63 = vpop.f32.mrf.mxu0  ;;  %7065 = vmatprep.mubr.bf16.mxu1 %v8796_v26  ;;  %9478 = vst [vmem:[#allocation31_spill] sm:$0xff] %v8894_v18  ;;  %v1279_v13 = vsel %vm1183_vm0, %v1032_v50, %v1231_v58  ;;  %vm1179_vm7 = vcmp.gt.f32.partialorder %v8748_v48, 0.0  ;;  %v1263_v50 = vsel %vm1167_vm12, %v8718_v23, %v8763_v30 }
 0x25b   : > { %vm1186_vm1 = vcmp.gt.f32.partialorder %v1036_v19, 0.0  ;;  %v1234_v4 = vmul.f32 0.01, %v1036_v19  ;;  %v1038_v22 = vadd.f32 %v1037_v63, %v8615_v41  ;;  %7057 = vmatprep.subr.bf16.mxu1 %v7359_v31  ;;  %v8909_v27 = vsel %vm1184_vm2, %v1034_v60, %v1232_v20 }
 0x25c   : > { %v1041_v15 = vpop.f32.mrf.mxu0  ;;  %v8923_v58 = vsel %vm1164_vm14, %v8733_v33, %v8775_v8  ;;  %v1266_v23 = vsel %vm1170_vm15, %v8730_v32, %v8772_v54  ;;  %v7362_v8 = vld [vmem:[%s8446_s22 + $0x200] sm:$0xff]   ;;  %vm1185_vm14 = vcmp.gt.f32.partialorder %v8812_v45, 0.0  ;;  %vm1188_vm15 = vcmp.gt.f32.partialorder %v8835_v29, 0.0 }
 0x25d   : > { %vm1187_vm3 = vcmp.gt.f32.partialorder %v1038_v22, 0.0  ;;  %v1235_v26 = vmul.f32 0.01, %v1038_v22  ;;  %v1042_v59 = vadd.f32 %v1041_v15, %v8617_v44  ;;  %v1282_v15 = vsel %vm1186_vm1, %v1036_v19, %v1234_v4  ;;  %9479 = vst [vmem:[#allocation32_spill] sm:$0xff] %v8923_v58 }
 0x25e   : > { %7058 = vmatpush3.bf16.msra.mxu1 %v7359_v31  ;;  %v1043_v52 = vpop.f32.mrf.mxu0  ;;  %v1257_v31 = vsel %vm1161_vm13, %v8722_v28, %v8766_v47  ;;  %v1509_v47 = vpack.c.bf16 %v1282_v15, %v9430_v55  ;;  %vm1191_vm13 = vcmp.gt.f32.partialorder %v8809_v43, 0.0 }
 0x25f   : > { %vm1189_vm8 = vcmp.gt.f32.partialorder %v1042_v59, 0.0  ;;  %v1237_v21 = vmul.f32 0.01, %v1042_v59  ;;  %v1044_v63 = vadd.f32 %v1043_v52, %v8615_v41  ;;  %7059 = vmatprep.subr.bf16.mxu1 %v7360_v2  ;;  %v8927_v52 = vpack.c.bf16 %v1263_v50, %v1257_v31  ;;  %v7372_v31 = vld [vmem:[%s8456_s11 + $0xa8] sm:$0xff]  }
 0x260   : > { %v1045_v11 = vpop.f32.mrf.mxu0  ;;  %v7373_v50 = vld [vmem:[%s8456_s11 + $0x68] sm:$0xff]  }
 0x261   : > { %vm1190_vm9 = vcmp.gt.f32.partialorder %v1044_v63, 0.0  ;;  %v1238_v60 = vmul.f32 0.01, %v1044_v63  ;;  %v1046_v20 = vadd.f32 %v1045_v11, %v8617_v44  ;;  %v1285_v19 = vsel %vm1189_vm8, %v1042_v59, %v1237_v21 }
 0x262   : > { %7060 = vmatpush3.bf16.msra.mxu1 %v7360_v2  ;;  %v1047_v4 = vpop.f32.mrf.mxu0  ;;  %v1510_v28 = vpack.c.bf16 %v1285_v19, %v1279_v13  ;;  %v8942_v2 = vpack.c.bf16 %v1266_v23, %v8923_v58  ;;  %v8951_v59 = vsel %vm1187_vm3, %v1038_v22, %v1235_v26  ;;  %v8959_v21 = vsel %vm1176_vm6, %v8826_v16, %v8852_v34  ;;  %v7363_v34 = vld [vmem:[%s8456_s11 + $0xf8] sm:$0xff]   ;;  %v7376_v19 = vld [vmem:[%s8456_s11 + $0xa0] sm:$0xff]  }
 0x263   : > { %vm1192_vm10 = vcmp.gt.f32.partialorder %v1046_v20, 0.0  ;;  %v1240_v33 = vmul.f32 0.01, %v1046_v20  ;;  %v1048_v30 = vadd.f32 %v1047_v4, %v8615_v41  ;;  %7061 = vmatprep.subr.bf16.mxu1 %v7361_v39  ;;  %v8937_v44 = vsel %vm1190_vm9, %v1044_v63, %v1238_v60  ;;  %v7370_v63 = vld [vmem:[%s8456_s11 + $0x30] sm:$0xff]   ;;  %v7374_v60 = vld [vmem:[%s8456_s11 + $0x28] sm:$0xff]   ;;  %v7377_v4 = vld [vmem:[%s8456_s11 + $0x60] sm:$0xff]  }
 0x264   : > { %2138 = vmatprep.mubr.bf16.mxu0 %v1510_v28  ;;  %v8971_v22 = vsel %vm1173_vm4, %v8751_v49, %v8806_v42  ;;  %v8979_v16 = vsel %vm1179_vm7, %v8748_v48, %v8800_v51  ;;  %v8987_v49 = vsel %vm1194_vm11, %v8832_v61, %v8863_v38  ;;  %v8993_v48 = vsel %vm1185_vm14, %v8812_v45, %v8860_v24  ;;  %v7364_v24 = vld [vmem:[%s8456_s11 + $0xb8] sm:$0xff]   ;;  %v7368_v38 = vld [vmem:[%s8456_s11 + $0xb0] sm:$0xff]   ;;  %v7378_v28 = vld [vmem:[%s8456_s11 + $0x20] sm:$0xff]  }
 0x265   : > { %vm1193_vm12 = vcmp.gt.f32.partialorder %v1048_v30, 0.0  ;;  %v1241_v32 = vmul.f32 0.01, %v1048_v30  ;;  %2139 = vmatmul.mubr.bf16.gmra.mxu0 %v1509_v47  ;;  %v1288_v41 = vsel %vm1192_vm10, %v1046_v20, %v1240_v33  ;;  %9481 = vst [vmem:[#allocation34_spill] sm:$0xff] %v8971_v22  ;;  %9482 = vst [vmem:[#allocation35_spill] sm:$0xff] %v8979_v16  ;;  %v8999_v51 = vsel %vm1191_vm13, %v8809_v43, %v8855_v53  ;;  %v7365_v43 = vld [vmem:[%s8456_s11 + $0x78] sm:$0xff]  }
 0x266   : > { %7062 = vmatpush3.bf16.msra.mxu1 %v7361_v39  ;;  %v8965_v39 = vsel %vm1182_vm5, %v8779_v12, %v8823_v0  ;;  %v1511_v0 = vpack.c.bf16 %v1288_v41, %v1282_v15  ;;  %9483 = vst [vmem:[#allocation36_spill] sm:$0xff] %v8987_v49  ;;  %9484 = vst [vmem:[#allocation37_spill] sm:$0xff] %v8993_v48  ;;  %v9005_v42 = vsel %vm1188_vm15, %v8835_v29, %v8879_v35  ;;  %v7366_v53 = vld [vmem:[%s8456_s11 + $0x38] sm:$0xff]   ;;  %v7367_v29 = vld [vmem:[%s8456_s11 + $0xf0] sm:$0xff]   ;;  %vm7989_vm14 = vmmov 0  }
 0x267   : > { %v8948_v54 = vsel %vm1193_vm12, %v1048_v30, %v1241_v32  ;;  %7063 = vmatprep.subr.bf16.mxu1 %v7362_v8  ;;  %9480 = vst [vmem:[#allocation33_spill] sm:$0xff] %v8965_v39  ;;  %9485 = vst [vmem:[#allocation38_spill] sm:$0xff] %v8999_v51  ;;  %6601 = vmatprep.subr.bf16.mxu0 %v7365_v43  ;;  %v7369_v35 = vld [vmem:[%s8456_s11 + $0x70] sm:$0xff]   ;;  %v7371_v15 = vld [vmem:[%s8456_s11 + $0xe8] sm:$0xff]  }
 0x268   : > { %9486 = vst [vmem:[#allocation39_spill] sm:$0xff] %v9005_v42  ;;  %6602 = vmatpush3.bf16.msra.mxu0 %v7366_v53  ;;  %v7375_v20 = vld [vmem:[%s8456_s11 + $0xe0] sm:$0xff]   ;;  %v7379_v47 = vld [vmem:[%s8456_s11 + $0xd8] sm:$0xff]   ;;  %v7384_v32 = vld [vmem:[%s8456_s11 + $0x90] sm:$0xff]  }
 0x269   : > { %6603 = vmatprep.subr.bf16.mxu0 %v7369_v35  ;;  %v7380_v23 = vld [vmem:[%s8456_s11 + $0x98] sm:$0xff]   ;;  %v7385_v41 = vld [vmem:[%s8456_s11 + $0x50] sm:$0xff]   ;;  %v7389_v43 = vld [vmem:[%s8456_s11 + $0x48] sm:$0xff]  }
 0x26a   : > { %7064 = vmatpush3.bf16.msra.mxu1 %v7362_v8  ;;  %v7381_v33 = vld [vmem:[%s8456_s11 + $0x58] sm:$0xff]   ;;  %v7383_v8 = vld [vmem:[%s8456_s11 + $0xd0] sm:$0xff]   ;;  %v7390_v53 = vld [vmem:[%s8456_s11 + $0x8] sm:$0xff]  }
 0x26b   : > { %6623 = vmatprep.subr.bf16.mxu1 %v7363_v34  ;;  %v7382_v30 = vld [vmem:[%s8456_s11 + $0x18] sm:$0xff]   ;;  %v7387_v34 = vld [vmem:[%s8456_s11 + $0xc8] sm:$0xff]   ;;  %v7393_v35 = vld [vmem:[%s8456_s11 + $0x40] sm:$0xff]  }
 0x26c   : > { %6604 = vmatpush3.bf16.msra.mxu0 %v7370_v63  ;;  %v7394_v63 = vld [vmem:[%s8456_s11] sm:$0xff]   ;;  %v5692_v13 = vld [vmem:[%s8449_s24] ss:$0 sm:$0xff] }
 0x26d   : > { %7066 = vmatmul.mubr.bf16.vlgmr.msra.gmra.mxu1 %v1511_v0  ;;  %6605 = vmatprep.subr.bf16.mxu0 %v7373_v50  ;;  %v7386_v0 = vld [vmem:[%s8456_s11 + $0x10] sm:$0xff]   ;;  %v6495_v50 = vpop.f32.mrf.mxu1 }
 0x26e   : > { %6624 = vmatpush3.bf16.msra.mxu1 %v7364_v24  ;;  %v7388_v24 = vld [vmem:[%s8456_s11 + $0x88] sm:$0xff]  }
 0x26f   : > { %6625 = vmatprep.subr.bf16.mxu1 %v7367_v29  ;;  %v7391_v29 = vld [vmem:[%s8456_s11 + $0xc0] sm:$0xff]  }
 0x270   : > { %6606 = vmatpush3.bf16.msra.mxu0 %v7374_v60  ;;  %v6496_v60 = vpop.f32.mrf.mxu1 }
 0x271   : > { %6607 = vmatprep.subr.bf16.mxu0 %v7377_v4  ;;  %v6497_v7 = vadd.f32 %v6496_v60, %v6495_v50 }
 0x272   : > { %6626 = vmatpush3.bf16.msra.mxu1 %v7368_v38  ;;  %v7392_v38 = vld [vmem:[%s8456_s11 + $0x80] sm:$0xff]  }
 0x273   : > { %6627 = vmatprep.subr.bf16.mxu1 %v7371_v15  ;;  %v7395_v15 = vld [vmem:[%s8446_s22 + $0x338] sm:$0xff]   ;;  %v1986_v40 = vadd.f32 %v6497_v7, %v5692_v13 }
 0x274   : > { %6608 = vmatpush3.bf16.msra.mxu0 %v7378_v28 }
 0x275   : > { %6609 = vmatprep.subr.bf16.mxu0 %v7381_v33 }
 0x276   : > { %6628 = vmatpush3.bf16.msra.mxu1 %v7372_v31  ;;  %v7397_v31 = vld [vmem:[%s8446_s22 + $0x2b8] sm:$0xff]  }
 0x277   : > { %6629 = vmatprep.subr.bf16.mxu1 %v7375_v20  ;;  %v6498_v20 = vpop.f32.mrf.mxu1 }
 0x278   : > { %6610 = vmatpush3.bf16.msra.mxu0 %v7382_v30 }
 0x279   : > { %6611 = vmatprep.subr.bf16.mxu0 %v7385_v41 }
 0x27a   : > { %6630 = vmatpush3.bf16.msra.mxu1 %v7376_v19  ;;  %v6499_v19 = vpop.f32.mrf.mxu1 }
 0x27b   : > { %6631 = vmatprep.subr.bf16.mxu1 %v7379_v47  ;;  %v6500_v36 = vadd.f32 %v6499_v19, %v6498_v20 }
 0x27c   : > { %6612 = vmatpush3.bf16.msra.mxu0 %v7386_v0 }
 0x27d   : > { %6613 = vmatprep.subr.bf16.mxu0 %v7389_v43 }
 0x27e   : > { %6632 = vmatpush3.bf16.msra.mxu1 %v7380_v23 }
 0x27f   : > { %6633 = vmatprep.subr.bf16.mxu1 %v7383_v8 }
 0x280   : > { %6614 = vmatpush3.bf16.msra.mxu0 %v7390_v53 }
 0x281   : > { %6615 = vmatprep.subr.bf16.mxu0 %v7393_v35 }
 0x282   : > { %6634 = vmatpush3.bf16.msra.mxu1 %v7384_v32 }
 0x283   : > { %6635 = vmatprep.subr.bf16.mxu1 %v7387_v34 }
 0x284   : > { %6616 = vmatpush3.bf16.msra.mxu0 %v7394_v63 }
 0x285   : > { %6645 = vmatprep.subr.bf16.mxu0 %v7397_v31 }
 0x286   : > { %6636 = vmatpush3.bf16.msra.mxu1 %v7388_v24 }
 0x287   : > { %6637 = vmatprep.subr.bf16.mxu1 %v7391_v29 }
 0x28a   : > { %6638 = vmatpush3.bf16.msra.mxu1 %v7392_v38 }
 0x28b   : > { %6673 = vmatprep.subr.bf16.mxu1 %v7395_v15 }
 0x2f1   : > { %v6523_v4 = vpop.f32.mrf.mxu0 }
 0x2f3   : > { %v6524_v47 = vpop.f32.mrf.mxu0 }
 0x2f4   : > { %v6525_v16 = vadd.f32 %v6524_v47, %v6523_v4 }
 0x2f5   : > { %v6526_v30 = vpop.f32.mrf.mxu0 }
 0x2f6   : > { %v2035_v50 = vadd.f32 %v6525_v16, %v1986_v40 }
 0x2f7   : > { %v6527_v41 = vpop.f32.mrf.mxu0 }
 0x305   : > { %v6501_v28 = vpop.f32.mrf.mxu1 }
 0x307   : > { %v6502_v23 = vpop.f32.mrf.mxu1 }
 0x308   : > { %v6503_v12 = vadd.f32 %v6502_v23, %v6501_v28 }
 0x309   : > { %v6504_v33 = vpop.f32.mrf.mxu1 }
 0x30a   : > { %v1994_v14 = vadd.f32 %v6503_v12, %v5692_v13 }
 0x30b   : > { %v6505_v8 = vpop.f32.mrf.mxu1 }
 0x30c   : > { %v6506_v11 = vadd.f32 %v6505_v8, %v6504_v33  ;;  %v1989_v8 = vadd.f32 %v6500_v36, %v5692_v13 }
 0x30d   : > { %v6551_v32 = vpop.f32.mrf.mxu1 }
 0x30e   : > { %v1997_v48 = vadd.f32 %v6506_v11, %v5692_v13 }
 0x30f   : > { %v6552_v0 = vpop.f32.mrf.mxu1 }
 0x310   : > { %v6553_v18 = vadd.f32 %v6552_v0, %v6551_v32  ;;  %v7396_v32 = vld [vmem:[%s8446_s22 + $0x2f8] sm:$0xff]  }
 0x311   : > { %v6529_v34 = vpop.f32.mrf.mxu0  ;;  %v6554_v24 = vpop.f32.mrf.mxu1 }
 0x313   : > { %v6530_v43 = vpop.f32.mrf.mxu0  ;;  %v6555_v29 = vpop.f32.mrf.mxu1 }
 0x314   : > { %v6531_v61 = vadd.f32 %v6530_v43, %v6529_v34  ;;  %v6528_v34 = vadd.f32 %v6527_v41, %v6526_v30  ;;  %v6556_v4 = vadd.f32 %v6555_v29, %v6554_v24  ;;  %v7399_v29 = vld [vmem:[%s8446_s22 + $0x330] sm:$0xff]  }
 0x315   : > { %v6532_v53 = vpop.f32.mrf.mxu0 }
 0x316   : > { %v2043_v42 = vadd.f32 %v6531_v61, %v1994_v14  ;;  %v2038_v7 = vadd.f32 %v6528_v34, %v1989_v8  ;;  %v7403_v34 = vld [vmem:[%s8446_s22 + $0x328] sm:$0xff]  }
 0x317   : > { %v6533_v38 = vpop.f32.mrf.mxu0  ;;  %v7406_v8 = vld [vmem:[%s8446_s22 + $0x268] sm:$0xff]  }
 0x318   : > { %v6534_v39 = vadd.f32 %v6533_v38, %v6532_v53  ;;  %v7398_v53 = vld [vmem:[%s8446_s22 + $0x278] sm:$0xff]  }
 0x319   : > { %v6557_v35 = vpop.f32.mrf.mxu1  ;;  %v6579_v63 = vpop.f32.mrf.mxu0 }
 0x31a   : > { %v2046_v60 = vadd.f32 %v6534_v39, %v1997_v48 }
 0x31b   : > { %v6580_v15 = vpop.f32.mrf.mxu0  ;;  %v6558_v31 = vpop.f32.mrf.mxu1 }
 0x31c   : > { %v6559_v55 = vadd.f32 %v6558_v31, %v6557_v35  ;;  %v6581_v33 = vadd.f32 %v6580_v15, %v6579_v63  ;;  %v2084_v31 = vadd.f32 %v6553_v18, %v2035_v50  ;;  %v9487_v63 = vmov 0.0   ;;  %v7405_v50 = vld [vmem:[%s8446_s22 + $0x2a8] sm:$0xff]  }
 0x31d   : > { %v6582_v45 = vpop.f32.mrf.mxu0  ;;  %v6560_v26 = vpop.f32.mrf.mxu1  ;;  %v2719_v15 = vpack.c.bf16 %v8662_v37, %v9487_v63 }
 0x31e   : > { %v2092_v58 = vadd.f32 %v6559_v55, %v2043_v42  ;;  %v2133_v47 = vadd.f32 %v6581_v33, %v2084_v31  ;;  %v7404_v33 = vld [vmem:[%s8446_s22 + $0x2e8] sm:$0xff]   ;;  %v7408_v31 = vld [vmem:[%s8446_s22 + $0x2e0] sm:$0xff]  }
 0x31f   : > { %v6583_v1 = vpop.f32.mrf.mxu0  ;;  %v6561_v49 = vpop.f32.mrf.mxu1 }
 0x320   : > { %v6562_v28 = vadd.f32 %v6561_v49, %v6560_v26  ;;  %v6584_v11 = vadd.f32 %v6583_v1, %v6582_v45 }
 0x322   : > { %v2095_v14 = vadd.f32 %v6562_v28, %v2046_v60  ;;  %v7401_v28 = vld [vmem:[%s8446_s22 + $0x2b0] sm:$0xff]   ;;  %v9488_v60 = vmov 0.0|0.0  }
 0x325   : > { %v6585_v22 = vpop.f32.mrf.mxu0 }
 0x327   : > { %v6586_v51 = vpop.f32.mrf.mxu0 }
 0x328   : > { %v6587_v23 = vadd.f32 %v6586_v51, %v6585_v22  ;;  %v2087_v22 = vadd.f32 %v6556_v4, %v2038_v7  ;;  %v7411_v4 = vld [vmem:[%s8446_s22 + $0x318] sm:$0xff]  }
 0x329   : > { %v6588_v43 = vpop.f32.mrf.mxu0  ;;  %v7412_v7 = vld [vmem:[%s8446_s22 + $0x2d8] sm:$0xff]  }
 0x32a   : > { %v2141_v12 = vadd.f32 %v6587_v23, %v2092_v58  ;;  %v2136_v36 = vadd.f32 %v6584_v11, %v2087_v22  ;;  %v7400_v23 = vld [vmem:[%s8446_s22 + $0x2f0] sm:$0xff]   ;;  %v7414_v11 = vld [vmem:[%s8446_s22 + $0x258] sm:$0xff]   ;;  %v7421_v22 = vld [vmem:[%s8446_s22 + $0x288] sm:$0xff]  }
 0x32b   : > { %v6589_v35 = vpop.f32.mrf.mxu0 }
 0x32c   : > { %v6590_v61 = vadd.f32 %v6589_v35, %v6588_v43  ;;  %v7402_v43 = vld [vmem:[%s8446_s22 + $0x270] sm:$0xff]   ;;  %v7409_v35 = vld [vmem:[%s8446_s22 + $0x2a0] sm:$0xff]  }
 0x32d   : > { %v7067_v20 = vpop.f32.mrf.mxu1 }
 0x32e   : > { %v2190_v19 = vadd.f32 %v7067_v20, %v2141_v12  ;;  %v2144_v55 = vadd.f32 %v6590_v61, %v2095_v14  ;;  %v7407_v12 = vld [vmem:[%s8446_s22 + $0x320] sm:$0xff]   ;;  %v7413_v61 = vld [vmem:[%s8446_s22 + $0x298] sm:$0xff]   ;;  %v7415_v20 = vld [vmem:[%s8446_s22 + $0x310] sm:$0xff]  }
 0x32f   : > { %v2181_v26 = vpop.f32.mrf.mxu1  ;;  %v7410_v14 = vld [vmem:[%s8446_s22 + $0x260] sm:$0xff]  }
 0x330   : > { %v2182_v49 = vadd.f32 %v2181_v26, %v2133_v47  ;;  %v2202_v51 = vmul.f32 0.01, %v2190_v19  ;;  %vm2198_vm0 = vcmp.gt.f32.partialorder %v2190_v19, 0.0  ;;  %v7416_v47 = vld [vmem:[%s8446_s22 + $0x2d0] sm:$0xff]  }
 0x331   : > { %v7068_v40 = vpop.f32.mrf.mxu1  ;;  %v7418_v26 = vld [vmem:[%s8446_s22 + $0x250] sm:$0xff]  }
 0x332   : > { %v2193_v58 = vadd.f32 %v7068_v40, %v2144_v55  ;;  %v2200_v13 = vmul.f32 0.01, %v2182_v49  ;;  %vm2196_vm1 = vcmp.gt.f32.partialorder %v2182_v49, 0.0  ;;  %v2206_v16 = vsel %vm2198_vm0, %v2190_v19, %v2202_v51  ;;  %v7417_v19 = vld [vmem:[%s8446_s22 + $0x290] sm:$0xff]   ;;  %v7419_v55 = vld [vmem:[%s8446_s22 + $0x308] sm:$0xff]   ;;  %v7423_v51 = vld [vmem:[%s8446_s22 + $0x300] sm:$0xff]  }
 0x333   : > { %v2184_v18 = vpop.f32.mrf.mxu1  ;;  %v2274_v41 = vpack.c.bf16 %v2206_v16, %v2206_v16  ;;  %v7422_v40 = vld [vmem:[%s8446_s22 + $0x248] sm:$0xff]   ;;  %v7431_v16 = vld [vmem:[%s8446_s22 + $0x430] sm:$0xff]  }
 0x334   : > { %vm2199_vm2 = vcmp.gt.f32.partialorder %v2193_v58, 0.0  ;;  %v2203_v39 = vmul.f32 0.01, %v2193_v58  ;;  %v2185_v1 = vadd.f32 %v2184_v18, %v2136_v36  ;;  %v2204_v45 = vsel %vm2196_vm1, %v2182_v49, %v2200_v13  ;;  %v7420_v49 = vld [vmem:[%s8446_s22 + $0x2c8] sm:$0xff]   ;;  %v7424_v36 = vld [vmem:[%s8446_s22 + $0x2c0] sm:$0xff]   ;;  %v7427_v13 = vld [vmem:[%s8446_s22 + $0x438] sm:$0xff]  }
 0x335   : > { %v2272_v38 = vpack.c.bf16 %v2204_v45, %v2204_v45  ;;  %v7426_v18 = vld [vmem:[%s8446_s22 + $0x240] sm:$0xff]   ;;  %v7433_v45 = vld [vmem:[%s8446_s22 + $0x3b0] sm:$0xff]  }
 0x336   : > { %vm2197_vm3 = vcmp.gt.f32.partialorder %v2185_v1, 0.0  ;;  %v2201_v48 = vmul.f32 0.01, %v2185_v1  ;;  %v2207_v42 = vsel %vm2199_vm2, %v2193_v58, %v2203_v39  ;;  %v7425_v58 = vld [vmem:[%s8446_s22 + $0x280] sm:$0xff]   ;;  %v7429_v39 = vld [vmem:[%s8446_s22 + $0x3b8] sm:$0xff]  }
 0x337   : > { %v2275_v30 = vpack.c.bf16 %v2207_v42, %v2207_v42  ;;  %v7430_v42 = vld [vmem:[%s8446_s22 + $0x378] sm:$0xff]  }
 0x338   : > { %v2205_v0 = vsel %vm2197_vm3, %v2185_v1, %v2201_v48  ;;  %v7428_v1 = vld [vmem:[%s8446_s22 + $0x3f8] sm:$0xff]   ;;  %v2725_v48 = vpack.c.bf16 %v8868_v10, %v9487_v63 }
 0x339   : > { %2547 = vmatprep.mubr.bf16.mxu1 %v2275_v30  ;;  %v2273_v24 = vpack.c.bf16 %v2205_v0, %v2205_v0  ;;  %v7432_v30 = vld [vmem:[%s8446_s22 + $0x3f0] sm:$0xff]   ;;  %v7437_v0 = vld [vmem:[%s8446_s22 + $0x3a8] sm:$0xff]  }
 0x33a   : > { %2548 = vmatmul.mubr.bf16.vlgmr.msra.gmra.mxu1 %v2274_v41  ;;  %v7434_v41 = vld [vmem:[%s8446_s22 + $0x370] sm:$0xff]  }
 0x33b   : > { %6674 = vmatpush3.bf16.msra.mxu1 %v7396_v32  ;;  %2507 = vmatprep.mubr.bf16.mxu0 %v2273_v24  ;;  %v7435_v32 = vld [vmem:[%s8446_s22 + $0x428] sm:$0xff]  }
 0x33c   : > { %3251 = vmatprep.mubr.bf16.mxu1 %v2719_v15  ;;  %2508 = vmatmul.mubr.bf16.vlgmr.msra.gmra.mxu0 %v2272_v38  ;;  %v7436_v24 = vld [vmem:[%s8446_s22 + $0x3e8] sm:$0xff]   ;;  %v2722_v38 = vpack.c.bf16 %v8758_v57, %v9487_v63  ;;  %v7441_v15 = vld [vmem:[%s8446_s22 + $0x3a0] sm:$0xff]  }
 0x33d   : > { %6646 = vmatpush3.bf16.msra.mxu0 %v7398_v53  ;;  %6675 = vmatprep.subr.bf16.mxu1 %v7399_v29  ;;  %v7439_v53 = vld [vmem:[%s8446_s22 + $0x420] sm:$0xff]   ;;  %v7438_v29 = vld [vmem:[%s8446_s22 + $0x368] sm:$0xff]  }
 0x33e   : > { %6647 = vmatprep.subr.bf16.mxu0 %v7401_v28  ;;  %3202 = vmatprep.mubr.bf16.mxu0 %v9488_v60  ;;  %v7440_v28 = vld [vmem:[%s8446_s22 + $0x3e0] sm:$0xff]  }
 0x33f   : > { %6676 = vmatpush3.bf16.msra.mxu1 %v7400_v23  ;;  %v7443_v23 = vld [vmem:[%s8446_s22 + $0x418] sm:$0xff]   ;;  %v7442_v57 = vld [vmem:[%s8446_s22 + $0x360] sm:$0xff]  }
 0x340   : > { %6677 = vmatprep.subr.bf16.mxu1 %v7403_v34  ;;  %v9489_v34 = vpack.c.bf16 %v8668_v46, %v8662_v37  ;;  %v7448_v37 = vld [vmem:[%s8446_s22 + $0x3d0] sm:$0xff]   ;;  %v7451_v46 = vld [vmem:[%s8446_s22 + $0x408] sm:$0xff]  }
 0x341   : > { %6648 = vmatpush3.bf16.msra.mxu0 %v7402_v43  ;;  %v7445_v43 = vld [vmem:[%s8446_s22 + $0x398] sm:$0xff]  }
 0x342   : > { %6649 = vmatprep.subr.bf16.mxu0 %v7405_v50  ;;  %v7444_v50 = vld [vmem:[%s8446_s22 + $0x3d8] sm:$0xff]  }
 0x343   : > { %6678 = vmatpush3.bf16.msra.mxu1 %v7404_v33  ;;  %v7446_v33 = vld [vmem:[%s8446_s22 + $0x358] sm:$0xff]  }
 0x344   : > { %6679 = vmatprep.subr.bf16.mxu1 %v7407_v12  ;;  %v7449_v12 = vld [vmem:[%s8446_s22 + $0x390] sm:$0xff]  }
 0x345   : > { %6650 = vmatpush3.bf16.msra.mxu0 %v7406_v8  ;;  %v7450_v8 = vld [vmem:[%s8446_s22 + $0x350] sm:$0xff]  }
 0x346   : > { %6651 = vmatprep.subr.bf16.mxu0 %v7409_v35  ;;  %v7453_v35 = vld [vmem:[%s8446_s22 + $0x388] sm:$0xff]  }
 0x347   : > { %6680 = vmatpush3.bf16.msra.mxu1 %v7408_v31  ;;  %v7452_v31 = vld [vmem:[%s8446_s22 + $0x3c8] sm:$0xff]  }
 0x348   : > { %6681 = vmatprep.subr.bf16.mxu1 %v7411_v4  ;;  %v7455_v4 = vld [vmem:[%s8446_s22 + $0x400] sm:$0xff]  }
 0x349   : > { %6652 = vmatpush3.bf16.msra.mxu0 %v7410_v14  ;;  %v7454_v14 = vld [vmem:[%s8446_s22 + $0x348] sm:$0xff]  }
 0x34a   : > { %6653 = vmatprep.subr.bf16.mxu0 %v7413_v61  ;;  %v7457_v61 = vld [vmem:[%s8446_s22 + $0x380] sm:$0xff]  }
 0x34b   : > { %6682 = vmatpush3.bf16.msra.mxu1 %v7412_v7  ;;  %v7456_v7 = vld [vmem:[%s8446_s22 + $0x3c0] sm:$0xff]  }
 0x34c   : > { %6683 = vmatprep.subr.bf16.mxu1 %v7415_v20  ;;  %v7458_v20 = vld [vmem:[%s8446_s22 + $0x340] sm:$0xff]  }
 0x34d   : > { %6654 = vmatpush3.bf16.msra.mxu0 %v7414_v11  ;;  %v7459_v11 = vld [vmem:[%s8446_s22 + $0x478] sm:$0xff]  }
 0x34e   : > { %6655 = vmatprep.subr.bf16.mxu0 %v7417_v19  ;;  %v7460_v19 = vld [vmem:[%s8446_s22 + $0x470] sm:$0xff]  }
 0x34f   : > { %6684 = vmatpush3.bf16.msra.mxu1 %v7416_v47  ;;  %v9490_v47 = vpack.c.bf16 %v8937_v44, %v8909_v27  ;;  %v7462_v27 = vld [vmem:[%s8446_s22 + $0x460] sm:$0xff]  }
 0x350   : > { %6685 = vmatprep.subr.bf16.mxu1 %v7419_v55  ;;  %v9491_v55 = vpack.c.bf16 %v8636_v5, %v8633_v3  ;;  %v9493_v3 = vpack.c.bf16 %v8843_v9, %v8840_v62  ;;  %v7463_v5 = vld [vmem:[%s8446_s22 + $0x458] sm:$0xff]   ;;  %v7466_v62 = vld [vmem:[%s8446_s22 + $0x440] sm:$0xff]  }
 0x351   : > { %6656 = vmatpush3.bf16.msra.mxu0 %v7418_v26  ;;  %v9492_v26 = vpack.c.bf16 %v8871_v25, %v8868_v10  ;;  %v7464_v10 = vld [vmem:[%s8446_s22 + $0x450] sm:$0xff]   ;;  %v7465_v25 = vld [vmem:[%s8446_s22 + $0x448] sm:$0xff]   ;;  %v7467_v9 = vld [vmem:[%s8456_s11 + $0x1f8] sm:$0xff]  }
 0x352   : > { %6657 = vmatprep.subr.bf16.mxu0 %v7421_v22  ;;  %v7461_v22 = vld [vmem:[%s8446_s22 + $0x468] sm:$0xff]   ;;  %v7468_v44 = vld [vmem:[%s8456_s11 + $0x1b8] sm:$0xff]  }
 0x353   : > { %6686 = vmatpush3.bf16.msra.mxu1 %v7420_v49  ;;  %v2728_v49 = vpack.c.bf16 %v8951_v59, %v9487_v63 }
 0x354   : > { %6687 = vmatprep.subr.bf16.mxu1 %v7423_v51  ;;  %v7469_v51 = vld [vmem:[%s8456_s11 + $0x178] sm:$0xff]  }
 0x355   : > { %6658 = vmatpush3.bf16.msra.mxu0 %v7422_v40  ;;  %v7470_v40 = vld [vmem:[%s8456_s11 + $0x138] sm:$0xff]  }
 0x356   : > { %6659 = vmatprep.subr.bf16.mxu0 %v7425_v58  ;;  %v7471_v58 = vld [vmem:[%s8456_s11 + $0x1f0] sm:$0xff]  }
 0x357   : > { %6688 = vmatpush3.bf16.msra.mxu1 %v7424_v36  ;;  %v7472_v36 = vld [vmem:[%s8456_s11 + $0x1b0] sm:$0xff]  }
 0x358   : > { %6729 = vmatprep.subr.bf16.mxu1 %v7427_v13  ;;  %v7473_v13 = vld [vmem:[%s8456_s11 + $0x170] sm:$0xff]  }
 0x359   : > { %6660 = vmatpush3.bf16.msra.mxu0 %v7426_v18  ;;  %v7476_v18 = vld [vmem:[%s8456_s11 + $0x1a8] sm:$0xff]  }
 0x35a   : > { %3252 = vmatmul.mubr.bf16.vlgmr.msra.gmra.mxu1 %v9488_v60  ;;  %6701 = vmatprep.subr.bf16.mxu0 %v7429_v39  ;;  %v7477_v39 = vld [vmem:[%s8456_s11 + $0x168] sm:$0xff]  }
 0x35b   : > { %3259 = vmatprep.mubr.bf16.mxu1 %v2725_v48  ;;  %6730 = vmatpush3.bf16.msra.mxu1 %v7428_v1  ;;  %v7479_v1 = vld [vmem:[%s8456_s11 + $0x1e0] sm:$0xff]  }
 0x35c   : > { %3203 = vmatmul.mubr.bf16.vlgmr.msra.gmra.mxu0 %v9488_v60  ;;  %6731 = vmatprep.subr.bf16.mxu1 %v7431_v16  ;;  %v7478_v16 = vld [vmem:[%s8456_s11 + $0x128] sm:$0xff]   ;;  %v7480_v48 = vld [vmem:[%s8456_s11 + $0x1a0] sm:$0xff]  }
 0x35d   : > { %3210 = vmatprep.mubr.bf16.mxu0 %v8753_v56  ;;  %6702 = vmatpush3.bf16.msra.mxu0 %v7430_v42  ;;  %v7481_v42 = vld [vmem:[%s8456_s11 + $0x160] sm:$0xff]  }
 0x35e   : > { %6703 = vmatprep.subr.bf16.mxu0 %v7433_v45  ;;  %v7483_v45 = vld [vmem:[%s8456_s11 + $0x1d8] sm:$0xff]  }
 0x35f   : > { %6732 = vmatpush3.bf16.msra.mxu1 %v7432_v30  ;;  %v7482_v30 = vld [vmem:[%s8456_s11 + $0x120] sm:$0xff]  }
 0x360   : > { %6733 = vmatprep.subr.bf16.mxu1 %v7435_v32  ;;  %v7484_v32 = vld [vmem:[%s8456_s11 + $0x198] sm:$0xff]  }
 0x361   : > { %6704 = vmatpush3.bf16.msra.mxu0 %v7434_v41  ;;  %v7485_v41 = vld [vmem:[%s8456_s11 + $0x158] sm:$0xff]  }
 0x362   : > { %3260 = vmatmul.mubr.bf16.gmra.mxu1 %v8782_v6  ;;  %6705 = vmatprep.subr.bf16.mxu0 %v7437_v0  ;;  %v7486_v0 = vld [vmem:[%s8456_s11 + $0x118] sm:$0xff]  }
 0x363   : > { %6734 = vmatpush3.bf16.msra.mxu1 %v7436_v24  ;;  %3349 = vmatprep.mubr.bf16.mxu1 %v8753_v56  ;;  %v7447_v56 = vld [vmem:[%s8446_s22 + $0x410] sm:$0xff]  }
 0x364   : > { %3211 = vmatmul.mubr.bf16.gmra.mxu0 %v2722_v38  ;;  %6735 = vmatprep.subr.bf16.mxu1 %v7439_v53  ;;  %v7487_v24 = vld [vmem:[%s8456_s11 + $0x1d0] sm:$0xff]  }
 0x365   : > { %6706 = vmatpush3.bf16.msra.mxu0 %v7438_v29  ;;  %3300 = vmatprep.mubr.bf16.mxu0 %v9489_v34  ;;  %v7488_v53 = vld [vmem:[%s8456_s11 + $0x190] sm:$0xff]   ;;  %v7494_v34 = vld [vmem:[%s8456_s11 + $0x108] sm:$0xff]  }
 0x366   : > { %6707 = vmatprep.subr.bf16.mxu0 %v7441_v15  ;;  %v7489_v29 = vld [vmem:[%s8456_s11 + $0x150] sm:$0xff]   ;;  %v7491_v15 = vld [vmem:[%s8456_s11 + $0x1c8] sm:$0xff]  }
 0x367   : > { %6736 = vmatpush3.bf16.msra.mxu1 %v7440_v28  ;;  %v7492_v28 = vld [vmem:[%s8456_s11 + $0x188] sm:$0xff]  }
 0x368   : > { %6737 = vmatprep.subr.bf16.mxu1 %v7443_v23  ;;  %v7493_v23 = vld [vmem:[%s8456_s11 + $0x148] sm:$0xff]  }
 0x369   : > { %6708 = vmatpush3.bf16.msra.mxu0 %v7442_v57  ;;  %v7495_v57 = vld [vmem:[%s8456_s11 + $0x1c0] sm:$0xff]  }
 0x36a   : > { %6709 = vmatprep.subr.bf16.mxu0 %v7445_v43  ;;  %v7497_v43 = vld [vmem:[%s8456_s11 + $0x140] sm:$0xff]  }
 0x36b   : > { %6738 = vmatpush3.bf16.msra.mxu1 %v7444_v50  ;;  %v7496_v50 = vld [vmem:[%s8456_s11 + $0x180] sm:$0xff]  }
 0x36c   : > { %6739 = vmatprep.subr.bf16.mxu1 %v7447_v56  ;;  %v7499_v56 = vld [vmem:[%s8446_s22 + $0x578] sm:$0xff]  }
 0x36d   : > { %6710 = vmatpush3.bf16.msra.mxu0 %v7446_v33  ;;  %v7498_v33 = vld [vmem:[%s8456_s11 + $0x100] sm:$0xff]  }
 0x36e   : > { %6711 = vmatprep.subr.bf16.mxu0 %v7449_v12  ;;  %v7501_v12 = vld [vmem:[%s8446_s22 + $0x4f8] sm:$0xff]  }
 0x36f   : > { %6740 = vmatpush3.bf16.msra.mxu1 %v7448_v37 }
 0x370   : > { %6741 = vmatprep.subr.bf16.mxu1 %v7451_v46 }
 0x371   : > { %6712 = vmatpush3.bf16.msra.mxu0 %v7450_v8 }
 0x372   : > { %6713 = vmatprep.subr.bf16.mxu0 %v7453_v35 }
 0x373   : > { %6742 = vmatpush3.bf16.msra.mxu1 %v7452_v31  ;;  %v5765_v31 = vld [vmem:[%s8459_s20] ss:$0 sm:$0xff] }
 0x374   : > { %6743 = vmatprep.subr.bf16.mxu1 %v7455_v4 }
 0x375   : > { %6714 = vmatpush3.bf16.msra.mxu0 %v7454_v14 }
 0x376   : > { %6715 = vmatprep.subr.bf16.mxu0 %v7457_v61 }
 0x377   : > { %6744 = vmatpush3.bf16.msra.mxu1 %v7456_v7 }
 0x378   : > { %6767 = vmatprep.subr.bf16.mxu1 %v7469_v51 }
 0x379   : > { %6716 = vmatpush3.bf16.msra.mxu0 %v7458_v20 }
 0x37a   : > { %3350 = vmatmul.mubr.bf16.vlgmr.msra.gmra.mxu1 %v2722_v38  ;;  %7069 = vmatprep.subr.bf16.mxu0 %v7459_v11  ;;  %v7490_v38 = vld [vmem:[%s8456_s11 + $0x110] sm:$0xff]  }
 0x37b   : > { %3357 = vmatprep.mubr.bf16.mxu1 %v9490_v47  ;;  %6768 = vmatpush3.bf16.msra.mxu1 %v7470_v40 }
 0x37c   : > { %3301 = vmatmul.mubr.bf16.vlgmr.msra.gmra.mxu0 %v9491_v55  ;;  %6769 = vmatprep.subr.bf16.mxu1 %v7473_v13 }
 0x37d   : > { %3308 = vmatprep.mubr.bf16.mxu0 %v9492_v26  ;;  %7070 = vmatpush3.bf16.msra.mxu0 %v7459_v11 }
 0x37e   : > { %7071 = vmatprep.subr.bf16.mxu0 %v7460_v19 }
 0x381   : > { %7072 = vmatpush3.bf16.msra.mxu0 %v7460_v19 }
 0x382   : > { %3358 = vmatmul.mubr.bf16.gmra.mxu1 %v2728_v49  ;;  %7073 = vmatprep.subr.bf16.mxu0 %v7461_v22 }
 0x384   : > { %3309 = vmatmul.mubr.bf16.gmra.mxu0 %v9493_v3 }
 0x385   : > { %7074 = vmatpush3.bf16.msra.mxu0 %v7461_v22  ;;  %7085 = vmatprep.mubr.bf16.mxu0 %v8782_v6  ;;  %v9494_v6 = vpack.c.bf16 %v8948_v54, %v8951_v59  ;;  %v7475_v54 = vld [vmem:[%s8456_s11 + $0x1e8] sm:$0xff]   ;;  %v7474_v59 = vld [vmem:[%s8456_s11 + $0x130] sm:$0xff]  }
 0x386   : > { %7075 = vmatprep.subr.bf16.mxu0 %v7462_v27  ;;  %6770 = vmatpush3.bf16.msra.mxu1 %v7474_v59 }
 0x387   : > { %6771 = vmatprep.subr.bf16.mxu1 %v7477_v39 }
 0x389   : > { %7076 = vmatpush3.bf16.msra.mxu0 %v7462_v27 }
 0x38a   : > { %7077 = vmatprep.subr.bf16.mxu0 %v7463_v5  ;;  %6772 = vmatpush3.bf16.msra.mxu1 %v7478_v16 }
 0x38b   : > { %6773 = vmatprep.subr.bf16.mxu1 %v7481_v42 }
 0x38d   : > { %7078 = vmatpush3.bf16.msra.mxu0 %v7463_v5 }
 0x38e   : > { %7079 = vmatprep.subr.bf16.mxu0 %v7464_v10  ;;  %6774 = vmatpush3.bf16.msra.mxu1 %v7482_v30 }
 0x38f   : > { %6775 = vmatprep.subr.bf16.mxu1 %v7485_v41  ;;  %v5942_v41 = vld [vmem:[%s8449_s24 + $0x1] ss:$0 sm:$0xff] }
 0x391   : > { %7080 = vmatpush3.bf16.msra.mxu0 %v7464_v10 }
 0x392   : > { %7081 = vmatprep.subr.bf16.mxu0 %v7465_v25  ;;  %6776 = vmatpush3.bf16.msra.mxu1 %v7486_v0 }
 0x393   : > { %6777 = vmatprep.subr.bf16.mxu1 %v7489_v29 }
 0x395   : > { %7082 = vmatpush3.bf16.msra.mxu0 %v7465_v25 }
 0x396   : > { %7083 = vmatprep.subr.bf16.mxu0 %v7466_v62  ;;  %6778 = vmatpush3.bf16.msra.mxu1 %v7490_v38 }
 0x397   : > { %6779 = vmatprep.subr.bf16.mxu1 %v7493_v23 }
 0x399   : > { %7084 = vmatpush3.bf16.msra.mxu0 %v7466_v62 }
 0x39a   : > { %6789 = vmatprep.subr.bf16.mxu0 %v7467_v9  ;;  %6780 = vmatpush3.bf16.msra.mxu1 %v7494_v34 }
 0x39b   : > { %6781 = vmatprep.subr.bf16.mxu1 %v7497_v43 }
 0x39c   : > { %7086 = vmatmul.mubr.bf16.vlgmr.msra.gmra.mxu0 %v9494_v6 }
 0x39d   : > { %6790 = vmatpush3.bf16.msra.mxu0 %v7468_v44 }
 0x39e   : > { %6791 = vmatprep.subr.bf16.mxu0 %v7471_v58  ;;  %6782 = vmatpush3.bf16.msra.mxu1 %v7498_v33 }
 0x39f   : > { %6811 = vmatprep.subr.bf16.mxu1 %v7501_v12 }
 0x3a1   : > { %6792 = vmatpush3.bf16.msra.mxu0 %v7472_v36 }
 0x3a2   : > { %6793 = vmatprep.subr.bf16.mxu0 %v7475_v54 }
 0x3a5   : > { %6794 = vmatpush3.bf16.msra.mxu0 %v7476_v18 }
 0x3a6   : > { %6795 = vmatprep.subr.bf16.mxu0 %v7479_v1 }
 0x3a9   : > { %6796 = vmatpush3.bf16.msra.mxu0 %v7480_v48 }
 0x3aa   : > { %6797 = vmatprep.subr.bf16.mxu0 %v7483_v45 }
 0x3ad   : > { %6798 = vmatpush3.bf16.msra.mxu0 %v7484_v32 }
 0x3ae   : > { %6799 = vmatprep.subr.bf16.mxu0 %v7487_v24 }
 0x3b1   : > { %6800 = vmatpush3.bf16.msra.mxu0 %v7488_v53 }
 0x3b2   : > { %6801 = vmatprep.subr.bf16.mxu0 %v7491_v15 }
 0x3b5   : > { %6802 = vmatpush3.bf16.msra.mxu0 %v7492_v28 }
 0x3b6   : > { %6803 = vmatprep.subr.bf16.mxu0 %v7495_v57 }
 0x3b9   : > { %6804 = vmatpush3.bf16.msra.mxu0 %v7496_v50 }
 0x3ba   : > { %6839 = vmatprep.subr.bf16.mxu0 %v7499_v56 }
 0x3fa   : > { %v6639_v37 = vpop.f32.mrf.mxu1 }
 0x3fc   : > { %v6617_v46 = vpop.f32.mrf.mxu0  ;;  %v6640_v8 = vpop.f32.mrf.mxu1 }
 0x3fd   : > { %v6641_v35 = vadd.f32 %v6640_v8, %v6639_v37 }
 0x3fe   : > { %v6618_v4 = vpop.f32.mrf.mxu0  ;;  %v6642_v14 = vpop.f32.mrf.mxu1 }
 0x3ff   : > { %v6619_v61 = vadd.f32 %v6618_v4, %v6617_v46 }
 0x400   : > { %v6620_v7 = vpop.f32.mrf.mxu0  ;;  %v6643_v20 = vpop.f32.mrf.mxu1 }
 0x401   : > { %v2510_v11 = vadd.f32 %v6619_v61, %v5765_v31 }
 0x402   : > { %v6621_v19 = vpop.f32.mrf.mxu0 }
 0x403   : > { %v9184_v47 = vadd.f32 %v6641_v35, %v2510_v11 }
 0x405   : > { %vm2555_vm13 = vcmp.gt.f32.partialorder %v9184_v47, 0.0 }
 0x41a   : > { %v6689_v26 = vpop.f32.mrf.mxu1 }
 0x41c   : > { %v6661_v55 = vpop.f32.mrf.mxu0  ;;  %v6690_v49 = vpop.f32.mrf.mxu1 }
 0x41d   : > { %v6691_v29 = vadd.f32 %v6690_v49, %v6689_v26 }
 0x41e   : > { %v6662_v22 = vpop.f32.mrf.mxu0  ;;  %v6692_v3 = vpop.f32.mrf.mxu1 }
 0x41f   : > { %v6663_v30 = vadd.f32 %v6662_v22, %v6661_v55 }
 0x420   : > { %v6664_v27 = vpop.f32.mrf.mxu0  ;;  %v6693_v10 = vpop.f32.mrf.mxu1 }
 0x421   : > { %v3205_v38 = vadd.f32 %v6663_v30, %v5942_v41  ;;  %v6694_v33 = vadd.f32 %v6693_v10, %v6692_v3 }
 0x422   : > { %v6665_v5 = vpop.f32.mrf.mxu0  ;;  %v6695_v62 = vpop.f32.mrf.mxu1 }
 0x423   : > { %v6666_v28 = vadd.f32 %v6665_v5, %v6664_v27  ;;  %v3254_v12 = vadd.f32 %v6691_v29, %v3205_v38  ;;  %v7504_v29 = vld [vmem:[%s8446_s22 + $0x530] sm:$0xff]   ;;  %v7507_v38 = vld [vmem:[%s8446_s22 + $0x568] sm:$0xff]  }
 0x424   : > { %v6667_v25 = vpop.f32.mrf.mxu0  ;;  %v6696_v9 = vpop.f32.mrf.mxu1 }
 0x425   : > { %v6697_v23 = vadd.f32 %v6696_v9, %v6695_v62  ;;  %v3208_v46 = vadd.f32 %v6666_v28, %v5942_v41  ;;  %v7509_v28 = vld [vmem:[%s8446_s22 + $0x4e8] sm:$0xff]  }
 0x426   : > { %v6668_v6 = vpop.f32.mrf.mxu0  ;;  %v6698_v51 = vpop.f32.mrf.mxu1 }
 0x427   : > { %v6669_v45 = vadd.f32 %v6668_v6, %v6667_v25  ;;  %v3257_v19 = vadd.f32 %v6694_v33, %v3208_v46  ;;  %v7514_v33 = vld [vmem:[%s8446_s22 + $0x4a0] sm:$0xff]   ;;  %v7519_v46 = vld [vmem:[%s8446_s22 + $0x550] sm:$0xff]  }
 0x428   : > { %v6670_v44 = vpop.f32.mrf.mxu0  ;;  %v6699_v58 = vpop.f32.mrf.mxu1 }
 0x429   : > { %v3213_v24 = vadd.f32 %v6669_v45, %v5942_v41  ;;  %v6700_v8 = vadd.f32 %v6699_v58, %v6698_v51 }
 0x42a   : > { %v6671_v40 = vpop.f32.mrf.mxu0 }
 0x42b   : > { %v6672_v53 = vadd.f32 %v6671_v40, %v6670_v44  ;;  %v3262_v56 = vadd.f32 %v6697_v23, %v3213_v24  ;;  %v3939_v24 = vpack.c.bf16 %v8885_v17, %v9487_v63  ;;  %v7508_v23 = vld [vmem:[%s8446_s22 + $0x528] sm:$0xff]  }
 0x42d   : > { %v3216_v43 = vadd.f32 %v6672_v53, %v5942_v41  ;;  %v7503_v41 = vld [vmem:[%s8446_s22 + $0x570] sm:$0xff]  }
 0x42e   : > { %v7505_v53 = vld [vmem:[%s8446_s22 + $0x4f0] sm:$0xff]  }
 0x42f   : > { %v3265_v7 = vadd.f32 %v6700_v8, %v3216_v43  ;;  %v7513_v43 = vld [vmem:[%s8446_s22 + $0x4e0] sm:$0xff]   ;;  %v7518_v8 = vld [vmem:[%s8446_s22 + $0x498] sm:$0xff]  }
 0x43a   : > { %v6745_v13 = vpop.f32.mrf.mxu1 }
 0x43c   : > { %v6717_v36 = vpop.f32.mrf.mxu0  ;;  %v6746_v18 = vpop.f32.mrf.mxu1 }
 0x43d   : > { %v6747_v11 = vadd.f32 %v6746_v18, %v6745_v13 }
 0x43e   : > { %v6718_v54 = vpop.f32.mrf.mxu0  ;;  %v6748_v1 = vpop.f32.mrf.mxu1 }
 0x43f   : > { %v6719_v50 = vadd.f32 %v6718_v54, %v6717_v36 }
 0x440   : > { %v6720_v59 = vpop.f32.mrf.mxu0  ;;  %v6749_v48 = vpop.f32.mrf.mxu1 }
 0x441   : > { %v3303_v4 = vadd.f32 %v6719_v50, %v3254_v12  ;;  %v6750_v25 = vadd.f32 %v6749_v48, %v6748_v1  ;;  %v7500_v48 = vld [vmem:[%s8446_s22 + $0x538] sm:$0xff]   ;;  %v7512_v50 = vld [vmem:[%s8446_s22 + $0x520] sm:$0xff]  }
 0x442   : > { %v6721_v39 = vpop.f32.mrf.mxu0  ;;  %v6751_v32 = vpop.f32.mrf.mxu1  ;;  %v7517_v12 = vld [vmem:[%s8446_s22 + $0x4d8] sm:$0xff]  }
 0x443   : > { %v6722_v14 = vadd.f32 %v6721_v39, %v6720_v59  ;;  %v3352_v3 = vadd.f32 %v6747_v11, %v3303_v4  ;;  %v7523_v4 = vld [vmem:[%s8446_s22 + $0x548] sm:$0xff]  }
 0x444   : > { %v6723_v16 = vpop.f32.mrf.mxu0  ;;  %v6752_v15 = vpop.f32.mrf.mxu1  ;;  %v7526_v11 = vld [vmem:[%s8446_s22 + $0x488] sm:$0xff]  }
 0x445   : > { %v6753_v61 = vadd.f32 %v6752_v15, %v6751_v32  ;;  %v3306_v49 = vadd.f32 %v6722_v14, %v3257_v19  ;;  %v7502_v32 = vld [vmem:[%s8446_s22 + $0x4b8] sm:$0xff]   ;;  %v7506_v15 = vld [vmem:[%s8446_s22 + $0x4b0] sm:$0xff]   ;;  %v7529_v19 = vld [vmem:[%s8446_s22 + $0x4c0] sm:$0xff]  }
 0x446   : > { %v6724_v42 = vpop.f32.mrf.mxu0  ;;  %v6754_v37 = vpop.f32.mrf.mxu1  ;;  %v7522_v14 = vld [vmem:[%s8446_s22 + $0x490] sm:$0xff]  }
 0x447   : > { %v6725_v34 = vadd.f32 %v6724_v42, %v6723_v16  ;;  %v3355_v40 = vadd.f32 %v6750_v25, %v3306_v49  ;;  %v7533_v49 = vld [vmem:[%s8446_s22 + $0x5f8] sm:$0xff]   ;;  %v7537_v25 = vld [vmem:[%s8446_s22 + $0x5f0] sm:$0xff]  }
 0x448   : > { %v6726_v0 = vpop.f32.mrf.mxu0  ;;  %v6755_v20 = vpop.f32.mrf.mxu1 }
 0x449   : > { %v3311_v35 = vadd.f32 %v6725_v34, %v3262_v56  ;;  %v6756_v27 = vadd.f32 %v6755_v20, %v6754_v37  ;;  %v7511_v34 = vld [vmem:[%s8446_s22 + $0x560] sm:$0xff]   ;;  %v7515_v56 = vld [vmem:[%s8446_s22 + $0x558] sm:$0xff]  }
 0x44a   : > { %v6727_v57 = vpop.f32.mrf.mxu0  ;;  %v7516_v37 = vld [vmem:[%s8446_s22 + $0x518] sm:$0xff]   ;;  %v7527_v20 = vld [vmem:[%s8446_s22 + $0x540] sm:$0xff]  }
 0x44b   : > { %v6728_v31 = vadd.f32 %v6727_v57, %v6726_v0  ;;  %v3360_v26 = vadd.f32 %v6753_v61, %v3311_v35  ;;  %v7510_v57 = vld [vmem:[%s8446_s22 + $0x4a8] sm:$0xff]   ;;  %v7521_v35 = vld [vmem:[%s8446_s22 + $0x4d0] sm:$0xff]  }
 0x44c   : > { %v7525_v61 = vld [vmem:[%s8446_s22 + $0x4c8] sm:$0xff]  }
 0x44d   : > { %v3314_v55 = vadd.f32 %v6728_v31, %v3265_v7  ;;  %v7520_v31 = vld [vmem:[%s8446_s22 + $0x510] sm:$0xff]   ;;  %v7524_v7 = vld [vmem:[%s8446_s22 + $0x508] sm:$0xff]  }
 0x44f   : > { %v3363_v6 = vadd.f32 %v6756_v27, %v3314_v55  ;;  %v7528_v55 = vld [vmem:[%s8446_s22 + $0x500] sm:$0xff]   ;;  %v7532_v27 = vld [vmem:[%s8446_s22 + $0x638] sm:$0xff]  }
 0x45c   : > { %v7087_v22 = vpop.f32.mrf.mxu0 }
 0x45d   : > { %v3409_v5 = vadd.f32 %v7087_v22, %v3360_v26  ;;  %v7531_v26 = vld [vmem:[%s8446_s22 + $0x678] sm:$0xff]   ;;  %v7530_v22 = vld [vmem:[%s8446_s22 + $0x480] sm:$0xff]  }
 0x45e   : > { %v3400_v10 = vpop.f32.mrf.mxu0 }
 0x45f   : > { %v3401_v62 = vadd.f32 %v3400_v10, %v3352_v3  ;;  %v3421_v9 = vmul.f32 0.01, %v3409_v5  ;;  %vm3417_vm4 = vcmp.gt.f32.partialorder %v3409_v5, 0.0  ;;  %v3945_v3 = vpack.c.bf16 %v8959_v21, %v9487_v63  ;;  %v7534_v10 = vld [vmem:[%s8446_s22 + $0x5b8] sm:$0xff]  }
 0x460   : > { %v7088_v44 = vpop.f32.mrf.mxu0 }
 0x461   : > { %v3412_v51 = vadd.f32 %v7088_v44, %v3363_v6  ;;  %v3419_v58 = vmul.f32 0.01, %v3401_v62  ;;  %vm3415_vm5 = vcmp.gt.f32.partialorder %v3401_v62, 0.0  ;;  %v3425_v59 = vsel %vm3417_vm4, %v3409_v5, %v3421_v9  ;;  %v7535_v5 = vld [vmem:[%s8446_s22 + $0x670] sm:$0xff]   ;;  %v7539_v6 = vld [vmem:[%s8446_s22 + $0x668] sm:$0xff]  }
 0x462   : > { %v3403_v36 = vpop.f32.mrf.mxu0  ;;  %v3494_v42 = vpack.c.bf16 %v3425_v59, %v3425_v59  ;;  %v7538_v9 = vld [vmem:[%s8446_s22 + $0x5b0] sm:$0xff]   ;;  %v7541_v44 = vld [vmem:[%s8446_s22 + $0x5e8] sm:$0xff]   ;;  %v7547_v59 = vld [vmem:[%s8446_s22 + $0x658] sm:$0xff]  }
 0x463   : > { %vm3418_vm6 = vcmp.gt.f32.partialorder %v3412_v51, 0.0  ;;  %v3422_v13 = vmul.f32 0.01, %v3412_v51  ;;  %v3404_v54 = vadd.f32 %v3403_v36, %v3355_v40  ;;  %v3423_v1 = vsel %vm3415_vm5, %v3401_v62, %v3419_v58  ;;  %v7536_v62 = vld [vmem:[%s8446_s22 + $0x630] sm:$0xff]   ;;  %v7543_v40 = vld [vmem:[%s8446_s22 + $0x660] sm:$0xff]   ;;  %v7542_v58 = vld [vmem:[%s8446_s22 + $0x5a8] sm:$0xff]  }
 0x464   : > { %v3492_v0 = vpack.c.bf16 %v3423_v1, %v3423_v1  ;;  %v7546_v1 = vld [vmem:[%s8446_s22 + $0x5a0] sm:$0xff]  }
 0x465   : > { %vm3416_vm7 = vcmp.gt.f32.partialorder %v3404_v54, 0.0  ;;  %v3420_v18 = vmul.f32 0.01, %v3404_v54  ;;  %v3426_v39 = vsel %vm3418_vm6, %v3412_v51, %v3422_v13  ;;  %v7540_v51 = vld [vmem:[%s8446_s22 + $0x628] sm:$0xff]   ;;  %v7545_v13 = vld [vmem:[%s8446_s22 + $0x5e0] sm:$0xff]  }
 0x466   : > { %v3495_v16 = vpack.c.bf16 %v3426_v39, %v3426_v39 }
 0x467   : > { %v3424_v45 = vsel %vm3416_vm7, %v3404_v54, %v3420_v18  ;;  %v7544_v54 = vld [vmem:[%s8446_s22 + $0x620] sm:$0xff]  }
 0x468   : > { %3767 = vmatprep.mubr.bf16.mxu0 %v3495_v16  ;;  %v3493_v30 = vpack.c.bf16 %v3424_v45, %v3424_v45  ;;  %v9496_v18 = vld [vmem:[#allocation31_spill] sm:$0xff]  ;;  %v7549_v16 = vld [vmem:[%s8446_s22 + $0x5d8] sm:$0xff]   ;;  %v7553_v45 = vld [vmem:[%s8446_s22 + $0x5d0] sm:$0xff]  }
 0x469   : > { %3768 = vmatmul.mubr.bf16.vlgmr.msra.gmra.mxu0 %v3494_v42  ;;  %v9497_v39 = vpack.c.bf16 %v9496_v18, %v8885_v17  ;;  %v7550_v42 = vld [vmem:[%s8446_s22 + $0x598] sm:$0xff]   ;;  %v7552_v17 = vld [vmem:[%s8446_s22 + $0x610] sm:$0xff]  }
 0x46a   : > { %6840 = vmatpush3.bf16.msra.mxu0 %v7500_v48  ;;  %3727 = vmatprep.mubr.bf16.mxu1 %v3493_v30  ;;  %v7548_v48 = vld [vmem:[%s8446_s22 + $0x618] sm:$0xff]   ;;  %v7555_v30 = vld [vmem:[%s8446_s22 + $0x648] sm:$0xff]  }
 0x46b   : > { %4471 = vmatprep.mubr.bf16.mxu0 %v3939_v24  ;;  %3728 = vmatmul.mubr.bf16.vlgmr.msra.gmra.mxu1 %v3492_v0  ;;  %v7556_v0 = vld [vmem:[%s8446_s22 + $0x608] sm:$0xff]   ;;  %v7559_v24 = vld [vmem:[%s8446_s22 + $0x640] sm:$0xff]   ;;  %v7592_v18 = vld [vmem:[%s8456_s11 + $0x250] sm:$0xff]  }
 0x46c   : > { %6812 = vmatpush3.bf16.msra.mxu1 %v7502_v32  ;;  %6841 = vmatprep.subr.bf16.mxu0 %v7503_v41  ;;  %v7554_v32 = vld [vmem:[%s8446_s22 + $0x590] sm:$0xff]   ;;  %v7557_v41 = vld [vmem:[%s8446_s22 + $0x5c8] sm:$0xff]  }
 0x46d   : > { %6813 = vmatprep.subr.bf16.mxu1 %v7505_v53  ;;  %4422 = vmatprep.mubr.bf16.mxu1 %v9488_v60  ;;  %v7558_v53 = vld [vmem:[%s8446_s22 + $0x588] sm:$0xff]  }
 0x46e   : > { %6842 = vmatpush3.bf16.msra.mxu0 %v7504_v29  ;;  %v7561_v29 = vld [vmem:[%s8446_s22 + $0x5c0] sm:$0xff]  }
 0x46f   : > { %6843 = vmatprep.subr.bf16.mxu0 %v7507_v38  ;;  %v7560_v38 = vld [vmem:[%s8446_s22 + $0x600] sm:$0xff]  }
 0x470   : > { %6814 = vmatpush3.bf16.msra.mxu1 %v7506_v15  ;;  %v7562_v15 = vld [vmem:[%s8446_s22 + $0x580] sm:$0xff]  }
 0x471   : > { %6815 = vmatprep.subr.bf16.mxu1 %v7509_v28  ;;  %v7563_v28 = vld [vmem:[%s8446_s22 + $0x6b8] sm:$0xff]  }
 0x472   : > { %6844 = vmatpush3.bf16.msra.mxu0 %v7508_v23  ;;  %v7564_v23 = vld [vmem:[%s8446_s22 + $0x6b0] sm:$0xff]  }
 0x473   : > { %6845 = vmatprep.subr.bf16.mxu0 %v7511_v34  ;;  %v9498_v34 = vld [vmem:[#allocation38_spill] sm:$0xff] }
 0x474   : > { %6816 = vmatpush3.bf16.msra.mxu1 %v7510_v57  ;;  %v9499_v57 = vld [vmem:[#allocation37_spill] sm:$0xff] }
 0x475   : > { %6817 = vmatprep.subr.bf16.mxu1 %v7513_v43  ;;  %v9500_v43 = vpack.c.bf16 %v9498_v34, %v9499_v57 }
 0x476   : > { %6846 = vmatpush3.bf16.msra.mxu0 %v7512_v50  ;;  %v9501_v50 = vld [vmem:[#allocation29_spill] sm:$0xff] }
 0x477   : > { %6847 = vmatprep.subr.bf16.mxu0 %v7515_v56  ;;  %v9502_v56 = vld [vmem:[#allocation30_spill] sm:$0xff] }
 0x478   : > { %6818 = vmatpush3.bf16.msra.mxu1 %v7514_v33  ;;  %v9503_v33 = vpack.c.bf16 %v9501_v50, %v9502_v56 }
 0x479   : > { %6819 = vmatprep.subr.bf16.mxu1 %v7517_v12  ;;  %v9504_v12 = vld [vmem:[#allocation33_spill] sm:$0xff] }
 0x47a   : > { %6848 = vmatpush3.bf16.msra.mxu0 %v7516_v37  ;;  %v9505_v37 = vpack.c.bf16 %v9504_v12, %v8959_v21  ;;  %v7567_v21 = vld [vmem:[%s8446_s22 + $0x698] sm:$0xff]  }
 0x47b   : > { %6849 = vmatprep.subr.bf16.mxu0 %v7519_v46  ;;  %v7565_v46 = vld [vmem:[%s8446_s22 + $0x6a8] sm:$0xff]  }
 0x47c   : > { %6820 = vmatpush3.bf16.msra.mxu1 %v7518_v8  ;;  %v9506_v8 = vld [vmem:[#allocation39_spill] sm:$0xff] }
 0x47d   : > { %6821 = vmatprep.subr.bf16.mxu1 %v7521_v35  ;;  %v3948_v35 = vpack.c.bf16 %v9506_v8, %v9487_v63 }
 0x47e   : > { %6850 = vmatpush3.bf16.msra.mxu0 %v7520_v31  ;;  %v7566_v31 = vld [vmem:[%s8446_s22 + $0x6a0] sm:$0xff]  }
 0x47f   : > { %6851 = vmatprep.subr.bf16.mxu0 %v7523_v4  ;;  %v9507_v4 = vld [vmem:[#allocation35_spill] sm:$0xff] }
 0x480   : > { %6822 = vmatpush3.bf16.msra.mxu1 %v7522_v14  ;;  %v9508_v14 = vld [vmem:[#allocation34_spill] sm:$0xff] }
 0x481   : > { %6823 = vmatprep.subr.bf16.mxu1 %v7525_v61  ;;  %v9509_v61 = vpack.c.bf16 %v9507_v4, %v9508_v14 }
 0x482   : > { %6852 = vmatpush3.bf16.msra.mxu0 %v7524_v7  ;;  %v7568_v7 = vld [vmem:[%s8446_s22 + $0x690] sm:$0xff]  }
 0x483   : > { %6853 = vmatprep.subr.bf16.mxu0 %v7527_v20  ;;  %v7569_v20 = vld [vmem:[%s8446_s22 + $0x688] sm:$0xff]  }
 0x484   : > { %6824 = vmatpush3.bf16.msra.mxu1 %v7526_v11  ;;  %v7570_v11 = vld [vmem:[%s8446_s22 + $0x680] sm:$0xff]  }
 0x485   : > { %6825 = vmatprep.subr.bf16.mxu1 %v7529_v19 }
 0x486   : > { %6854 = vmatpush3.bf16.msra.mxu0 %v7528_v55  ;;  %v7571_v55 = vld [vmem:[%s8456_s11 + $0x2f8] sm:$0xff]  }
 0x487   : > { %6895 = vmatprep.subr.bf16.mxu0 %v7531_v26  ;;  %v7572_v26 = vld [vmem:[%s8456_s11 + $0x278] sm:$0xff]  }
 0x488   : > { %6826 = vmatpush3.bf16.msra.mxu1 %v7530_v22  ;;  %v7573_v22 = vld [vmem:[%s8456_s11 + $0x2b8] sm:$0xff]  }
 0x489   : > { %4472 = vmatmul.mubr.bf16.vlgmr.msra.gmra.mxu0 %v9488_v60  ;;  %6867 = vmatprep.subr.bf16.mxu1 %v7533_v49  ;;  %v7574_v49 = vld [vmem:[%s8456_s11 + $0x238] sm:$0xff]  }
 0x48a   : > { %4479 = vmatprep.mubr.bf16.mxu0 %v3945_v3  ;;  %6896 = vmatpush3.bf16.msra.mxu0 %v7532_v27  ;;  %v7575_v27 = vld [vmem:[%s8456_s11 + $0x2f0] sm:$0xff]  }
 0x48b   : > { %4423 = vmatmul.mubr.bf16.vlgmr.msra.gmra.mxu1 %v9488_v60  ;;  %6897 = vmatprep.subr.bf16.mxu0 %v7535_v5  ;;  %v9495_v60 = vld [vmem:[#allocation32_spill] sm:$0xff]  ;;  %v7576_v5 = vld [vmem:[%s8456_s11 + $0x270] sm:$0xff]  }
 0x48c   : > { %4430 = vmatprep.mubr.bf16.mxu1 %v8927_v52  ;;  %6868 = vmatpush3.bf16.msra.mxu1 %v7534_v10  ;;  %v3942_v36 = vpack.c.bf16 %v9495_v60, %v9487_v63  ;;  %v7577_v3 = vld [vmem:[%s8456_s11 + $0x2b0] sm:$0xff]   ;;  %v7587_v60 = vld [vmem:[%s8456_s11 + $0x2d8] sm:$0xff]  }
 0x48d   : > { %6869 = vmatprep.subr.bf16.mxu1 %v7537_v25  ;;  %v7578_v10 = vld [vmem:[%s8456_s11 + $0x230] sm:$0xff]   ;;  %v7579_v25 = vld [vmem:[%s8456_s11 + $0x2e8] sm:$0xff]  }
 0x48e   : > { %6898 = vmatpush3.bf16.msra.mxu0 %v7536_v62  ;;  %v7580_v62 = vld [vmem:[%s8456_s11 + $0x268] sm:$0xff]  }
 0x48f   : > { %6899 = vmatprep.subr.bf16.mxu0 %v7539_v6  ;;  %v7581_v6 = vld [vmem:[%s8456_s11 + $0x2a8] sm:$0xff]  }
 0x490   : > { %6870 = vmatpush3.bf16.msra.mxu1 %v7538_v9  ;;  %v7582_v9 = vld [vmem:[%s8456_s11 + $0x228] sm:$0xff]  }
 0x491   : > { %4480 = vmatmul.mubr.bf16.gmra.mxu0 %v8942_v2  ;;  %6871 = vmatprep.subr.bf16.mxu1 %v7541_v44  ;;  %v7583_v44 = vld [vmem:[%s8456_s11 + $0x2e0] sm:$0xff]  }
 0x492   : > { %6900 = vmatpush3.bf16.msra.mxu0 %v7540_v51  ;;  %4569 = vmatprep.mubr.bf16.mxu0 %v8927_v52  ;;  %v7551_v52 = vld [vmem:[%s8446_s22 + $0x650] sm:$0xff]   ;;  %v7584_v51 = vld [vmem:[%s8456_s11 + $0x260] sm:$0xff]  }
 0x493   : > { %4431 = vmatmul.mubr.bf16.gmra.mxu1 %v3942_v36  ;;  %6901 = vmatprep.subr.bf16.mxu0 %v7543_v40  ;;  %v7585_v40 = vld [vmem:[%s8456_s11 + $0x2a0] sm:$0xff]  }
 0x494   : > { %6872 = vmatpush3.bf16.msra.mxu1 %v7542_v58  ;;  %4520 = vmatprep.mubr.bf16.mxu1 %v9497_v39  ;;  %v7586_v58 = vld [vmem:[%s8456_s11 + $0x220] sm:$0xff]   ;;  %v7593_v39 = vld [vmem:[%s8456_s11 + $0x290] sm:$0xff]  }
 0x495   : > { %6873 = vmatprep.subr.bf16.mxu1 %v7545_v13  ;;  %v7589_v13 = vld [vmem:[%s8456_s11 + $0x298] sm:$0xff]  }
 0x496   : > { %6902 = vmatpush3.bf16.msra.mxu0 %v7544_v54  ;;  %v7590_v54 = vld [vmem:[%s8456_s11 + $0x218] sm:$0xff]  }
 0x497   : > { %6903 = vmatprep.subr.bf16.mxu0 %v7547_v59  ;;  %v7591_v59 = vld [vmem:[%s8456_s11 + $0x2d0] sm:$0xff]  }
 0x498   : > { %6874 = vmatpush3.bf16.msra.mxu1 %v7546_v1  ;;  %v7594_v1 = vld [vmem:[%s8456_s11 + $0x210] sm:$0xff]  }
 0x499   : > { %6875 = vmatprep.subr.bf16.mxu1 %v7549_v16  ;;  %v7595_v16 = vld [vmem:[%s8456_s11 + $0x2c8] sm:$0xff]  }
 0x49a   : > { %6904 = vmatpush3.bf16.msra.mxu0 %v7548_v48  ;;  %v7596_v48 = vld [vmem:[%s8456_s11 + $0x248] sm:$0xff]  }
 0x49b   : > { %6905 = vmatprep.subr.bf16.mxu0 %v7551_v52  ;;  %v7597_v52 = vld [vmem:[%s8456_s11 + $0x288] sm:$0xff]  }
 0x49c   : > { %6876 = vmatpush3.bf16.msra.mxu1 %v7550_v42  ;;  %v7598_v42 = vld [vmem:[%s8456_s11 + $0x208] sm:$0xff]  }
 0x49d   : > { %6877 = vmatprep.subr.bf16.mxu1 %v7553_v45  ;;  %v7599_v45 = vld [vmem:[%s8456_s11 + $0x2c0] sm:$0xff]  }
 0x49e   : > { %6906 = vmatpush3.bf16.msra.mxu0 %v7552_v17  ;;  %v7600_v17 = vld [vmem:[%s8456_s11 + $0x240] sm:$0xff]  }
 0x49f   : > { %6907 = vmatprep.subr.bf16.mxu0 %v7555_v30  ;;  %v7601_v30 = vld [vmem:[%s8456_s11 + $0x280] sm:$0xff]  }
 0x4a0   : > { %6878 = vmatpush3.bf16.msra.mxu1 %v7554_v32  ;;  %v7602_v32 = vld [vmem:[%s8456_s11 + $0x200] sm:$0xff]  }
 0x4a1   : > { %6879 = vmatprep.subr.bf16.mxu1 %v7557_v41  ;;  %v7603_v41 = vld [vmem:[%s8465_s23 + $0x78] sm:$0xff]  }
 0x4a2   : > { %6908 = vmatpush3.bf16.msra.mxu0 %v7556_v0 }
 0x4a3   : > { %6909 = vmatprep.subr.bf16.mxu0 %v7559_v24 }
 0x4a4   : > { %6880 = vmatpush3.bf16.msra.mxu1 %v7558_v53 }
 0x4a5   : > { %6881 = vmatprep.subr.bf16.mxu1 %v7561_v29 }
 0x4a6   : > { %6910 = vmatpush3.bf16.msra.mxu0 %v7560_v38  ;;  %v6079_v38 = vld [vmem:[%s8459_s20 + $0x1] ss:$0 sm:$0xff] }
 0x4a7   : > { %6933 = vmatprep.subr.bf16.mxu0 %v7572_v26 }
 0x4a8   : > { %6882 = vmatpush3.bf16.msra.mxu1 %v7562_v15 }
 0x4a9   : > { %4570 = vmatmul.mubr.bf16.vlgmr.msra.gmra.mxu0 %v3942_v36  ;;  %7089 = vmatprep.subr.bf16.mxu1 %v7563_v28  ;;  %v7588_v36 = vld [vmem:[%s8456_s11 + $0x258] sm:$0xff]  }
 0x4aa   : > { %4577 = vmatprep.mubr.bf16.mxu0 %v9500_v43  ;;  %6934 = vmatpush3.bf16.msra.mxu0 %v7574_v49 }
 0x4ab   : > { %4521 = vmatmul.mubr.bf16.vlgmr.msra.gmra.mxu1 %v9503_v33  ;;  %6935 = vmatprep.subr.bf16.mxu0 %v7576_v5 }
 0x4ac   : > { %4528 = vmatprep.mubr.bf16.mxu1 %v9505_v37  ;;  %7090 = vmatpush3.bf16.msra.mxu1 %v7563_v28 }
 0x4ad   : > { %7091 = vmatprep.subr.bf16.mxu1 %v7564_v23 }
 0x4ae   : > { %6936 = vmatpush3.bf16.msra.mxu0 %v7578_v10 }
 0x4af   : > { %6937 = vmatprep.subr.bf16.mxu0 %v7580_v62 }
 0x4b0   : > { %7092 = vmatpush3.bf16.msra.mxu1 %v7564_v23 }
 0x4b1   : > { %4578 = vmatmul.mubr.bf16.gmra.mxu0 %v3948_v35  ;;  %7093 = vmatprep.subr.bf16.mxu1 %v7565_v46 }
 0x4b2   : > { %6938 = vmatpush3.bf16.msra.mxu0 %v7582_v9 }
 0x4b3   : > { %4529 = vmatmul.mubr.bf16.gmra.mxu1 %v9509_v61  ;;  %6939 = vmatprep.subr.bf16.mxu0 %v7584_v51  ;;  %v6256_v51 = vld [vmem:[%s8449_s24 + $0x2] ss:$0 sm:$0xff]  ;;  %s9512_s24 = sld [smem:[#allocation45_spill]] }
 0x4b4   : > { %7094 = vmatpush3.bf16.msra.mxu1 %v7565_v46  ;;  %7105 = vmatprep.mubr.bf16.mxu1 %v8942_v2  ;;  %v9510_v2 = vld [vmem:[#allocation36_spill] sm:$0xff] }
 0x4b5   : > { %7095 = vmatprep.subr.bf16.mxu1 %v7566_v31  ;;  %v9511_v19 = vpack.c.bf16 %v9510_v2, %v9506_v8 }
 0x4b6   : > { %6940 = vmatpush3.bf16.msra.mxu0 %v7586_v58 }
 0x4b7   : > { %6941 = vmatprep.subr.bf16.mxu0 %v7588_v36 }
 0x4b8   : > { %7096 = vmatpush3.bf16.msra.mxu1 %v7566_v31 }
 0x4b9   : > { %7097 = vmatprep.subr.bf16.mxu1 %v7567_v21  ;;  %s734_s11 = scalar_lea.vmem %s9512_s24, %s5667_s16 }
 0x4ba   : > { %6942 = vmatpush3.bf16.msra.mxu0 %v7590_v54 }
 0x4bb   : > { %6943 = vmatprep.subr.bf16.mxu0 %v7592_v18 }
 0x4bc   : > { %7098 = vmatpush3.bf16.msra.mxu1 %v7567_v21 }
 0x4bd   : > { %7099 = vmatprep.subr.bf16.mxu1 %v7568_v7 }
 0x4be   : > { %6944 = vmatpush3.bf16.msra.mxu0 %v7594_v1 }
 0x4bf   : > { %6945 = vmatprep.subr.bf16.mxu0 %v7596_v48 }
 0x4c0   : > { %7100 = vmatpush3.bf16.msra.mxu1 %v7568_v7 }
 0x4c1   : > { %7101 = vmatprep.subr.bf16.mxu1 %v7569_v20 }
 0x4c2   : > { %6946 = vmatpush3.bf16.msra.mxu0 %v7598_v42 }
 0x4c3   : > { %6947 = vmatprep.subr.bf16.mxu0 %v7600_v17 }
 0x4c4   : > { %7102 = vmatpush3.bf16.msra.mxu1 %v7569_v20 }
 0x4c5   : > { %7103 = vmatprep.subr.bf16.mxu1 %v7570_v11 }
 0x4c6   : > { %6948 = vmatpush3.bf16.msra.mxu0 %v7602_v32 }
 0x4c7   : > { %6977 = vmatprep.subr.bf16.mxu0 %v7603_v41 }
 0x4c8   : > { %7104 = vmatpush3.bf16.msra.mxu1 %v7570_v11 }
 0x4c9   : > { %6955 = vmatprep.subr.bf16.mxu1 %v7571_v55 }
 0x4cb   : > { %7106 = vmatmul.mubr.bf16.vlgmr.msra.gmra.mxu1 %v9511_v19 }
 0x4cc   : > { %6956 = vmatpush3.bf16.msra.mxu1 %v7573_v22 }
 0x4cd   : > { %6957 = vmatprep.subr.bf16.mxu1 %v7575_v27 }
 0x4d0   : > { %6958 = vmatpush3.bf16.msra.mxu1 %v7577_v3 }
 0x4d1   : > { %6959 = vmatprep.subr.bf16.mxu1 %v7579_v25 }
 0x4d4   : > { %6960 = vmatpush3.bf16.msra.mxu1 %v7581_v6 }
 0x4d5   : > { %6961 = vmatprep.subr.bf16.mxu1 %v7583_v44 }
 0x4d8   : > { %6962 = vmatpush3.bf16.msra.mxu1 %v7585_v40 }
 0x4d9   : > { %6963 = vmatprep.subr.bf16.mxu1 %v7587_v60 }
 0x4dc   : > { %6964 = vmatpush3.bf16.msra.mxu1 %v7589_v13 }
 0x4dd   : > { %6965 = vmatprep.subr.bf16.mxu1 %v7591_v59 }
 0x4e0   : > { %6966 = vmatpush3.bf16.msra.mxu1 %v7593_v39 }
 0x4e1   : > { %6967 = vmatprep.subr.bf16.mxu1 %v7595_v16 }
 0x4e4   : > { %6968 = vmatpush3.bf16.msra.mxu1 %v7597_v52 }
 0x4e5   : > { %6969 = vmatprep.subr.bf16.mxu1 %v7599_v45 }
 0x4e8   : > { %6970 = vmatpush3.bf16.msra.mxu1 %v7601_v30 }
 0x4e9   : > { %7109 = vmatprep.subr.bf16.mxu1 %v9487_v63 }
 0x529   : > { %v6805_v0 = vpop.f32.mrf.mxu0 }
 0x52b   : > { %v6783_v24 = vpop.f32.mrf.mxu1  ;;  %v6806_v53 = vpop.f32.mrf.mxu0 }
 0x52c   : > { %v6807_v29 = vadd.f32 %v6806_v53, %v6805_v0 }
 0x52d   : > { %v6784_v15 = vpop.f32.mrf.mxu1  ;;  %v6808_v28 = vpop.f32.mrf.mxu0 }
 0x52e   : > { %v6785_v23 = vadd.f32 %v6784_v15, %v6783_v24 }
 0x52f   : > { %v6786_v34 = vpop.f32.mrf.mxu1  ;;  %v6809_v57 = vpop.f32.mrf.mxu0 }
 0x530   : > { %v3730_v43 = vadd.f32 %v6785_v23, %v6079_v38 }
 0x531   : > { %v6787_v50 = vpop.f32.mrf.mxu1 }
 0x532   : > { %v9325_v56 = vadd.f32 %v6807_v29, %v3730_v43 }
 0x534   : > { %vm3775_vm11 = vcmp.gt.f32.partialorder %v9325_v56, 0.0 }
 0x549   : > { %v6855_v12 = vpop.f32.mrf.mxu0 }
 0x54b   : > { %v6827_v33 = vpop.f32.mrf.mxu1  ;;  %v6856_v46 = vpop.f32.mrf.mxu0 }
 0x54c   : > { %v6857_v36 = vadd.f32 %v6856_v46, %v6855_v12 }
 0x54d   : > { %v6828_v37 = vpop.f32.mrf.mxu1  ;;  %v6858_v35 = vpop.f32.mrf.mxu0 }
 0x54e   : > { %v6829_v9 = vadd.f32 %v6828_v37, %v6827_v33 }
 0x54f   : > { %v6830_v8 = vpop.f32.mrf.mxu1  ;;  %v6859_v4 = vpop.f32.mrf.mxu0 }
 0x550   : > { %v4425_v13 = vadd.f32 %v6829_v9, %v6256_v51  ;;  %v6860_v42 = vadd.f32 %v6859_v4, %v6858_v35 }
 0x551   : > { %v6831_v31 = vpop.f32.mrf.mxu1  ;;  %v6861_v61 = vpop.f32.mrf.mxu0 }
 0x552   : > { %v6832_v59 = vadd.f32 %v6831_v31, %v6830_v8  ;;  %v4474_v45 = vadd.f32 %v6857_v36, %v4425_v13  ;;  %v7608_v36 = vld [vmem:[%s8465_s23 + $0x28] sm:$0xff]   ;;  %v7609_v13 = vld [vmem:[%s8465_s23 + $0x60] sm:$0xff]  }
 0x553   : > { %v6833_v14 = vpop.f32.mrf.mxu1  ;;  %v6862_v7 = vpop.f32.mrf.mxu0 }
 0x554   : > { %v6863_v18 = vadd.f32 %v6862_v7, %v6861_v61  ;;  %v4428_v30 = vadd.f32 %v6832_v59, %v6256_v51  ;;  %v7610_v59 = vld [vmem:[%s8465_s23 + $0x20] sm:$0xff]  }
 0x555   : > { %v6834_v21 = vpop.f32.mrf.mxu1  ;;  %v6864_v11 = vpop.f32.mrf.mxu0 }
 0x556   : > { %v6835_v6 = vadd.f32 %v6834_v21, %v6833_v14  ;;  %v4477_v23 = vadd.f32 %v6860_v42, %v4428_v30  ;;  %v7617_v42 = vld [vmem:[%s8465_s23 + $0x40] sm:$0xff]  }
 0x557   : > { %v6836_v20 = vpop.f32.mrf.mxu1  ;;  %v6865_v19 = vpop.f32.mrf.mxu0 }
 0x558   : > { %v4433_v58 = vadd.f32 %v6835_v6, %v6256_v51  ;;  %v6866_v32 = vadd.f32 %v6865_v19, %v6864_v11  ;;  %v3776_v11 = vmul.f32 0.01, %v9325_v56  ;;  %v7604_v6 = vld [vmem:[%s8465_s23 + $0x38] sm:$0xff]  }
 0x559   : > { %v6837_v2 = vpop.f32.mrf.mxu1 }
 0x55a   : > { %v6838_v60 = vadd.f32 %v6837_v2, %v6836_v20  ;;  %v4482_v52 = vadd.f32 %v6863_v18, %v4433_v58  ;;  %v7607_v58 = vld [vmem:[%s8465_s23 + $0x68] sm:$0xff]   ;;  %v7611_v18 = vld [vmem:[%s8465_s23 + $0x58] sm:$0xff]  }
 0x55c   : > { %v4436_v16 = vadd.f32 %v6838_v60, %v6256_v51  ;;  %v7621_v60 = vld [vmem:[%s8465_s23 + $0xa8] sm:$0xff]  }
 0x55e   : > { %v4485_v38 = vadd.f32 %v6866_v32, %v4436_v16  ;;  %v7614_v16 = vld [vmem:[%s8465_s23 + $0x10] sm:$0xff]  }
 0x569   : > { %v6911_v26 = vpop.f32.mrf.mxu0 }
 0x56b   : > { %v6883_v55 = vpop.f32.mrf.mxu1  ;;  %v6912_v27 = vpop.f32.mrf.mxu0 }
 0x56c   : > { %v6913_v28 = vadd.f32 %v6912_v27, %v6911_v26 }
 0x56d   : > { %v6884_v22 = vpop.f32.mrf.mxu1  ;;  %v6914_v3 = vpop.f32.mrf.mxu0 }
 0x56e   : > { %v6885_v48 = vadd.f32 %v6884_v22, %v6883_v55 }
 0x56f   : > { %v6886_v49 = vpop.f32.mrf.mxu1  ;;  %v6915_v25 = vpop.f32.mrf.mxu0 }
 0x570   : > { %v4523_v24 = vadd.f32 %v6885_v48, %v4474_v45  ;;  %v6916_v8 = vadd.f32 %v6915_v25, %v6914_v3  ;;  %v3777_v25 = vsel %vm3775_vm11, %v9325_v56, %v3776_v11  ;;  %v7606_v56 = vld [vmem:[%s8465_s23 + $0x30] sm:$0xff]   ;;  %v7615_v48 = vld [vmem:[%s8465_s23 + $0x48] sm:$0xff]   ;;  %v2556_v45 = vmul.f32 0.01, %v9184_v47 }
 0x571   : > { %v6887_v5 = vpop.f32.mrf.mxu1  ;;  %v6917_v44 = vpop.f32.mrf.mxu0  ;;  %v5047_v51 = vpack.c.bf16 %v3777_v25, %v3777_v25 }
 0x572   : > { %v6888_v53 = vadd.f32 %v6887_v5, %v6886_v49  ;;  %v4572_v37 = vadd.f32 %v6913_v28, %v4523_v24  ;;  %v7619_v5 = vld [vmem:[%s8465_s23 + $0xb8] sm:$0xff]   ;;  %v2557_v30 = vsel %vm2555_vm13, %v9184_v47, %v2556_v45  ;;  %v7625_v24 = vld [vmem:[%s8465_s23 + $0x88] sm:$0xff]   ;;  %v7626_v47 = vld [vmem:[%s8465_s23 + $0x80] sm:$0xff]  }
 0x573   : > { %v6889_v10 = vpop.f32.mrf.mxu1  ;;  %v6918_v54 = vpop.f32.mrf.mxu0  ;;  %v5046_v32 = vpack.c.bf16 %v2557_v30, %v2557_v30  ;;  %v7631_v28 = vld [vmem:[%s8473_s14 + $0x18] sm:$0xff]  }
 0x574   : > { %v6919_v29 = vadd.f32 %v6918_v54, %v6917_v44  ;;  %v4526_v50 = vadd.f32 %v6888_v53, %v4477_v23  ;;  %v7605_v44 = vld [vmem:[%s8465_s23 + $0x70] sm:$0xff]   ;;  %v7622_v54 = vld [vmem:[%s8465_s23 + $0xa0] sm:$0xff]  }
 0x575   : > { %v6890_v62 = vpop.f32.mrf.mxu1  ;;  %v6920_v17 = vpop.f32.mrf.mxu0  ;;  %v7627_v53 = vld [vmem:[%s8473_s14 + $0x38] sm:$0xff]   ;;  %v7632_v23 = vld [vmem:[%s8473_s14 + $0x10] sm:$0xff]  }
 0x576   : > { %v6891_v39 = vadd.f32 %v6890_v62, %v6889_v10  ;;  %v4575_v21 = vadd.f32 %v6916_v8, %v4526_v50  ;;  %v6393_v50 = vld [vmem:[%s8459_s20 + $0x2] ss:$0 sm:$0xff] }
 0x577   : > { %v6892_v40 = vpop.f32.mrf.mxu1  ;;  %v6921_v15 = vpop.f32.mrf.mxu0 }
 0x578   : > { %v4531_v41 = vadd.f32 %v6891_v39, %v4482_v52  ;;  %v6922_v33 = vadd.f32 %v6921_v15, %v6920_v17  ;;  %v7612_v39 = vld [vmem:[%s8465_s23 + $0x18] sm:$0xff]   ;;  %v7616_v52 = vld [vmem:[%s8465_s23 + $0x8] sm:$0xff]   ;;  %v7618_v17 = vld [vmem:[%s8465_s23] sm:$0xff]  }
 0x579   : > { %v6893_v1 = vpop.f32.mrf.mxu1  ;;  %v7630_v15 = vld [vmem:[%s8473_s14 + $0x20] sm:$0xff]  }
 0x57a   : > { %v6894_v0 = vadd.f32 %v6893_v1, %v6892_v40  ;;  %v4580_v57 = vadd.f32 %v6919_v29, %v4531_v41  ;;  %v7620_v40 = vld [vmem:[%s8465_s23 + $0xb0] sm:$0xff]   ;;  %v7623_v41 = vld [vmem:[%s8465_s23 + $0x98] sm:$0xff]  }
 0x57b   : > { %v7613_v1 = vld [vmem:[%s8465_s23 + $0x50] sm:$0xff]  }
 0x57c   : > { %v4534_v34 = vadd.f32 %v6894_v0, %v4485_v38  ;;  %v7624_v0 = vld [vmem:[%s8465_s23 + $0x90] sm:$0xff]  }
 0x57d   : > { %v7628_v29 = vld [vmem:[%s8473_s14 + $0x30] sm:$0xff]   ;;  %v7629_v38 = vld [vmem:[%s8473_s14 + $0x28] sm:$0xff]  }
 0x57e   : > { %v4583_v31 = vadd.f32 %v6922_v33, %v4534_v34 }
 0x58b   : > { %v7107_v43 = vpop.f32.mrf.mxu1 }
 0x58c   : > { %v4629_v12 = vadd.f32 %v7107_v43, %v4580_v57 }
 0x58d   : > { %v4620_v46 = vpop.f32.mrf.mxu1 }
 0x58e   : > { %v4621_v35 = vadd.f32 %v4620_v46, %v4572_v37  ;;  %v4641_v4 = vmul.f32 0.01, %v4629_v12  ;;  %vm4637_vm8 = vcmp.gt.f32.partialorder %v4629_v12, 0.0 }
 0x58f   : > { %v7108_v14 = vpop.f32.mrf.mxu1 }
 0x590   : > { %v4632_v61 = vadd.f32 %v7108_v14, %v4583_v31  ;;  %v4639_v7 = vmul.f32 0.01, %v4621_v35  ;;  %vm4635_vm9 = vcmp.gt.f32.partialorder %v4621_v35, 0.0  ;;  %v4645_v55 = vsel %vm4637_vm8, %v4629_v12, %v4641_v4 }
 0x591   : > { %v4623_v20 = vpop.f32.mrf.mxu1  ;;  %v4714_v3 = vpack.c.bf16 %v4645_v55, %v4645_v55 }
 0x592   : > { %vm4638_vm10 = vcmp.gt.f32.partialorder %v4632_v61, 0.0  ;;  %v4642_v2 = vmul.f32 0.01, %v4632_v61  ;;  %v4624_v19 = vadd.f32 %v4623_v20, %v4575_v21  ;;  %v4643_v49 = vsel %vm4635_vm9, %v4621_v35, %v4639_v7 }
 0x593   : > { %v4712_v9 = vpack.c.bf16 %v4643_v49, %v4643_v49  ;;  %v6426_v49 = vld [vmem:[%s633_s3] ss:$0 sm:$0xff] }
 0x594   : > { %vm4636_vm12 = vcmp.gt.f32.partialorder %v4624_v19, 0.0  ;;  %v4640_v26 = vmul.f32 0.01, %v4624_v19  ;;  %v4646_v22 = vsel %vm4638_vm10, %v4632_v61, %v4642_v2 }
 0x595   : > { %v4715_v27 = vpack.c.bf16 %v4646_v22, %v4646_v22  ;;  %v7634_v22 = vld [vmem:[%s8473_s14] sm:$0xff]  }
 0x596   : > { %v4644_v10 = vsel %vm4636_vm12, %v4624_v19, %v4640_v26  ;;  %v7633_v26 = vld [vmem:[%s8473_s14 + $0x8] sm:$0xff]  }
 0x597   : > { %4987 = vmatprep.mubr.bf16.mxu1 %v4715_v27  ;;  %v4713_v62 = vpack.c.bf16 %v4644_v10, %v4644_v10 }
 0x598   : > { %4988 = vmatmul.mubr.bf16.vlgmr.msra.gmra.mxu1 %v4714_v3 }
 0x599   : > { %4947 = vmatprep.mubr.bf16.mxu0 %v4713_v62  ;;  %7110 = vmatpush3.bf16.msra.mxu1 %v7619_v5 }
 0x59a   : > { %4948 = vmatmul.mubr.bf16.vlgmr.msra.gmra.mxu0 %v4712_v9  ;;  %7111 = vmatprep.subr.bf16.mxu1 %v9487_v63 }
 0x59b   : > { %6978 = vmatpush3.bf16.msra.mxu0 %v7604_v6  ;;  %5232 = vmatprep.mubr.bf16.mxu0 %v5047_v51 }
 0x59c   : > { %6979 = vmatprep.subr.bf16.mxu0 %v7605_v44  ;;  %7125 = vmatprep.mubr.msk.bf16.mxu1 %vm7989_vm14, %v9487_v63 }
 0x59d   : > { %7112 = vmatpush3.bf16.msra.mxu1 %v7620_v40 }
 0x59e   : > { %7113 = vmatprep.subr.bf16.mxu1 %v9487_v63 }
 0x59f   : > { %6980 = vmatpush3.bf16.msra.mxu0 %v7606_v56 }
 0x5a0   : > { %6981 = vmatprep.subr.bf16.mxu0 %v7607_v58 }
 0x5a1   : > { %7114 = vmatpush3.bf16.msra.mxu1 %v7621_v60 }
 0x5a2   : > { %7115 = vmatprep.subr.bf16.mxu1 %v9487_v63 }
 0x5a3   : > { %6982 = vmatpush3.bf16.msra.mxu0 %v7608_v36 }
 0x5a4   : > { %6983 = vmatprep.subr.bf16.mxu0 %v7609_v13 }
 0x5a5   : > { %7116 = vmatpush3.bf16.msra.mxu1 %v7622_v54 }
 0x5a6   : > { %7117 = vmatprep.subr.bf16.mxu1 %v9487_v63 }
 0x5a7   : > { %6984 = vmatpush3.bf16.msra.mxu0 %v7610_v59 }
 0x5a8   : > { %6985 = vmatprep.subr.bf16.mxu0 %v7611_v18 }
 0x5a9   : > { %7118 = vmatpush3.bf16.msra.mxu1 %v7623_v41 }
 0x5aa   : > { %7119 = vmatprep.subr.bf16.mxu1 %v9487_v63 }
 0x5ab   : > { %6986 = vmatpush3.bf16.msra.mxu0 %v7612_v39 }
 0x5ac   : > { %6987 = vmatprep.subr.bf16.mxu0 %v7613_v1 }
 0x5ad   : > { %7120 = vmatpush3.bf16.msra.mxu1 %v7624_v0 }
 0x5ae   : > { %7121 = vmatprep.subr.bf16.mxu1 %v9487_v63 }
 0x5af   : > { %6988 = vmatpush3.bf16.msra.mxu0 %v7614_v16 }
 0x5b0   : > { %6989 = vmatprep.subr.bf16.mxu0 %v7615_v48 }
 0x5b1   : > { %7122 = vmatpush3.bf16.msra.mxu1 %v7625_v24 }
 0x5b2   : > { %7123 = vmatprep.subr.bf16.mxu1 %v9487_v63 }
 0x5b3   : > { %6990 = vmatpush3.bf16.msra.mxu0 %v7616_v52 }
 0x5b4   : > { %6991 = vmatprep.subr.bf16.mxu0 %v7617_v42 }
 0x5b5   : > { %7124 = vmatpush3.bf16.msra.mxu1 %v7626_v47 }
 0x5b7   : > { %6992 = vmatpush3.bf16.msra.mxu0 %v7618_v17 }
 0x5b8   : > { %7129 = vmatprep.subr.bf16.mxu0 %v9487_v63 }
 0x5ba   : > { %5233 = vmatmul.mubr.bf16.vlgmr.msra.gmra.mxu0 %v5046_v32 }
 0x5bb   : > { %7145 = vmatprep.mubr.msk.bf16.mxu0 %vm7989_vm14, %v9487_v63  ;;  %7130 = vmatpush3.bf16.msra.mxu0 %v7627_v53 }
 0x5bc   : > { %7131 = vmatprep.subr.bf16.mxu0 %v9487_v63 }
 0x5bf   : > { %7132 = vmatpush3.bf16.msra.mxu0 %v7628_v29 }
 0x5c0   : > { %7133 = vmatprep.subr.bf16.mxu0 %v9487_v63 }
 0x5c3   : > { %7134 = vmatpush3.bf16.msra.mxu0 %v7629_v38 }
 0x5c4   : > { %7135 = vmatprep.subr.bf16.mxu0 %v9487_v63 }
 0x5c7   : > { %7136 = vmatpush3.bf16.msra.mxu0 %v7630_v15 }
 0x5c8   : > { %7137 = vmatprep.subr.bf16.mxu0 %v9487_v63 }
 0x5cb   : > { %7138 = vmatpush3.bf16.msra.mxu0 %v7631_v28 }
 0x5cc   : > { %7139 = vmatprep.subr.bf16.mxu0 %v9487_v63 }
 0x5cf   : > { %7140 = vmatpush3.bf16.msra.mxu0 %v7632_v23 }
 0x5d0   : > { %7141 = vmatprep.subr.bf16.mxu0 %v9487_v63 }
 0x5d3   : > { %7142 = vmatpush3.bf16.msra.mxu0 %v7633_v26 }
 0x5d4   : > { %7143 = vmatprep.subr.bf16.mxu0 %v9487_v63  ;;  %v6451_v63 = vld [vmem:[%s650_s12] ss:$0 sm:$0xff] }
 0x5d7   : > { %7144 = vmatpush3.bf16.msra.mxu0 %v7634_v22 }
 0x658   : > { %v6971_v34 = vpop.f32.mrf.mxu1 }
 0x65a   : > { %v6949_v57 = vpop.f32.mrf.mxu0  ;;  %v6972_v43 = vpop.f32.mrf.mxu1 }
 0x65b   : > { %v6973_v35 = vadd.f32 %v6972_v43, %v6971_v34 }
 0x65c   : > { %v6950_v33 = vpop.f32.mrf.mxu0  ;;  %v6974_v12 = vpop.f32.mrf.mxu1 }
 0x65d   : > { %v6951_v37 = vadd.f32 %v6950_v33, %v6949_v57 }
 0x65e   : > { %v6952_v46 = vpop.f32.mrf.mxu0  ;;  %v6975_v8 = vpop.f32.mrf.mxu1 }
 0x65f   : > { %v4950_v31 = vadd.f32 %v6951_v37, %v6393_v50 }
 0x660   : > { %v6953_v4 = vpop.f32.mrf.mxu0 }
 0x661   : > { %v4990_v14 = vadd.f32 %v6973_v35, %v4950_v31 }
 0x663   : > { %vm4995_vm15 = vcmp.gt.f32.partialorder %v4990_v14, 0.0  ;;  %v4996_v61 = vmul.f32 0.01, %v4990_v14 }
 0x665   : > { %v4997_v21 = vsel %vm4995_vm15, %v4990_v14, %v4996_v61 }
 0x666   : > { %v5048_v7 = vpack.c.bf16 %v4997_v21, %v4997_v21 }
 0x668   : > { %7126 = vmatmul.mubr.bf16.vlgmr.msra.gmra.mxu1 %v5048_v7 }
 0x67a   : > { %v6993_v20 = vpop.f32.mrf.mxu0 }
 0x67c   : > { %v6994_v11 = vpop.f32.mrf.mxu0 }
 0x67d   : > { %v6995_v2 = vadd.f32 %v6994_v11, %v6993_v20 }
 0x67e   : > { %v6996_v19 = vpop.f32.mrf.mxu0 }
 0x67f   : > { %v5235_v27 = vadd.f32 %v6995_v2, %v6426_v49 }
 0x680   : > { %v6997_v55 = vpop.f32.mrf.mxu0 }
 0x728   : > { %v5274_v5 = vpop.f32.mrf.mxu1 }
 0x729   : > { %v5275_v3 = vadd.f32 %v5274_v5, %v5235_v27 }
 0x72a   : > { %v7127_v10 = vpop.f32.mrf.mxu1 }
 0x72b   : > { %vm5280_vm0 = vcmp.gt.f32.partialorder %v5275_v3, 0.0  ;;  %v5281_v25 = vmul.f32 0.01, %v5275_v3 }
 0x72c   : > { %v5277_v62 = vpop.f32.mrf.mxu1 }
 0x72d   : > { %v5282_v6 = vsel %vm5280_vm0, %v5275_v3, %v5281_v25 }
 0x72e   : > { %v5299_v9 = vpack.c.bf16 %v5282_v6, %v5282_v6  ;;  %v7128_v44 = vpop.f32.mrf.mxu1 }
 0x730   : > { %7146 = vmatmul.mubr.bf16.vlgmr.msra.gmra.mxu0 %v5299_v9 }
 0x7f0   : > { %v5389_v51 = vpop.f32.mrf.mxu0 }
 0x7f1   : > { %v5390_v40 = vadd.f32 %v6451_v63, %v5389_v51 }
 0x7f2   : > { %v7147_v56 = vpop.f32.mrf.mxu0 }
 0x7f3   : > { %5395 = vst [vmem:[%s734_s11] sm:$0xff] %v5390_v40 }
 0x7f4   : > { %v5392_v58 = vpop.f32.mrf.mxu0 }
 0x7f6   : > { %v7148_v60 = vpop.f32.mrf.mxu0 }
 0x7f7 PF: > { %s9513_s20 = sld [smem:[#allocation27_spill]]  ;;  %s9516_s17 = smov %s7962_s18 }
 0x7f8   : > { %s9514_s23 = sld [smem:[#allocation25_spill]] }
 0x7f9   : > { %s9515_s19 = sld [smem:[#allocation28_spill]] }
 0x7fd   : > { %p36_p6 = scmp.ge.s32.totalorder %s9513_s20, 8  }
 0x7fe   : > { %s9517_s18 = smov %s9514_s23 }
 0x7ff   :  { %38 = sbr.rel (!%p36_p6) target bundleno = 20 (0x14), region = 217 }
 0x804   :  { %5415 = vsyncpa [#allocation4], 1 }
 0x805   :  { %5417 = vsyncpa [#allocation4 + $0x1], 1 }
 0x806   :  { %5418 = vsyncpa [#allocation6], 1 }
 0x807   :  { %5420 = vsyncpa [#allocation6 + $0x1], 1 }
 0x808   :  { %5421 = vsyncpa [#allocation9], 1 }
 0x809   :  { %5423 = vsyncpa [#allocation9 + $0x1], 1 }
 0x80a   :  { %5424 = vsyncpa [#allocation12], 1 }
 0x80b   :  { %5426 = vsyncpa [#allocation12 + $0x1], 1 }
 0x80c   :  { %5427 = vsyncpa [#allocation15], 1 }
 0x80d   :  { %5429 = vsyncpa [#allocation15 + $0x1], 1 }
 0x80e   :  { %5430 = vsyncpa [#allocation18], 1 }
 0x80f   :  { %5432 = vsyncpa [#allocation18 + $0x1], 1 }

</bundles_post_ra>
